<compile_context>
chip_gen: v6e
topology: v6e:2x2x1
jax: 0.10.0
libtpu: 0.0.40
codegen_flags: <defaults>
</compile_context>

<pallas_src>
import functools

import jax
import jax.numpy as jnp
from jax import lax
from jax.experimental import pallas as pl
from jax.experimental.pallas import tpu as pltpu

EPS = 1e-6  # norm_layer = partial(nn.LayerNorm, eps=1e-6)


# ---------------------------------------------------------------------------
# Small host-side helpers
# ---------------------------------------------------------------------------
def _round_up(n, m):
    return ((n + m - 1) // m) * m


def _vmem_limit_bytes():
    """Generation-aware VMEM budget (~85% of per-core physical VMEM)."""
    try:
        cap = pltpu.get_tpu_info().vmem_capacity_bytes
    except Exception:
        cap = 64 * 1024 * 1024  # conservative (v7x-sized) fallback
    return int(0.85 * cap)


def _const_spec(shape):
    """BlockSpec for an operand whose block index is constant across the grid.

    Single-buffered (pl.Buffered(1)) so resident weights are not doubled;
    falls back to a plain BlockSpec if pipeline_mode is unavailable.
    """
    nd = len(shape)
    idx = lambda *_a, _nd=nd: (0,) * _nd
    try:
        return pl.BlockSpec(shape, idx, pipeline_mode=pl.Buffered(1))
    except Exception:
        return pl.BlockSpec(shape, idx)


# ---------------------------------------------------------------------------
# In-kernel helpers (pure jnp/lax + pl, traced inside Pallas kernel bodies)
# ---------------------------------------------------------------------------
def _layernorm(x, g, b):
    # x: (M, C) fp32, g/b: (1, C) fp32
    m = jnp.mean(x, axis=-1, keepdims=True)
    v = jnp.mean((x - m) ** 2, axis=-1, keepdims=True)
    return (x - m) * lax.rsqrt(v + EPS) * g + b


def _erf(x):
    # Abramowitz & Stegun 7.1.26 polynomial approximation built from
    # exp/mul/add + an EUP reciprocal so it always lowers on the TPU VPU/EUP.
    # The approx reciprocal keeps the effective GELU error at ~1e-4 level,
    # which is within the bf16-matmul noise of the rest of the pipeline.
    a1, a2, a3, a4, a5 = (0.254829592, -0.284496736, 1.421413741,
                          -1.453152027, 1.061405429)
    p = 0.3275911
    sign = jnp.where(x >= 0.0, 1.0, -1.0)
    ax = jnp.abs(x)
    t = pl.reciprocal(1.0 + p * ax, approx=True)
    poly = ((((a5 * t + a4) * t + a3) * t + a2) * t + a1) * t
    y = 1.0 - poly * jnp.exp(-ax * ax)
    return sign * y


def _gelu(x):
    # erf-based GELU, as used by nn.GELU()
    return 0.5 * x * (1.0 + _erf(x * 0.7071067811865476))


# ---------------------------------------------------------------------------
# Pallas kernels
# ---------------------------------------------------------------------------
def patch_embed_kernel(p_ref, w_ref, b_ref, o_ref):
    # p: (TM, patch_dim) bf16, w: (patch_dim, C) bf16, b: (1, C) f32
    o_ref[...] = (
        jnp.dot(p_ref[...], w_ref[...], preferred_element_type=jnp.float32)
        + b_ref[...]
    )


def cls_ln_kernel(x_ref, g_ref, b_ref, o_ref):
    # x: (B, C) fp32 -> final LayerNorm on the cls rows only
    o_ref[...] = _layernorm(x_ref[...], g_ref[...], b_ref[...])


def block_kernel(*refs, num_heads, add_pos, n_valid, hidden_chunk):
    """One transformer block (pre-LN MHSA + pre-LN MLP) for TB batch rows.

    Weights (wqkv/wo/w1/w2) are bf16; biases / LN params fp32.  All
    elementwise math (LayerNorm, softmax, GELU, residuals) stays fp32; only
    matmul operands are bf16 with fp32 accumulation.  Pad key columns
    (index >= n_valid) are masked so padded tokens never affect valid ones.
    """
    if add_pos:
        (x_ref, pos_ref, ln1_g, ln1_b, wqkv, bqkv, wo, bo,
         ln2_g, ln2_b, w1, b1, w2, b2, o_ref, attn_ctx) = refs
    else:
        (x_ref, ln1_g, ln1_b, wqkv, bqkv, wo, bo,
         ln2_g, ln2_b, w1, b1, w2, b2, o_ref, attn_ctx) = refs
        pos_ref = None

    x = x_ref[...]                             # (TB, N, C) fp32
    if add_pos:
        x = x + pos_ref[...]                   # pos-embed add fused in

    TB, N, C = x.shape
    M = TB * N
    hd = C // num_heads
    scale = hd ** (-0.5)

    x2 = x.reshape(M, C)

    # --- attention branch --------------------------------------------------
    h = _layernorm(x2, ln1_g[...], ln1_b[...])
    qkv = (jnp.dot(h.astype(jnp.bfloat16), wqkv[...],
                   preferred_element_type=jnp.float32) + bqkv[...])   # (M, 3C)

    # scale folded into q (touches C lanes once instead of every score row)
    q = (qkv[:, 0 * C:1 * C] * scale).astype(jnp.bfloat16).reshape(TB, N, C)
    k = qkv[:, 1 * C:2 * C].astype(jnp.bfloat16).reshape(TB, N, C)
    v = qkv[:, 2 * C:3 * C].astype(jnp.bfloat16).reshape(TB, N, C)

    if n_valid < N:
        key_idx = lax.broadcasted_iota(jnp.int32, (1, 1, N), 2)
        kbias = jnp.where(key_idx < n_valid, 0.0, -1e30).astype(jnp.float32)
    else:
        kbias = None

    # per-head attention on contiguous lane slices; each head writes its
    # context directly into a VMEM scratch lane slice (no lane-axis concat)
    for hh in range(num_heads):
        sl = slice(hh * hd, (hh + 1) * hd)
        s = jnp.einsum("bnd,bmd->bnm", q[:, :, sl], k[:, :, sl],
                       preferred_element_type=jnp.float32)            # fp32
        if kbias is not None:
            s = s + kbias
        s = s - jnp.max(s, axis=-1, keepdims=True)
        p = jnp.exp(s)
        p = p * pl.reciprocal(jnp.sum(p, axis=-1, keepdims=True), approx=True)
        attn_ctx[:, :, sl] = jnp.einsum(
            "bnm,bmd->bnd", p.astype(jnp.bfloat16), v[:, :, sl],
            preferred_element_type=jnp.float32)

    o = attn_ctx[...].reshape(M, C)                                    # fp32
    x2 = x2 + (jnp.dot(o.astype(jnp.bfloat16), wo[...],
                       preferred_element_type=jnp.float32) + bo[...])  # resid

    # --- MLP branch (tiled over the hidden dimension) ------------------------
    h2 = _layernorm(x2, ln2_g[...], ln2_b[...]).astype(jnp.bfloat16)
    hidden = w1.shape[1]
    out = x2 + b2[...]
    for t0 in range(0, hidden, hidden_chunk):
        t1 = t0 + hidden_chunk
        m = (jnp.dot(h2, w1[:, t0:t1], preferred_element_type=jnp.float32)
             + b1[:, t0:t1])
        m = _gelu(m)
        out = out + jnp.dot(m.astype(jnp.bfloat16), w2[t0:t1, :],
                            preferred_element_type=jnp.float32)

    o_ref[...] = out.reshape(TB, N, C)


# ---------------------------------------------------------------------------
# Tiling helpers
# ---------------------------------------------------------------------------
def _pick_hidden_chunk(hidden, target=512):
    """Largest multiple-of-128 chunk <= target that divides hidden."""
    if hidden <= target:
        return hidden
    for hc in range(target, 127, -128):
        if hidden % hc == 0:
            return hc
    return hidden


def _block_weight_bytes(blk_params):
    return sum(int(p.size) * p.dtype.itemsize for p in blk_params.values())


def _block_tb_bytes(tb, N, C, hidden_chunk):
    """Rough per-step VMEM use (excluding resident weights) for TB rows."""
    M = tb * N
    tok = M * C * 4
    io = 2 * 2 * tok                                # in + out, double-buffered
    inter = M * (3 * C + 3 * C + hidden_chunk + C) * 4   # qkv, q/k/v, mlp chunk
    scores = tb * N * N * 4 * 3                     # one head's score temporaries
    scratch = tok                                   # attention context scratch
    return io + inter + scores + scratch


def _pick_tb(B, N, C, hidden_chunk, weight_bytes, vmem_limit, max_tb=8):
    """Batch rows per grid step under the VMEM budget; prefer >=2 grid steps
    so both v7x TensorCores get work (harmless serial loop on v5e/v6e)."""
    budget = int(0.8 * vmem_limit) - weight_bytes
    cands = [tb for tb in range(1, min(max_tb, B) + 1)
             if B % tb == 0 and _block_tb_bytes(tb, N, C, hidden_chunk) <= budget]
    if not cands:
        cands = [1]
    two_step = [tb for tb in cands if B // tb >= 2]
    pool = two_step if two_step else cands
    return max(pool)


# ---------------------------------------------------------------------------
# pallas_call wrappers
# ---------------------------------------------------------------------------
def patch_embed_call(patches_bf16, w_bf16, b):
    M, P = patches_bf16.shape
    C = w_bf16.shape[1]
    vmem_limit = _vmem_limit_bytes()
    target = 1024 if vmem_limit >= 96 * 1024 * 1024 else 512
    TM = _round_up(M, 8) if M <= target else target
    M_pad = _round_up(M, TM)
    if M_pad != M:
        patches_bf16 = jnp.pad(patches_bf16, ((0, M_pad - M), (0, 0)))

    out = pl.pallas_call(
        patch_embed_kernel,
        out_shape=jax.ShapeDtypeStruct((M_pad, C), jnp.float32),
        grid=(M_pad // TM,),
        in_specs=[
            pl.BlockSpec((TM, P), lambda i: (i, 0)),
            _const_spec((P, C)),
            _const_spec((1, C)),
        ],
        out_specs=pl.BlockSpec((TM, C), lambda i: (i, 0)),
        compiler_params=pltpu.CompilerParams(dimension_semantics=("parallel",)),
    )(patches_bf16, w_bf16, b)
    return out[:M]


def cls_layernorm_call(x, g, b):
    # x: (B, C) fp32 -- only the cls rows are normalised / written back.
    B, C = x.shape
    return pl.pallas_call(
        cls_ln_kernel,
        out_shape=jax.ShapeDtypeStruct((B, C), jnp.float32),
        grid=(1,),
        in_specs=[
            pl.BlockSpec((B, C), lambda i: (0, 0)),
            pl.BlockSpec((1, C), lambda i: (0, 0)),
            pl.BlockSpec((1, C), lambda i: (0, 0)),
        ],
        out_specs=pl.BlockSpec((B, C), lambda i: (0, 0)),
    )(x, g, b)


BLOCK_PARAM_ORDER = ("ln1_g", "ln1_b", "wqkv", "bqkv", "wo", "bo",
                     "ln2_g", "ln2_b", "w1", "b1", "w2", "b2")


def block_call(tokens, blk_params, num_heads, n_valid, pos=None):
    B, N, C = tokens.shape
    hidden = blk_params["w1"].shape[1]
    hidden_chunk = _pick_hidden_chunk(hidden)
    vmem_limit = _vmem_limit_bytes()
    weight_bytes = _block_weight_bytes(blk_params)
    TB = _pick_tb(B, N, C, hidden_chunk, weight_bytes, vmem_limit)
    grid = (B // TB,)
    add_pos = pos is not None

    inputs = [tokens]
    in_specs = [pl.BlockSpec((TB, N, C), lambda b: (b, 0, 0))]
    if add_pos:
        inputs.append(pos)
        in_specs.append(_const_spec((1, N, C)))
    for key in BLOCK_PARAM_ORDER:
        p = blk_params[key]
        inputs.append(p)
        in_specs.append(_const_spec(p.shape))

    return pl.pallas_call(
        functools.partial(block_kernel, num_heads=num_heads, add_pos=add_pos,
                          n_valid=n_valid, hidden_chunk=hidden_chunk),
        out_shape=jax.ShapeDtypeStruct((B, N, C), jnp.float32),
        grid=grid,
        in_specs=in_specs,
        out_specs=pl.BlockSpec((TB, N, C), lambda b: (b, 0, 0)),
        scratch_shapes=[pltpu.VMEM((TB, N, C), jnp.float32)],
        compiler_params=pltpu.CompilerParams(
            dimension_semantics=("parallel",),
            vmem_limit_bytes=vmem_limit),
    )(*inputs)


# ---------------------------------------------------------------------------
# Model glue (parameter init + forward)
# ---------------------------------------------------------------------------
def extract_patches(x, ph, pw):
    # x: (B, C, H, W) NCHW -> (B, num_patches, C*ph*pw); patch ordering and
    # per-patch (c, i, j) flattening match Conv2d(kernel=stride=patch).
    B, C, H, W = x.shape
    Hg, Wg = H // ph, W // pw
    x = x.reshape(B, C, Hg, ph, Wg, pw)
    x = x.transpose(0, 2, 4, 1, 3, 5)       # (B, Hg, Wg, C, ph, pw)
    return x.reshape(B, Hg * Wg, C * ph * pw)


def init_params(key, *, in_chans, patch_size, img_size, embed_dim, depth,
                num_heads, mlp_ratio):
    del num_heads
    num_patches = (img_size // patch_size) ** 2
    patch_dim = in_chans * patch_size * patch_size
    hidden = int(embed_dim * mlp_ratio)
    keys = jax.random.split(key, 3 + depth)

    def tn(k, shape):  # deterministic, synthetic stand-in for trunc_normal_
        return (0.02 * jax.random.normal(k, shape)).astype(jnp.float32)

    def tn_bf16(k, shape):  # matmul weights are stored in bf16 for the MXU
        return tn(k, shape).astype(jnp.bfloat16)

    params = {
        "patch_w": tn_bf16(keys[0], (patch_dim, embed_dim)),
        "patch_b": jnp.zeros((1, embed_dim), jnp.float32),
        "cls_token": tn(keys[1], (1, 1, embed_dim)),
        "pos_embed": tn(keys[2], (1, num_patches + 1, embed_dim)),
        "norm_g": jnp.ones((1, embed_dim), jnp.float32),
        "norm_b": jnp.zeros((1, embed_dim), jnp.float32),
        "blocks": [],
    }
    for i in range(depth):
        bk = jax.random.split(keys[3 + i], 4)
        params["blocks"].append({
            "ln1_g": jnp.ones((1, embed_dim), jnp.float32),
            "ln1_b": jnp.zeros((1, embed_dim), jnp.float32),
            # fused q/k/v projection (Linear(dim, 3*dim), qkv_bias=True)
            "wqkv": tn_bf16(bk[0], (embed_dim, 3 * embed_dim)),
            "bqkv": jnp.zeros((1, 3 * embed_dim), jnp.float32),
            "wo": tn_bf16(bk[1], (embed_dim, embed_dim)),
            "bo": jnp.zeros((1, embed_dim), jnp.float32),
            "ln2_g": jnp.ones((1, embed_dim), jnp.float32),
            "ln2_b": jnp.zeros((1, embed_dim), jnp.float32),
            "w1": tn_bf16(bk[2], (embed_dim, hidden)),
            "b1": jnp.zeros((1, hidden), jnp.float32),
            "w2": tn_bf16(bk[3], (hidden, embed_dim)),
            "b2": jnp.zeros((1, embed_dim), jnp.float32),
        })
    return params


def vit_forward(x, params, *, patch_size, num_heads, depth):
    # Dropout / DropPath are identity (rates 0 / eval mode) and are omitted.
    # TODO(synk): bicubic pos-embed interpolation path is not needed here
    # (input spatial size == img_size), so it is not implemented.
    B = x.shape[0]
    patches = extract_patches(x, patch_size, patch_size)        # (B, Np, P)
    Np, P = patches.shape[1], patches.shape[2]
    C = params["patch_w"].shape[1]

    flat = patches.reshape(B * Np, P).astype(jnp.bfloat16)
    tok = patch_embed_call(flat, params["patch_w"], params["patch_b"])
    tok = tok.reshape(B, Np, C)

    cls = jnp.broadcast_to(params["cls_token"], (B, 1, C))
    tokens = jnp.concatenate([cls, tok], axis=1)                 # (B, n_valid, C)

    # pad token count to a sublane multiple of 8; pad keys are masked in-kernel
    n_valid = Np + 1
    n_pad = _round_up(n_valid, 8)
    if n_pad != n_valid:
        tokens = jnp.pad(tokens, ((0, 0), (0, n_pad - n_valid), (0, 0)))
        pos = jnp.pad(params["pos_embed"],
                      ((0, 0), (0, n_pad - n_valid), (0, 0)))
    else:
        pos = params["pos_embed"]

    # pos-embed add is fused into the first block kernel (no extra HBM pass)
    for i in range(depth):
        tokens = block_call(tokens, params["blocks"][i], num_heads, n_valid,
                            pos=pos if i == 0 else None)

    # Final LayerNorm only on the cls row (that is all the forward returns).
    cls_rows = tokens[:, 0, :]                                   # (B, C)
    return cls_layernorm_call(cls_rows, params["norm_g"], params["norm_b"])


# ---------------------------------------------------------------------------
if __name__ == "__main__":
    B, in_chans, img_size, patch_size = 2, 3, 16, 8
    embed_dim, depth, num_heads, mlp_ratio = 128, 2, 4, 4.0

    key = jax.random.PRNGKey(0)
    kx, kp = jax.random.split(key)
    x = jax.random.normal(kx, (B, in_chans, img_size, img_size), jnp.float32)
    params = init_params(kp, in_chans=in_chans, patch_size=patch_size,
                         img_size=img_size, embed_dim=embed_dim, depth=depth,
                         num_heads=num_heads, mlp_ratio=mlp_ratio)

    fwd = jax.jit(functools.partial(vit_forward, patch_size=patch_size,
                                    num_heads=num_heads, depth=depth))
    out = fwd(x, params)
    jax.block_until_ready(out)
    assert out.shape == (B, embed_dim), out.shape
    assert bool(jnp.all(jnp.isfinite(out)))
    print("KERNEL_OK")
</pallas_src>

<mosaic_0001>
module attributes {stable_mosaic.version = 11 : i64} {
  func.func @patch_embed_kernel(%arg0: i32, %arg1: memref<8x192xbf16, #tpu.memory_space<vmem>>, %arg2: memref<192x128xbf16, #tpu.memory_space<vmem>>, %arg3: memref<1x128xf32, #tpu.memory_space<vmem>>, %arg4: memref<8x128xf32, #tpu.memory_space<vmem>>) attributes {dimension_semantics = [#tpu.dimension_semantics<parallel>], iteration_bounds = array<i64: 1>, scalar_prefetch = 0 : i64, scratch_operands = 0 : i64, tpu.core_type = #tpu.core_type<tc>, window_params = [{transform_indices = @transform_0, window_bounds = array<i64: 8, 192>}, {pipeline_mode = #tpu.pipeline_mode<synchronous>, transform_indices = @transform_1, window_bounds = array<i64: 192, 128>}, {pipeline_mode = #tpu.pipeline_mode<synchronous>, transform_indices = @transform_2, window_bounds = array<i64: 1, 128>}, {transform_indices = @transform_3, window_bounds = array<i64: 8, 128>}]} {
    %c0 = arith.constant 0 : index
    %c0_0 = arith.constant 0 : index
    %0 = vector.load %arg1[%c0, %c0_0] : memref<8x192xbf16, #tpu.memory_space<vmem>>, vector<8x192xbf16>
    %c0_1 = arith.constant 0 : index
    %c0_2 = arith.constant 0 : index
    %1 = vector.load %arg2[%c0_1, %c0_2] : memref<192x128xbf16, #tpu.memory_space<vmem>>, vector<192x128xbf16>
    %cst = arith.constant dense<0.000000e+00> : vector<8x128xf32>
    %2 = tpu.matmul %0, %1, %cst {dimension_numbers = #tpu.dot_dimension_numbers<[1], [0], [0], [1], [0, 0, 1, 1], [], []>} : vector<8x192xbf16>, vector<192x128xbf16>, vector<8x128xf32> -> vector<8x128xf32>
    %c0_3 = arith.constant 0 : index
    %c0_4 = arith.constant 0 : index
    %3 = vector.load %arg3[%c0_3, %c0_4] : memref<1x128xf32, #tpu.memory_space<vmem>>, vector<1x128xf32>
    %4 = vector.broadcast %3 : vector<1x128xf32> to vector<8x128xf32>
    %5 = arith.addf %2, %4 : vector<8x128xf32>
    %c0_5 = arith.constant 0 : index
    %c0_6 = arith.constant 0 : index
    %6 = vector.load %arg4[%c0_5, %c0_6] : memref<8x128xf32, #tpu.memory_space<vmem>>, vector<8x128xf32>
    tpu.vector_store %arg4[%c0_5, %c0_6], %5 {strides = array<i32>} : memref<8x128xf32, #tpu.memory_space<vmem>>, vector<8x128xf32>,
    return
  }
  func.func @transform_0(%arg0: i32) -> (i32, i32) {
    %c0_i32 = arith.constant 0 : i32
    %c0_i32_0 = arith.constant 0 : i32
    return %arg0, %c0_i32 : i32, i32
  }
  func.func @transform_1(%arg0: i32) -> (i32, i32) {
    %c0_i32 = arith.constant 0 : i32
    %c0_i32_0 = arith.constant 0 : i32
    %c0_i32_1 = arith.constant 0 : i32
    return %c0_i32, %c0_i32_0 : i32, i32
  }
  func.func @transform_2(%arg0: i32) -> (i32, i32) {
    %c0_i32 = arith.constant 0 : i32
    %c0_i32_0 = arith.constant 0 : i32
    %c0_i32_1 = arith.constant 0 : i32
    return %c0_i32, %c0_i32_0 : i32, i32
  }
  func.func @transform_3(%arg0: i32) -> (i32, i32) {
    %c0_i32 = arith.constant 0 : i32
    %c0_i32_0 = arith.constant 0 : i32
    return %arg0, %c0_i32 : i32, i32
  }
}

module attributes {stable_mosaic.version = 11 : i64} {
  func.func @block_kernel(%arg0: i32, %arg1: memref<1x8x128xf32, #tpu.memory_space<vmem>>, %arg2: memref<1x8x128xf32, #tpu.memory_space<vmem>>, %arg3: memref<1x128xf32, #tpu.memory_space<vmem>>, %arg4: memref<1x128xf32, #tpu.memory_space<vmem>>, %arg5: memref<128x384xbf16, #tpu.memory_space<vmem>>, %arg6: memref<1x384xf32, #tpu.memory_space<vmem>>, %arg7: memref<128x128xbf16, #tpu.memory_space<vmem>>, %arg8: memref<1x128xf32, #tpu.memory_space<vmem>>, %arg9: memref<1x128xf32, #tpu.memory_space<vmem>>, %arg10: memref<1x128xf32, #tpu.memory_space<vmem>>, %arg11: memref<128x512xbf16, #tpu.memory_space<vmem>>, %arg12: memref<1x512xf32, #tpu.memory_space<vmem>>, %arg13: memref<512x128xbf16, #tpu.memory_space<vmem>>, %arg14: memref<1x128xf32, #tpu.memory_space<vmem>>, %arg15: memref<1x8x128xf32, #tpu.memory_space<vmem>>, %arg16: memref<1x8x128xf32, #tpu.memory_space<vmem>>) attributes {dimension_semantics = [#tpu.dimension_semantics<parallel>], iteration_bounds = array<i64: 2>, scalar_prefetch = 0 : i64, scratch_operands = 1 : i64, tpu.core_type = #tpu.core_type<tc>, window_params = [{transform_indices = @transform_0, window_bounds = array<i64: 1, 8, 128>}, {pipeline_mode = #tpu.pipeline_mode<synchronous>, transform_indices = @transform_1, window_bounds = array<i64: 1, 8, 128>}, {pipeline_mode = #tpu.pipeline_mode<synchronous>, transform_indices = @transform_2, window_bounds = array<i64: 1, 128>}, {pipeline_mode = #tpu.pipeline_mode<synchronous>, transform_indices = @transform_3, window_bounds = array<i64: 1, 128>}, {pipeline_mode = #tpu.pipeline_mode<synchronous>, transform_indices = @transform_4, window_bounds = array<i64: 128, 384>}, {pipeline_mode = #tpu.pipeline_mode<synchronous>, transform_indices = @transform_5, window_bounds = array<i64: 1, 384>}, {pipeline_mode = #tpu.pipeline_mode<synchronous>, transform_indices = @transform_6, window_bounds = array<i64: 128, 128>}, {pipeline_mode = #tpu.pipeline_mode<synchronous>, transform_indices = @transform_7, window_bounds = array<i64: 1, 128>}, {pipeline_mode = #tpu.pipeline_mode<synchronous>, transform_indices = @transform_8, window_bounds = array<i64: 1, 128>}, {pipeline_mode = #tpu.pipeline_mode<synchronous>, transform_indices = @transform_9, window_bounds = array<i64: 1, 128>}, {pipeline_mode = #tpu.pipeline_mode<synchronous>, transform_indices = @transform_10, window_bounds = array<i64: 128, 512>}, {pipeline_mode = #tpu.pipeline_mode<synchronous>, transform_indices = @transform_11, window_bounds = array<i64: 1, 512>}, {pipeline_mode = #tpu.pipeline_mode<synchronous>, transform_indices = @transform_12, window_bounds = array<i64: 512, 128>}, {pipeline_mode = #tpu.pipeline_mode<synchronous>, transform_indices = @transform_13, window_bounds = array<i64: 1, 128>}, {transform_indices = @transform_14, window_bounds = array<i64: 1, 8, 128>}]} {
    %c0 = arith.constant 0 : index
    %c0_0 = arith.constant 0 : index
    %c0_1 = arith.constant 0 : index
    %0 = vector.load %arg1[%c0, %c0_0, %c0_1] : memref<1x8x128xf32, #tpu.memory_space<vmem>>, vector<1x8x128xf32>
    %c0_2 = arith.constant 0 : index
    %c0_3 = arith.constant 0 : index
    %c0_4 = arith.constant 0 : index
    %1 = vector.load %arg2[%c0_2, %c0_3, %c0_4] : memref<1x8x128xf32, #tpu.memory_space<vmem>>, vector<1x8x128xf32>
    %2 = arith.addf %0, %1 : vector<1x8x128xf32>
    %3 = vector.shape_cast %2 : vector<1x8x128xf32> to vector<8x128xf32>
    %c0_5 = arith.constant 0 : index
    %c0_6 = arith.constant 0 : index
    %4 = vector.load %arg3[%c0_5, %c0_6] : memref<1x128xf32, #tpu.memory_space<vmem>>, vector<1x128xf32>
    %c0_7 = arith.constant 0 : index
    %c0_8 = arith.constant 0 : index
    %5 = vector.load %arg4[%c0_7, %c0_8] : memref<1x128xf32, #tpu.memory_space<vmem>>, vector<1x128xf32>
    %cst = arith.constant dense<0.000000e+00> : vector<8xf32>
    %6 = vector.multi_reduction <add>, %3, %cst [1] : vector<8x128xf32> to vector<8xf32>
    %7 = vector.shape_cast %6 : vector<8xf32> to vector<8x1xf32>
    %cst_9 = arith.constant 1.280000e+02 : f32
    %8 = vector.broadcast %cst_9 : f32 to vector<8x1xf32>
    %9 = arith.divf %7, %8 : vector<8x1xf32>
    %10 = vector.broadcast %9 : vector<8x1xf32> to vector<8x128xf32>
    %11 = arith.subf %3, %10 : vector<8x128xf32>
    %12 = arith.mulf %11, %11 : vector<8x128xf32>
    %cst_10 = arith.constant dense<0.000000e+00> : vector<8xf32>
    %13 = vector.multi_reduction <add>, %12, %cst_10 [1] : vector<8x128xf32> to vector<8xf32>
    %14 = vector.shape_cast %13 : vector<8xf32> to vector<8x1xf32>
    %cst_11 = arith.constant 1.280000e+02 : f32
    %15 = vector.broadcast %cst_11 : f32 to vector<8x1xf32>
    %16 = arith.divf %14, %15 : vector<8x1xf32>
    %17 = vector.broadcast %9 : vector<8x1xf32> to vector<8x128xf32>
    %18 = arith.subf %3, %17 : vector<8x128xf32>
    %cst_12 = arith.constant 9.99999997E-7 : f32
    %19 = vector.broadcast %cst_12 : f32 to vector<8x1xf32>
    %20 = arith.addf %16, %19 : vector<8x1xf32>
    %21 = math.rsqrt %20 : vector<8x1xf32>
    %22 = vector.broadcast %21 : vector<8x1xf32> to vector<8x128xf32>
    %23 = arith.mulf %18, %22 : vector<8x128xf32>
    %24 = vector.broadcast %4 : vector<1x128xf32> to vector<8x128xf32>
    %25 = arith.mulf %23, %24 : vector<8x128xf32>
    %26 = vector.broadcast %5 : vector<1x128xf32> to vector<8x128xf32>
    %27 = arith.addf %25, %26 : vector<8x128xf32>
    %28 = arith.truncf %27 : vector<8x128xf32> to vector<8x128xbf16>
    %c0_13 = arith.constant 0 : index
    %c0_14 = arith.constant 0 : index
    %29 = vector.load %arg5[%c0_13, %c0_14] : memref<128x384xbf16, #tpu.memory_space<vmem>>, vector<128x384xbf16>
    %cst_15 = arith.constant dense<0.000000e+00> : vector<8x384xf32>
    %30 = tpu.matmul %28, %29, %cst_15 {dimension_numbers = #tpu.dot_dimension_numbers<[1], [0], [0], [1], [0, 0, 1, 1], [], []>} : vector<8x128xbf16>, vector<128x384xbf16>, vector<8x384xf32> -> vector<8x384xf32>
    %c0_16 = arith.constant 0 : index
    %c0_17 = arith.constant 0 : index
    %31 = vector.load %arg6[%c0_16, %c0_17] : memref<1x384xf32, #tpu.memory_space<vmem>>, vector<1x384xf32>
    %32 = vector.broadcast %31 : vector<1x384xf32> to vector<8x384xf32>
    %33 = arith.addf %30, %32 : vector<8x384xf32>
    %34 = vector.extract_strided_slice %33 {offsets = [0, 0], sizes = [8, 128], strides = [1, 1]} : vector<8x384xf32> to vector<8x128xf32>
    %cst_18 = arith.constant 0.176776692 : f32
    %35 = vector.broadcast %cst_18 : f32 to vector<8x128xf32>
    %36 = arith.mulf %34, %35 : vector<8x128xf32>
    %37 = arith.truncf %36 : vector<8x128xf32> to vector<8x128xbf16>
    %38 = vector.shape_cast %37 : vector<8x128xbf16> to vector<1x8x128xbf16>
    %39 = vector.extract_strided_slice %33 {offsets = [0, 128], sizes = [8, 128], strides = [1, 1]} : vector<8x384xf32> to vector<8x128xf32>
    %40 = arith.truncf %39 : vector<8x128xf32> to vector<8x128xbf16>
    %41 = vector.shape_cast %40 : vector<8x128xbf16> to vector<1x8x128xbf16>
    %42 = vector.extract_strided_slice %33 {offsets = [0, 256], sizes = [8, 128], strides = [1, 1]} : vector<8x384xf32> to vector<8x128xf32>
    %43 = arith.truncf %42 : vector<8x128xf32> to vector<8x128xbf16>
    %44 = vector.shape_cast %43 : vector<8x128xbf16> to vector<1x8x128xbf16>
    %45 = tpu.iota {dimensions = array<i32: 2>} : vector<1x1x8xi32>
    %c5_i32 = arith.constant 5 : i32
    %46 = vector.broadcast %c5_i32 : i32 to vector<1x1x8xi32>
    %47 = arith.cmpi slt, %45, %46 : vector<1x1x8xi32>
    %cst_19 = arith.constant 0.000000e+00 : f32
    %cst_20 = arith.constant -1.000000e+30 : f32
    %48 = vector.broadcast %cst_19 : f32 to vector<1x1x8xf32>
    %49 = vector.broadcast %cst_20 : f32 to vector<1x1x8xf32>
    %50 = arith.select %47, %48, %49 : vector<1x1x8xi1>, vector<1x1x8xf32>
    %51 = vector.extract_strided_slice %38 {offsets = [0, 0, 0], sizes = [1, 8, 32], strides = [1, 1, 1]} : vector<1x8x128xbf16> to vector<1x8x32xbf16>
    %52 = vector.extract_strided_slice %41 {offsets = [0, 0, 0], sizes = [1, 8, 32], strides = [1, 1, 1]} : vector<1x8x128xbf16> to vector<1x8x32xbf16>
    "tpu.trace_start"() <{level = 10 : i32, message = "bnd,bmd->bnm"}> : () -> ()
    %cst_21 = arith.constant dense<0.000000e+00> : vector<1x8x8xf32>
    %53 = tpu.matmul %51, %52, %cst_21 {dimension_numbers = #tpu.dot_dimension_numbers<[2], [2], [1], [1], [0, 0, 0, 1, 1, 1], [0], [0]>} : vector<1x8x32xbf16>, vector<1x8x32xbf16>, vector<1x8x8xf32> -> vector<1x8x8xf32>
    "tpu.trace_stop"() : () -> ()
    %54 = vector.broadcast %50 : vector<1x1x8xf32> to vector<1x8x8xf32>
    %55 = arith.addf %53, %54 : vector<1x8x8xf32>
    %cst_22 = arith.constant dense<0xFF800000> : vector<1x8xf32>
    %56 = vector.multi_reduction <maximumf>, %55, %cst_22 [2] : vector<1x8x8xf32> to vector<1x8xf32>
    %57 = vector.shape_cast %56 : vector<1x8xf32> to vector<1x8x1xf32>
    %58 = vector.broadcast %57 : vector<1x8x1xf32> to vector<1x8x8xf32>
    %59 = arith.subf %55, %58 : vector<1x8x8xf32>
    %60 = math.exp %59 : vector<1x8x8xf32>
    %cst_23 = arith.constant dense<0.000000e+00> : vector<1x8xf32>
    %61 = vector.multi_reduction <add>, %60, %cst_23 [2] : vector<1x8x8xf32> to vector<1x8xf32>
    %62 = vector.shape_cast %61 : vector<1x8xf32> to vector<1x8x1xf32>
    %63 = tpu.reciprocal %62 {approx = true} : vector<1x8x1xf32> -> vector<1x8x1xf32>
    %64 = vector.broadcast %63 : vector<1x8x1xf32> to vector<1x8x8xf32>
    %65 = arith.mulf %60, %64 : vector<1x8x8xf32>
    %66 = arith.truncf %65 : vector<1x8x8xf32> to vector<1x8x8xbf16>
    %67 = vector.extract_strided_slice %44 {offsets = [0, 0, 0], sizes = [1, 8, 32], strides = [1, 1, 1]} : vector<1x8x128xbf16> to vector<1x8x32xbf16>
    "tpu.trace_start"() <{level = 10 : i32, message = "bnm,bmd->bnd"}> : () -> ()
    %cst_24 = arith.constant dense<0.000000e+00> : vector<1x8x32xf32>
    %68 = tpu.matmul %66, %67, %cst_24 {dimension_numbers = #tpu.dot_dimension_numbers<[2], [1], [1], [2], [0, 0, 0, 1, 1, 2], [0], [0]>} : vector<1x8x8xbf16>, vector<1x8x32xbf16>, vector<1x8x32xf32> -> vector<1x8x32xf32>
    "tpu.trace_stop"() : () -> ()
    %c0_25 = arith.constant 0 : index
    %c0_26 = arith.constant 0 : index
    %c0_27 = arith.constant 0 : index
    %69 = vector.load %arg16[%c0_25, %c0_26, %c0_27] : memref<1x8x128xf32, #tpu.memory_space<vmem>>, vector<1x8x32xf32>
    tpu.vector_store %arg16[%c0_25, %c0_26, %c0_27], %68 {strides = array<i32>} : memref<1x8x128xf32, #tpu.memory_space<vmem>>, vector<1x8x32xf32>,
    %70 = vector.extract_strided_slice %38 {offsets = [0, 0, 32], sizes = [1, 8, 32], strides = [1, 1, 1]} : vector<1x8x128xbf16> to vector<1x8x32xbf16>
    %71 = vector.extract_strided_slice %41 {offsets = [0, 0, 32], sizes = [1, 8, 32], strides = [1, 1, 1]} : vector<1x8x128xbf16> to vector<1x8x32xbf16>
    "tpu.trace_start"() <{level = 10 : i32, message = "bnd,bmd->bnm"}> : () -> ()
    %cst_28 = arith.constant dense<0.000000e+00> : vector<1x8x8xf32>
    %72 = tpu.matmul %70, %71, %cst_28 {dimension_numbers = #tpu.dot_dimension_numbers<[2], [2], [1], [1], [0, 0, 0, 1, 1, 1], [0], [0]>} : vector<1x8x32xbf16>, vector<1x8x32xbf16>, vector<1x8x8xf32> -> vector<1x8x8xf32>
    "tpu.trace_stop"() : () -> ()
    %73 = vector.broadcast %50 : vector<1x1x8xf32> to vector<1x8x8xf32>
    %74 = arith.addf %72, %73 : vector<1x8x8xf32>
    %cst_29 = arith.constant dense<0xFF800000> : vector<1x8xf32>
    %75 = vector.multi_reduction <maximumf>, %74, %cst_29 [2] : vector<1x8x8xf32> to vector<1x8xf32>
    %76 = vector.shape_cast %75 : vector<1x8xf32> to vector<1x8x1xf32>
    %77 = vector.broadcast %76 : vector<1x8x1xf32> to vector<1x8x8xf32>
    %78 = arith.subf %74, %77 : vector<1x8x8xf32>
    %79 = math.exp %78 : vector<1x8x8xf32>
    %cst_30 = arith.constant dense<0.000000e+00> : vector<1x8xf32>
    %80 = vector.multi_reduction <add>, %79, %cst_30 [2] : vector<1x8x8xf32> to vector<1x8xf32>
    %81 = vector.shape_cast %80 : vector<1x8xf32> to vector<1x8x1xf32>
    %82 = tpu.reciprocal %81 {approx = true} : vector<1x8x1xf32> -> vector<1x8x1xf32>
    %83 = vector.broadcast %82 : vector<1x8x1xf32> to vector<1x8x8xf32>
    %84 = arith.mulf %79, %83 : vector<1x8x8xf32>
    %85 = arith.truncf %84 : vector<1x8x8xf32> to vector<1x8x8xbf16>
    %86 = vector.extract_strided_slice %44 {offsets = [0, 0, 32], sizes = [1, 8, 32], strides = [1, 1, 1]} : vector<1x8x128xbf16> to vector<1x8x32xbf16>
    "tpu.trace_start"() <{level = 10 : i32, message = "bnm,bmd->bnd"}> : () -> ()
    %cst_31 = arith.constant dense<0.000000e+00> : vector<1x8x32xf32>
    %87 = tpu.matmul %85, %86, %cst_31 {dimension_numbers = #tpu.dot_dimension_numbers<[2], [1], [1], [2], [0, 0, 0, 1, 1, 2], [0], [0]>} : vector<1x8x8xbf16>, vector<1x8x32xbf16>, vector<1x8x32xf32> -> vector<1x8x32xf32>
    "tpu.trace_stop"() : () -> ()
    %c0_32 = arith.constant 0 : index
    %c0_33 = arith.constant 0 : index
    %c32 = arith.constant 32 : index
    %88 = vector.load %arg16[%c0_32, %c0_33, %c32] : memref<1x8x128xf32, #tpu.memory_space<vmem>>, vector<1x8x32xf32>
    tpu.vector_store %arg16[%c0_32, %c0_33, %c32], %87 {strides = array<i32>} : memref<1x8x128xf32, #tpu.memory_space<vmem>>, vector<1x8x32xf32>,
    %89 = vector.extract_strided_slice %38 {offsets = [0, 0, 64], sizes = [1, 8, 32], strides = [1, 1, 1]} : vector<1x8x128xbf16> to vector<1x8x32xbf16>
    %90 = vector.extract_strided_slice %41 {offsets = [0, 0, 64], sizes = [1, 8, 32], strides = [1, 1, 1]} : vector<1x8x128xbf16> to vector<1x8x32xbf16>
    "tpu.trace_start"() <{level = 10 : i32, message = "bnd,bmd->bnm"}> : () -> ()
    %cst_34 = arith.constant dense<0.000000e+00> : vector<1x8x8xf32>
    %91 = tpu.matmul %89, %90, %cst_34 {dimension_numbers = #tpu.dot_dimension_numbers<[2], [2], [1], [1], [0, 0, 0, 1, 1, 1], [0], [0]>} : vector<1x8x32xbf16>, vector<1x8x32xbf16>, vector<1x8x8xf32> -> vector<1x8x8xf32>
    "tpu.trace_stop"() : () -> ()
    %92 = vector.broadcast %50 : vector<1x1x8xf32> to vector<1x8x8xf32>
    %93 = arith.addf %91, %92 : vector<1x8x8xf32>
    %cst_35 = arith.constant dense<0xFF800000> : vector<1x8xf32>
    %94 = vector.multi_reduction <maximumf>, %93, %cst_35 [2] : vector<1x8x8xf32> to vector<1x8xf32>
    %95 = vector.shape_cast %94 : vector<1x8xf32> to vector<1x8x1xf32>
    %96 = vector.broadcast %95 : vector<1x8x1xf32> to vector<1x8x8xf32>
    %97 = arith.subf %93, %96 : vector<1x8x8xf32>
    %98 = math.exp %97 : vector<1x8x8xf32>
    %cst_36 = arith.constant dense<0.000000e+00> : vector<1x8xf32>
    %99 = vector.multi_reduction <add>, %98, %cst_36 [2] : vector<1x8x8xf32> to vector<1x8xf32>
    %100 = vector.shape_cast %99 : vector<1x8xf32> to vector<1x8x1xf32>
    %101 = tpu.reciprocal %100 {approx = true} : vector<1x8x1xf32> -> vector<1x8x1xf32>
    %102 = vector.broadcast %101 : vector<1x8x1xf32> to vector<1x8x8xf32>
    %103 = arith.mulf %98, %102 : vector<1x8x8xf32>
    %104 = arith.truncf %103 : vector<1x8x8xf32> to vector<1x8x8xbf16>
    %105 = vector.extract_strided_slice %44 {offsets = [0, 0, 64], sizes = [1, 8, 32], strides = [1, 1, 1]} : vector<1x8x128xbf16> to vector<1x8x32xbf16>
    "tpu.trace_start"() <{level = 10 : i32, message = "bnm,bmd->bnd"}> : () -> ()
    %cst_37 = arith.constant dense<0.000000e+00> : vector<1x8x32xf32>
    %106 = tpu.matmul %104, %105, %cst_37 {dimension_numbers = #tpu.dot_dimension_numbers<[2], [1], [1], [2], [0, 0, 0, 1, 1, 2], [0], [0]>} : vector<1x8x8xbf16>, vector<1x8x32xbf16>, vector<1x8x32xf32> -> vector<1x8x32xf32>
    "tpu.trace_stop"() : () -> ()
    %c0_38 = arith.constant 0 : index
    %c0_39 = arith.constant 0 : index
    %c64 = arith.constant 64 : index
    %107 = vector.load %arg16[%c0_38, %c0_39, %c64] : memref<1x8x128xf32, #tpu.memory_space<vmem>>, vector<1x8x32xf32>
    tpu.vector_store %arg16[%c0_38, %c0_39, %c64], %106 {strides = array<i32>} : memref<1x8x128xf32, #tpu.memory_space<vmem>>, vector<1x8x32xf32>,
    %108 = vector.extract_strided_slice %38 {offsets = [0, 0, 96], sizes = [1, 8, 32], strides = [1, 1, 1]} : vector<1x8x128xbf16> to vector<1x8x32xbf16>
    %109 = vector.extract_strided_slice %41 {offsets = [0, 0, 96], sizes = [1, 8, 32], strides = [1, 1, 1]} : vector<1x8x128xbf16> to vector<1x8x32xbf16>
    "tpu.trace_start"() <{level = 10 : i32, message = "bnd,bmd->bnm"}> : () -> ()
    %cst_40 = arith.constant dense<0.000000e+00> : vector<1x8x8xf32>
    %110 = tpu.matmul %108, %109, %cst_40 {dimension_numbers = #tpu.dot_dimension_numbers<[2], [2], [1], [1], [0, 0, 0, 1, 1, 1], [0], [0]>} : vector<1x8x32xbf16>, vector<1x8x32xbf16>, vector<1x8x8xf32> -> vector<1x8x8xf32>
    "tpu.trace_stop"() : () -> ()
    %111 = vector.broadcast %50 : vector<1x1x8xf32> to vector<1x8x8xf32>
    %112 = arith.addf %110, %111 : vector<1x8x8xf32>
    %cst_41 = arith.constant dense<0xFF800000> : vector<1x8xf32>
    %113 = vector.multi_reduction <maximumf>, %112, %cst_41 [2] : vector<1x8x8xf32> to vector<1x8xf32>
    %114 = vector.shape_cast %113 : vector<1x8xf32> to vector<1x8x1xf32>
    %115 = vector.broadcast %114 : vector<1x8x1xf32> to vector<1x8x8xf32>
    %116 = arith.subf %112, %115 : vector<1x8x8xf32>
    %117 = math.exp %116 : vector<1x8x8xf32>
    %cst_42 = arith.constant dense<0.000000e+00> : vector<1x8xf32>
    %118 = vector.multi_reduction <add>, %117, %cst_42 [2] : vector<1x8x8xf32> to vector<1x8xf32>
    %119 = vector.shape_cast %118 : vector<1x8xf32> to vector<1x8x1xf32>
    %120 = tpu.reciprocal %119 {approx = true} : vector<1x8x1xf32> -> vector<1x8x1xf32>
    %121 = vector.broadcast %120 : vector<1x8x1xf32> to vector<1x8x8xf32>
    %122 = arith.mulf %117, %121 : vector<1x8x8xf32>
    %123 = arith.truncf %122 : vector<1x8x8xf32> to vector<1x8x8xbf16>
    %124 = vector.extract_strided_slice %44 {offsets = [0, 0, 96], sizes = [1, 8, 32], strides = [1, 1, 1]} : vector<1x8x128xbf16> to vector<1x8x32xbf16>
    "tpu.trace_start"() <{level = 10 : i32, message = "bnm,bmd->bnd"}> : () -> ()
    %cst_43 = arith.constant dense<0.000000e+00> : vector<1x8x32xf32>
    %125 = tpu.matmul %123, %124, %cst_43 {dimension_numbers = #tpu.dot_dimension_numbers<[2], [1], [1], [2], [0, 0, 0, 1, 1, 2], [0], [0]>} : vector<1x8x8xbf16>, vector<1x8x32xbf16>, vector<1x8x32xf32> -> vector<1x8x32xf32>
    "tpu.trace_stop"() : () -> ()
    %c0_44 = arith.constant 0 : index
    %c0_45 = arith.constant 0 : index
    %c96 = arith.constant 96 : index
    %126 = vector.load %arg16[%c0_44, %c0_45, %c96] : memref<1x8x128xf32, #tpu.memory_space<vmem>>, vector<1x8x32xf32>
    tpu.vector_store %arg16[%c0_44, %c0_45, %c96], %125 {strides = array<i32>} : memref<1x8x128xf32, #tpu.memory_space<vmem>>, vector<1x8x32xf32>,
    %c0_46 = arith.constant 0 : index
    %c0_47 = arith.constant 0 : index
    %c0_48 = arith.constant 0 : index
    %127 = vector.load %arg16[%c0_46, %c0_47, %c0_48] : memref<1x8x128xf32, #tpu.memory_space<vmem>>, vector<1x8x128xf32>
    %128 = vector.shape_cast %127 : vector<1x8x128xf32> to vector<8x128xf32>
    %129 = arith.truncf %128 : vector<8x128xf32> to vector<8x128xbf16>
    %c0_49 = arith.constant 0 : index
    %c0_50 = arith.constant 0 : index
    %130 = vector.load %arg7[%c0_49, %c0_50] : memref<128x128xbf16, #tpu.memory_space<vmem>>, vector<128x128xbf16>
    %cst_51 = arith.constant dense<0.000000e+00> : vector<8x128xf32>
    %131 = tpu.matmul %129, %130, %cst_51 {dimension_numbers = #tpu.dot_dimension_numbers<[1], [0], [0], [1], [0, 0, 1, 1], [], []>} : vector<8x128xbf16>, vector<128x128xbf16>, vector<8x128xf32> -> vector<8x128xf32>
    %c0_52 = arith.constant 0 : index
    %c0_53 = arith.constant 0 : index
    %132 = vector.load %arg8[%c0_52, %c0_53] : memref<1x128xf32, #tpu.memory_space<vmem>>, vector<1x128xf32>
    %133 = vector.broadcast %132 : vector<1x128xf32> to vector<8x128xf32>
    %134 = arith.addf %131, %133 : vector<8x128xf32>
    %135 = arith.addf %3, %134 : vector<8x128xf32>
    %c0_54 = arith.constant 0 : index
    %c0_55 = arith.constant 0 : index
    %136 = vector.load %arg9[%c0_54, %c0_55] : memref<1x128xf32, #tpu.memory_space<vmem>>, vector<1x128xf32>
    %c0_56 = arith.constant 0 : index
    %c0_57 = arith.constant 0 : index
    %137 = vector.load %arg10[%c0_56, %c0_57] : memref<1x128xf32, #tpu.memory_space<vmem>>, vector<1x128xf32>
    %cst_58 = arith.constant dense<0.000000e+00> : vector<8xf32>
    %138 = vector.multi_reduction <add>, %135, %cst_58 [1] : vector<8x128xf32> to vector<8xf32>
    %139 = vector.shape_cast %138 : vector<8xf32> to vector<8x1xf32>
    %cst_59 = arith.constant 1.280000e+02 : f32
    %140 = vector.broadcast %cst_59 : f32 to vector<8x1xf32>
    %141 = arith.divf %139, %140 : vector<8x1xf32>
    %142 = vector.broadcast %141 : vector<8x1xf32> to vector<8x128xf32>
    %143 = arith.subf %135, %142 : vector<8x128xf32>
    %144 = arith.mulf %143, %143 : vector<8x128xf32>
    %cst_60 = arith.constant dense<0.000000e+00> : vector<8xf32>
    %145 = vector.multi_reduction <add>, %144, %cst_60 [1] : vector<8x128xf32> to vector<8xf32>
    %146 = vector.shape_cast %145 : vector<8xf32> to vector<8x1xf32>
    %cst_61 = arith.constant 1.280000e+02 : f32
    %147 = vector.broadcast %cst_61 : f32 to vector<8x1xf32>
    %148 = arith.divf %146, %147 : vector<8x1xf32>
    %149 = vector.broadcast %141 : vector<8x1xf32> to vector<8x128xf32>
    %150 = arith.subf %135, %149 : vector<8x128xf32>
    %cst_62 = arith.constant 9.99999997E-7 : f32
    %151 = vector.broadcast %cst_62 : f32 to vector<8x1xf32>
    %152 = arith.addf %148, %151 : vector<8x1xf32>
    %153 = math.rsqrt %152 : vector<8x1xf32>
    %154 = vector.broadcast %153 : vector<8x1xf32> to vector<8x128xf32>
    %155 = arith.mulf %150, %154 : vector<8x128xf32>
    %156 = vector.broadcast %136 : vector<1x128xf32> to vector<8x128xf32>
    %157 = arith.mulf %155, %156 : vector<8x128xf32>
    %158 = vector.broadcast %137 : vector<1x128xf32> to vector<8x128xf32>
    %159 = arith.addf %157, %158 : vector<8x128xf32>
    %160 = arith.truncf %159 : vector<8x128xf32> to vector<8x128xbf16>
    %c0_63 = arith.constant 0 : index
    %c0_64 = arith.constant 0 : index
    %161 = vector.load %arg14[%c0_63, %c0_64] : memref<1x128xf32, #tpu.memory_space<vmem>>, vector<1x128xf32>
    %162 = vector.broadcast %161 : vector<1x128xf32> to vector<8x128xf32>
    %163 = arith.addf %135, %162 : vector<8x128xf32>
    %c0_65 = arith.constant 0 : index
    %c0_66 = arith.constant 0 : index
    %164 = vector.load %arg11[%c0_65, %c0_66] : memref<128x512xbf16, #tpu.memory_space<vmem>>, vector<128x512xbf16>
    %cst_67 = arith.constant dense<0.000000e+00> : vector<8x512xf32>
    %165 = tpu.matmul %160, %164, %cst_67 {dimension_numbers = #tpu.dot_dimension_numbers<[1], [0], [0], [1], [0, 0, 1, 1], [], []>} : vector<8x128xbf16>, vector<128x512xbf16>, vector<8x512xf32> -> vector<8x512xf32>
    %c0_68 = arith.constant 0 : index
    %c0_69 = arith.constant 0 : index
    %166 = vector.load %arg12[%c0_68, %c0_69] : memref<1x512xf32, #tpu.memory_space<vmem>>, vector<1x512xf32>
    %167 = vector.broadcast %166 : vector<1x512xf32> to vector<8x512xf32>
    %168 = arith.addf %165, %167 : vector<8x512xf32>
    %cst_70 = arith.constant 5.000000e-01 : f32
    %169 = vector.broadcast %cst_70 : f32 to vector<8x512xf32>
    %170 = arith.mulf %169, %168 : vector<8x512xf32>
    %cst_71 = arith.constant 0.707106769 : f32
    %171 = vector.broadcast %cst_71 : f32 to vector<8x512xf32>
    %172 = arith.mulf %168, %171 : vector<8x512xf32>
    %cst_72 = arith.constant 0.000000e+00 : f32
    %173 = vector.broadcast %cst_72 : f32 to vector<8x512xf32>
    %174 = arith.cmpf oge, %172, %173 : vector<8x512xf32>
    %cst_73 = arith.constant 1.000000e+00 : f32
    %cst_74 = arith.constant -1.000000e+00 : f32
    %175 = vector.broadcast %cst_73 : f32 to vector<8x512xf32>
    %176 = vector.broadcast %cst_74 : f32 to vector<8x512xf32>
    %177 = arith.select %174, %175, %176 : vector<8x512xi1>, vector<8x512xf32>
    %178 = math.absf %172 : vector<8x512xf32>
    %cst_75 = arith.constant 0.327591091 : f32
    %179 = vector.broadcast %cst_75 : f32 to vector<8x512xf32>
    %180 = arith.mulf %179, %178 : vector<8x512xf32>
    %cst_76 = arith.constant 1.000000e+00 : f32
    %181 = vector.broadcast %cst_76 : f32 to vector<8x512xf32>
    %182 = arith.addf %181, %180 : vector<8x512xf32>
    %183 = tpu.reciprocal %182 {approx = true} : vector<8x512xf32> -> vector<8x512xf32>
    %cst_77 = arith.constant 1.06140542 : f32
    %184 = vector.broadcast %cst_77 : f32 to vector<8x512xf32>
    %185 = arith.mulf %184, %183 : vector<8x512xf32>
    %cst_78 = arith.constant -1.45315206 : f32
    %186 = vector.broadcast %cst_78 : f32 to vector<8x512xf32>
    %187 = arith.addf %185, %186 : vector<8x512xf32>
    %188 = arith.mulf %187, %183 : vector<8x512xf32>
    %cst_79 = arith.constant 1.42141378 : f32
    %189 = vector.broadcast %cst_79 : f32 to vector<8x512xf32>
    %190 = arith.addf %188, %189 : vector<8x512xf32>
    %191 = arith.mulf %190, %183 : vector<8x512xf32>
    %cst_80 = arith.constant -0.284496725 : f32
    %192 = vector.broadcast %cst_80 : f32 to vector<8x512xf32>
    %193 = arith.addf %191, %192 : vector<8x512xf32>
    %194 = arith.mulf %193, %183 : vector<8x512xf32>
    %cst_81 = arith.constant 0.254829586 : f32
    %195 = vector.broadcast %cst_81 : f32 to vector<8x512xf32>
    %196 = arith.addf %194, %195 : vector<8x512xf32>
    %197 = arith.mulf %196, %183 : vector<8x512xf32>
    %cst_82 = arith.constant 0.000000e+00 : f32
    %198 = vector.broadcast %cst_82 : f32 to vector<8x512xf32>
    %199 = arith.subf %198, %178 : vector<8x512xf32>
    %200 = arith.mulf %199, %178 : vector<8x512xf32>
    %201 = math.exp %200 : vector<8x512xf32>
    %202 = arith.mulf %197, %201 : vector<8x512xf32>
    %cst_83 = arith.constant 1.000000e+00 : f32
    %203 = vector.broadcast %cst_83 : f32 to vector<8x512xf32>
    %204 = arith.subf %203, %202 : vector<8x512xf32>
    %205 = arith.mulf %177, %204 : vector<8x512xf32>
    %cst_84 = arith.constant 1.000000e+00 : f32
    %206 = vector.broadcast %cst_84 : f32 to vector<8x512xf32>
    %207 = arith.addf %206, %205 : vector<8x512xf32>
    %208 = arith.mulf %170, %207 : vector<8x512xf32>
    %209 = arith.truncf %208 : vector<8x512xf32> to vector<8x512xbf16>
    %c0_85 = arith.constant 0 : index
    %c0_86 = arith.constant 0 : index
    %210 = vector.load %arg13[%c0_85, %c0_86] : memref<512x128xbf16, #tpu.memory_space<vmem>>, vector<512x128xbf16>
    %cst_87 = arith.constant dense<0.000000e+00> : vector<8x128xf32>
    %211 = tpu.matmul %209, %210, %cst_87 {dimension_numbers = #tpu.dot_dimension_numbers<[1], [0], [0], [1], [0, 0, 1, 1], [], []>} : vector<8x512xbf16>, vector<512x128xbf16>, vector<8x128xf32> -> vector<8x128xf32>
    %212 = arith.addf %163, %211 : vector<8x128xf32>
    %213 = vector.shape_cast %212 : vector<8x128xf32> to vector<1x8x128xf32>
    %c0_88 = arith.constant 0 : index
    %c0_89 = arith.constant 0 : index
    %c0_90 = arith.constant 0 : index
    %214 = vector.load %arg15[%c0_88, %c0_89, %c0_90] : memref<1x8x128xf32, #tpu.memory_space<vmem>>, vector<1x8x128xf32>
    tpu.vector_store %arg15[%c0_88, %c0_89, %c0_90], %213 {strides = array<i32>} : memref<1x8x128xf32, #tpu.memory_space<vmem>>, vector<1x8x128xf32>,
    return
  }
  func.func @transform_0(%arg0: i32) -> (i32, i32, i32) {
    %c0_i32 = arith.constant 0 : i32
    %c0_i32_0 = arith.constant 0 : i32
    %c0_i32_1 = arith.constant 0 : i32
    return %arg0, %c0_i32, %c0_i32_0 : i32, i32, i32
  }
  func.func @transform_1(%arg0: i32) -> (i32, i32, i32) {
    %c0_i32 = arith.constant 0 : i32
    %c0_i32_0 = arith.constant 0 : i32
    %c0_i32_1 = arith.constant 0 : i32
    %c0_i32_2 = arith.constant 0 : i32
    return %c0_i32, %c0_i32_0, %c0_i32_1 : i32, i32, i32
  }
  func.func @transform_2(%arg0: i32) -> (i32, i32) {
    %c0_i32 = arith.constant 0 : i32
    %c0_i32_0 = arith.constant 0 : i32
    %c0_i32_1 = arith.constant 0 : i32
    return %c0_i32, %c0_i32_0 : i32, i32
  }
  func.func @transform_3(%arg0: i32) -> (i32, i32) {
    %c0_i32 = arith.constant 0 : i32
    %c0_i32_0 = arith.constant 0 : i32
    %c0_i32_1 = arith.constant 0 : i32
    return %c0_i32, %c0_i32_0 : i32, i32
  }
  func.func @transform_4(%arg0: i32) -> (i32, i32) {
    %c0_i32 = arith.constant 0 : i32
    %c0_i32_0 = arith.constant 0 : i32
    %c0_i32_1 = arith.constant 0 : i32
    return %c0_i32, %c0_i32_0 : i32, i32
  }
  func.func @transform_5(%arg0: i32) -> (i32, i32) {
    %c0_i32 = arith.constant 0 : i32
    %c0_i32_0 = arith.constant 0 : i32
    %c0_i32_1 = arith.constant 0 : i32
    return %c0_i32, %c0_i32_0 : i32, i32
  }
  func.func @transform_6(%arg0: i32) -> (i32, i32) {
    %c0_i32 = arith.constant 0 : i32
    %c0_i32_0 = arith.constant 0 : i32
    %c0_i32_1 = arith.constant 0 : i32
    return %c0_i32, %c0_i32_0 : i32, i32
  }
  func.func @transform_7(%arg0: i32) -> (i32, i32) {
    %c0_i32 = arith.constant 0 : i32
    %c0_i32_0 = arith.constant 0 : i32
    %c0_i32_1 = arith.constant 0 : i32
    return %c0_i32, %c0_i32_0 : i32, i32
  }
  func.func @transform_8(%arg0: i32) -> (i32, i32) {
    %c0_i32 = arith.constant 0 : i32
    %c0_i32_0 = arith.constant 0 : i32
    %c0_i32_1 = arith.constant 0 : i32
    return %c0_i32, %c0_i32_0 : i32, i32
  }
  func.func @transform_9(%arg0: i32) -> (i32, i32) {
    %c0_i32 = arith.constant 0 : i32
    %c0_i32_0 = arith.constant 0 : i32
    %c0_i32_1 = arith.constant 0 : i32
    return %c0_i32, %c0_i32_0 : i32, i32
  }
  func.func @transform_10(%arg0: i32) -> (i32, i32) {
    %c0_i32 = arith.constant 0 : i32
    %c0_i32_0 = arith.constant 0 : i32
    %c0_i32_1 = arith.constant 0 : i32
    return %c0_i32, %c0_i32_0 : i32, i32
  }
  func.func @transform_11(%arg0: i32) -> (i32, i32) {
    %c0_i32 = arith.constant 0 : i32
    %c0_i32_0 = arith.constant 0 : i32
    %c0_i32_1 = arith.constant 0 : i32
    return %c0_i32, %c0_i32_0 : i32, i32
  }
  func.func @transform_12(%arg0: i32) -> (i32, i32) {
    %c0_i32 = arith.constant 0 : i32
    %c0_i32_0 = arith.constant 0 : i32
    %c0_i32_1 = arith.constant 0 : i32
    return %c0_i32, %c0_i32_0 : i32, i32
  }
  func.func @transform_13(%arg0: i32) -> (i32, i32) {
    %c0_i32 = arith.constant 0 : i32
    %c0_i32_0 = arith.constant 0 : i32
    %c0_i32_1 = arith.constant 0 : i32
    return %c0_i32, %c0_i32_0 : i32, i32
  }
  func.func @transform_14(%arg0: i32) -> (i32, i32, i32) {
    %c0_i32 = arith.constant 0 : i32
    %c0_i32_0 = arith.constant 0 : i32
    %c0_i32_1 = arith.constant 0 : i32
    return %arg0, %c0_i32, %c0_i32_0 : i32, i32, i32
  }
}

module attributes {stable_mosaic.version = 11 : i64} {
  func.func @block_kernel(%arg0: i32, %arg1: memref<1x8x128xf32, #tpu.memory_space<vmem>>, %arg2: memref<1x128xf32, #tpu.memory_space<vmem>>, %arg3: memref<1x128xf32, #tpu.memory_space<vmem>>, %arg4: memref<128x384xbf16, #tpu.memory_space<vmem>>, %arg5: memref<1x384xf32, #tpu.memory_space<vmem>>, %arg6: memref<128x128xbf16, #tpu.memory_space<vmem>>, %arg7: memref<1x128xf32, #tpu.memory_space<vmem>>, %arg8: memref<1x128xf32, #tpu.memory_space<vmem>>, %arg9: memref<1x128xf32, #tpu.memory_space<vmem>>, %arg10: memref<128x512xbf16, #tpu.memory_space<vmem>>, %arg11: memref<1x512xf32, #tpu.memory_space<vmem>>, %arg12: memref<512x128xbf16, #tpu.memory_space<vmem>>, %arg13: memref<1x128xf32, #tpu.memory_space<vmem>>, %arg14: memref<1x8x128xf32, #tpu.memory_space<vmem>>, %arg15: memref<1x8x128xf32, #tpu.memory_space<vmem>>) attributes {dimension_semantics = [#tpu.dimension_semantics<parallel>], iteration_bounds = array<i64: 2>, scalar_prefetch = 0 : i64, scratch_operands = 1 : i64, tpu.core_type = #tpu.core_type<tc>, window_params = [{transform_indices = @transform_0, window_bounds = array<i64: 1, 8, 128>}, {pipeline_mode = #tpu.pipeline_mode<synchronous>, transform_indices = @transform_1, window_bounds = array<i64: 1, 128>}, {pipeline_mode = #tpu.pipeline_mode<synchronous>, transform_indices = @transform_2, window_bounds = array<i64: 1, 128>}, {pipeline_mode = #tpu.pipeline_mode<synchronous>, transform_indices = @transform_3, window_bounds = array<i64: 128, 384>}, {pipeline_mode = #tpu.pipeline_mode<synchronous>, transform_indices = @transform_4, window_bounds = array<i64: 1, 384>}, {pipeline_mode = #tpu.pipeline_mode<synchronous>, transform_indices = @transform_5, window_bounds = array<i64: 128, 128>}, {pipeline_mode = #tpu.pipeline_mode<synchronous>, transform_indices = @transform_6, window_bounds = array<i64: 1, 128>}, {pipeline_mode = #tpu.pipeline_mode<synchronous>, transform_indices = @transform_7, window_bounds = array<i64: 1, 128>}, {pipeline_mode = #tpu.pipeline_mode<synchronous>, transform_indices = @transform_8, window_bounds = array<i64: 1, 128>}, {pipeline_mode = #tpu.pipeline_mode<synchronous>, transform_indices = @transform_9, window_bounds = array<i64: 128, 512>}, {pipeline_mode = #tpu.pipeline_mode<synchronous>, transform_indices = @transform_10, window_bounds = array<i64: 1, 512>}, {pipeline_mode = #tpu.pipeline_mode<synchronous>, transform_indices = @transform_11, window_bounds = array<i64: 512, 128>}, {pipeline_mode = #tpu.pipeline_mode<synchronous>, transform_indices = @transform_12, window_bounds = array<i64: 1, 128>}, {transform_indices = @transform_13, window_bounds = array<i64: 1, 8, 128>}]} {
    %c0 = arith.constant 0 : index
    %c0_0 = arith.constant 0 : index
    %c0_1 = arith.constant 0 : index
    %0 = vector.load %arg1[%c0, %c0_0, %c0_1] : memref<1x8x128xf32, #tpu.memory_space<vmem>>, vector<1x8x128xf32>
    %1 = vector.shape_cast %0 : vector<1x8x128xf32> to vector<8x128xf32>
    %c0_2 = arith.constant 0 : index
    %c0_3 = arith.constant 0 : index
    %2 = vector.load %arg2[%c0_2, %c0_3] : memref<1x128xf32, #tpu.memory_space<vmem>>, vector<1x128xf32>
    %c0_4 = arith.constant 0 : index
    %c0_5 = arith.constant 0 : index
    %3 = vector.load %arg3[%c0_4, %c0_5] : memref<1x128xf32, #tpu.memory_space<vmem>>, vector<1x128xf32>
    %cst = arith.constant dense<0.000000e+00> : vector<8xf32>
    %4 = vector.multi_reduction <add>, %1, %cst [1] : vector<8x128xf32> to vector<8xf32>
    %5 = vector.shape_cast %4 : vector<8xf32> to vector<8x1xf32>
    %cst_6 = arith.constant 1.280000e+02 : f32
    %6 = vector.broadcast %cst_6 : f32 to vector<8x1xf32>
    %7 = arith.divf %5, %6 : vector<8x1xf32>
    %8 = vector.broadcast %7 : vector<8x1xf32> to vector<8x128xf32>
    %9 = arith.subf %1, %8 : vector<8x128xf32>
    %10 = arith.mulf %9, %9 : vector<8x128xf32>
    %cst_7 = arith.constant dense<0.000000e+00> : vector<8xf32>
    %11 = vector.multi_reduction <add>, %10, %cst_7 [1] : vector<8x128xf32> to vector<8xf32>
    %12 = vector.shape_cast %11 : vector<8xf32> to vector<8x1xf32>
    %cst_8 = arith.constant 1.280000e+02 : f32
    %13 = vector.broadcast %cst_8 : f32 to vector<8x1xf32>
    %14 = arith.divf %12, %13 : vector<8x1xf32>
    %15 = vector.broadcast %7 : vector<8x1xf32> to vector<8x128xf32>
    %16 = arith.subf %1, %15 : vector<8x128xf32>
    %cst_9 = arith.constant 9.99999997E-7 : f32
    %17 = vector.broadcast %cst_9 : f32 to vector<8x1xf32>
    %18 = arith.addf %14, %17 : vector<8x1xf32>
    %19 = math.rsqrt %18 : vector<8x1xf32>
    %20 = vector.broadcast %19 : vector<8x1xf32> to vector<8x128xf32>
    %21 = arith.mulf %16, %20 : vector<8x128xf32>
    %22 = vector.broadcast %2 : vector<1x128xf32> to vector<8x128xf32>
    %23 = arith.mulf %21, %22 : vector<8x128xf32>
    %24 = vector.broadcast %3 : vector<1x128xf32> to vector<8x128xf32>
    %25 = arith.addf %23, %24 : vector<8x128xf32>
    %26 = arith.truncf %25 : vector<8x128xf32> to vector<8x128xbf16>
    %c0_10 = arith.constant 0 : index
    %c0_11 = arith.constant 0 : index
    %27 = vector.load %arg4[%c0_10, %c0_11] : memref<128x384xbf16, #tpu.memory_space<vmem>>, vector<128x384xbf16>
    %cst_12 = arith.constant dense<0.000000e+00> : vector<8x384xf32>
    %28 = tpu.matmul %26, %27, %cst_12 {dimension_numbers = #tpu.dot_dimension_numbers<[1], [0], [0], [1], [0, 0, 1, 1], [], []>} : vector<8x128xbf16>, vector<128x384xbf16>, vector<8x384xf32> -> vector<8x384xf32>
    %c0_13 = arith.constant 0 : index
    %c0_14 = arith.constant 0 : index
    %29 = vector.load %arg5[%c0_13, %c0_14] : memref<1x384xf32, #tpu.memory_space<vmem>>, vector<1x384xf32>
    %30 = vector.broadcast %29 : vector<1x384xf32> to vector<8x384xf32>
    %31 = arith.addf %28, %30 : vector<8x384xf32>
    %32 = vector.extract_strided_slice %31 {offsets = [0, 0], sizes = [8, 128], strides = [1, 1]} : vector<8x384xf32> to vector<8x128xf32>
    %cst_15 = arith.constant 0.176776692 : f32
    %33 = vector.broadcast %cst_15 : f32 to vector<8x128xf32>
    %34 = arith.mulf %32, %33 : vector<8x128xf32>
    %35 = arith.truncf %34 : vector<8x128xf32> to vector<8x128xbf16>
    %36 = vector.shape_cast %35 : vector<8x128xbf16> to vector<1x8x128xbf16>
    %37 = vector.extract_strided_slice %31 {offsets = [0, 128], sizes = [8, 128], strides = [1, 1]} : vector<8x384xf32> to vector<8x128xf32>
    %38 = arith.truncf %37 : vector<8x128xf32> to vector<8x128xbf16>
    %39 = vector.shape_cast %38 : vector<8x128xbf16> to vector<1x8x128xbf16>
    %40 = vector.extract_strided_slice %31 {offsets = [0, 256], sizes = [8, 128], strides = [1, 1]} : vector<8x384xf32> to vector<8x128xf32>
    %41 = arith.truncf %40 : vector<8x128xf32> to vector<8x128xbf16>
    %42 = vector.shape_cast %41 : vector<8x128xbf16> to vector<1x8x128xbf16>
    %43 = tpu.iota {dimensions = array<i32: 2>} : vector<1x1x8xi32>
    %c5_i32 = arith.constant 5 : i32
    %44 = vector.broadcast %c5_i32 : i32 to vector<1x1x8xi32>
    %45 = arith.cmpi slt, %43, %44 : vector<1x1x8xi32>
    %cst_16 = arith.constant 0.000000e+00 : f32
    %cst_17 = arith.constant -1.000000e+30 : f32
    %46 = vector.broadcast %cst_16 : f32 to vector<1x1x8xf32>
    %47 = vector.broadcast %cst_17 : f32 to vector<1x1x8xf32>
    %48 = arith.select %45, %46, %47 : vector<1x1x8xi1>, vector<1x1x8xf32>
    %49 = vector.extract_strided_slice %36 {offsets = [0, 0, 0], sizes = [1, 8, 32], strides = [1, 1, 1]} : vector<1x8x128xbf16> to vector<1x8x32xbf16>
    %50 = vector.extract_strided_slice %39 {offsets = [0, 0, 0], sizes = [1, 8, 32], strides = [1, 1, 1]} : vector<1x8x128xbf16> to vector<1x8x32xbf16>
    "tpu.trace_start"() <{level = 10 : i32, message = "bnd,bmd->bnm"}> : () -> ()
    %cst_18 = arith.constant dense<0.000000e+00> : vector<1x8x8xf32>
    %51 = tpu.matmul %49, %50, %cst_18 {dimension_numbers = #tpu.dot_dimension_numbers<[2], [2], [1], [1], [0, 0, 0, 1, 1, 1], [0], [0]>} : vector<1x8x32xbf16>, vector<1x8x32xbf16>, vector<1x8x8xf32> -> vector<1x8x8xf32>
    "tpu.trace_stop"() : () -> ()
    %52 = vector.broadcast %48 : vector<1x1x8xf32> to vector<1x8x8xf32>
    %53 = arith.addf %51, %52 : vector<1x8x8xf32>
    %cst_19 = arith.constant dense<0xFF800000> : vector<1x8xf32>
    %54 = vector.multi_reduction <maximumf>, %53, %cst_19 [2] : vector<1x8x8xf32> to vector<1x8xf32>
    %55 = vector.shape_cast %54 : vector<1x8xf32> to vector<1x8x1xf32>
    %56 = vector.broadcast %55 : vector<1x8x1xf32> to vector<1x8x8xf32>
    %57 = arith.subf %53, %56 : vector<1x8x8xf32>
    %58 = math.exp %57 : vector<1x8x8xf32>
    %cst_20 = arith.constant dense<0.000000e+00> : vector<1x8xf32>
    %59 = vector.multi_reduction <add>, %58, %cst_20 [2] : vector<1x8x8xf32> to vector<1x8xf32>
    %60 = vector.shape_cast %59 : vector<1x8xf32> to vector<1x8x1xf32>
    %61 = tpu.reciprocal %60 {approx = true} : vector<1x8x1xf32> -> vector<1x8x1xf32>
    %62 = vector.broadcast %61 : vector<1x8x1xf32> to vector<1x8x8xf32>
    %63 = arith.mulf %58, %62 : vector<1x8x8xf32>
    %64 = arith.truncf %63 : vector<1x8x8xf32> to vector<1x8x8xbf16>
    %65 = vector.extract_strided_slice %42 {offsets = [0, 0, 0], sizes = [1, 8, 32], strides = [1, 1, 1]} : vector<1x8x128xbf16> to vector<1x8x32xbf16>
    "tpu.trace_start"() <{level = 10 : i32, message = "bnm,bmd->bnd"}> : () -> ()
    %cst_21 = arith.constant dense<0.000000e+00> : vector<1x8x32xf32>
    %66 = tpu.matmul %64, %65, %cst_21 {dimension_numbers = #tpu.dot_dimension_numbers<[2], [1], [1], [2], [0, 0, 0, 1, 1, 2], [0], [0]>} : vector<1x8x8xbf16>, vector<1x8x32xbf16>, vector<1x8x32xf32> -> vector<1x8x32xf32>
    "tpu.trace_stop"() : () -> ()
    %c0_22 = arith.constant 0 : index
    %c0_23 = arith.constant 0 : index
    %c0_24 = arith.constant 0 : index
    %67 = vector.load %arg15[%c0_22, %c0_23, %c0_24] : memref<1x8x128xf32, #tpu.memory_space<vmem>>, vector<1x8x32xf32>
    tpu.vector_store %arg15[%c0_22, %c0_23, %c0_24], %66 {strides = array<i32>} : memref<1x8x128xf32, #tpu.memory_space<vmem>>, vector<1x8x32xf32>,
    %68 = vector.extract_strided_slice %36 {offsets = [0, 0, 32], sizes = [1, 8, 32], strides = [1, 1, 1]} : vector<1x8x128xbf16> to vector<1x8x32xbf16>
    %69 = vector.extract_strided_slice %39 {offsets = [0, 0, 32], sizes = [1, 8, 32], strides = [1, 1, 1]} : vector<1x8x128xbf16> to vector<1x8x32xbf16>
    "tpu.trace_start"() <{level = 10 : i32, message = "bnd,bmd->bnm"}> : () -> ()
    %cst_25 = arith.constant dense<0.000000e+00> : vector<1x8x8xf32>
    %70 = tpu.matmul %68, %69, %cst_25 {dimension_numbers = #tpu.dot_dimension_numbers<[2], [2], [1], [1], [0, 0, 0, 1, 1, 1], [0], [0]>} : vector<1x8x32xbf16>, vector<1x8x32xbf16>, vector<1x8x8xf32> -> vector<1x8x8xf32>
    "tpu.trace_stop"() : () -> ()
    %71 = vector.broadcast %48 : vector<1x1x8xf32> to vector<1x8x8xf32>
    %72 = arith.addf %70, %71 : vector<1x8x8xf32>
    %cst_26 = arith.constant dense<0xFF800000> : vector<1x8xf32>
    %73 = vector.multi_reduction <maximumf>, %72, %cst_26 [2] : vector<1x8x8xf32> to vector<1x8xf32>
    %74 = vector.shape_cast %73 : vector<1x8xf32> to vector<1x8x1xf32>
    %75 = vector.broadcast %74 : vector<1x8x1xf32> to vector<1x8x8xf32>
    %76 = arith.subf %72, %75 : vector<1x8x8xf32>
    %77 = math.exp %76 : vector<1x8x8xf32>
    %cst_27 = arith.constant dense<0.000000e+00> : vector<1x8xf32>
    %78 = vector.multi_reduction <add>, %77, %cst_27 [2] : vector<1x8x8xf32> to vector<1x8xf32>
    %79 = vector.shape_cast %78 : vector<1x8xf32> to vector<1x8x1xf32>
    %80 = tpu.reciprocal %79 {approx = true} : vector<1x8x1xf32> -> vector<1x8x1xf32>
    %81 = vector.broadcast %80 : vector<1x8x1xf32> to vector<1x8x8xf32>
    %82 = arith.mulf %77, %81 : vector<1x8x8xf32>
    %83 = arith.truncf %82 : vector<1x8x8xf32> to vector<1x8x8xbf16>
    %84 = vector.extract_strided_slice %42 {offsets = [0, 0, 32], sizes = [1, 8, 32], strides = [1, 1, 1]} : vector<1x8x128xbf16> to vector<1x8x32xbf16>
    "tpu.trace_start"() <{level = 10 : i32, message = "bnm,bmd->bnd"}> : () -> ()
    %cst_28 = arith.constant dense<0.000000e+00> : vector<1x8x32xf32>
    %85 = tpu.matmul %83, %84, %cst_28 {dimension_numbers = #tpu.dot_dimension_numbers<[2], [1], [1], [2], [0, 0, 0, 1, 1, 2], [0], [0]>} : vector<1x8x8xbf16>, vector<1x8x32xbf16>, vector<1x8x32xf32> -> vector<1x8x32xf32>
    "tpu.trace_stop"() : () -> ()
    %c0_29 = arith.constant 0 : index
    %c0_30 = arith.constant 0 : index
    %c32 = arith.constant 32 : index
    %86 = vector.load %arg15[%c0_29, %c0_30, %c32] : memref<1x8x128xf32, #tpu.memory_space<vmem>>, vector<1x8x32xf32>
    tpu.vector_store %arg15[%c0_29, %c0_30, %c32], %85 {strides = array<i32>} : memref<1x8x128xf32, #tpu.memory_space<vmem>>, vector<1x8x32xf32>,
    %87 = vector.extract_strided_slice %36 {offsets = [0, 0, 64], sizes = [1, 8, 32], strides = [1, 1, 1]} : vector<1x8x128xbf16> to vector<1x8x32xbf16>
    %88 = vector.extract_strided_slice %39 {offsets = [0, 0, 64], sizes = [1, 8, 32], strides = [1, 1, 1]} : vector<1x8x128xbf16> to vector<1x8x32xbf16>
    "tpu.trace_start"() <{level = 10 : i32, message = "bnd,bmd->bnm"}> : () -> ()
    %cst_31 = arith.constant dense<0.000000e+00> : vector<1x8x8xf32>
    %89 = tpu.matmul %87, %88, %cst_31 {dimension_numbers = #tpu.dot_dimension_numbers<[2], [2], [1], [1], [0, 0, 0, 1, 1, 1], [0], [0]>} : vector<1x8x32xbf16>, vector<1x8x32xbf16>, vector<1x8x8xf32> -> vector<1x8x8xf32>
    "tpu.trace_stop"() : () -> ()
    %90 = vector.broadcast %48 : vector<1x1x8xf32> to vector<1x8x8xf32>
    %91 = arith.addf %89, %90 : vector<1x8x8xf32>
    %cst_32 = arith.constant dense<0xFF800000> : vector<1x8xf32>
    %92 = vector.multi_reduction <maximumf>, %91, %cst_32 [2] : vector<1x8x8xf32> to vector<1x8xf32>
    %93 = vector.shape_cast %92 : vector<1x8xf32> to vector<1x8x1xf32>
    %94 = vector.broadcast %93 : vector<1x8x1xf32> to vector<1x8x8xf32>
    %95 = arith.subf %91, %94 : vector<1x8x8xf32>
    %96 = math.exp %95 : vector<1x8x8xf32>
    %cst_33 = arith.constant dense<0.000000e+00> : vector<1x8xf32>
    %97 = vector.multi_reduction <add>, %96, %cst_33 [2] : vector<1x8x8xf32> to vector<1x8xf32>
    %98 = vector.shape_cast %97 : vector<1x8xf32> to vector<1x8x1xf32>
    %99 = tpu.reciprocal %98 {approx = true} : vector<1x8x1xf32> -> vector<1x8x1xf32>
    %100 = vector.broadcast %99 : vector<1x8x1xf32> to vector<1x8x8xf32>
    %101 = arith.mulf %96, %100 : vector<1x8x8xf32>
    %102 = arith.truncf %101 : vector<1x8x8xf32> to vector<1x8x8xbf16>
    %103 = vector.extract_strided_slice %42 {offsets = [0, 0, 64], sizes = [1, 8, 32], strides = [1, 1, 1]} : vector<1x8x128xbf16> to vector<1x8x32xbf16>
    "tpu.trace_start"() <{level = 10 : i32, message = "bnm,bmd->bnd"}> : () -> ()
    %cst_34 = arith.constant dense<0.000000e+00> : vector<1x8x32xf32>
    %104 = tpu.matmul %102, %103, %cst_34 {dimension_numbers = #tpu.dot_dimension_numbers<[2], [1], [1], [2], [0, 0, 0, 1, 1, 2], [0], [0]>} : vector<1x8x8xbf16>, vector<1x8x32xbf16>, vector<1x8x32xf32> -> vector<1x8x32xf32>
    "tpu.trace_stop"() : () -> ()
    %c0_35 = arith.constant 0 : index
    %c0_36 = arith.constant 0 : index
    %c64 = arith.constant 64 : index
    %105 = vector.load %arg15[%c0_35, %c0_36, %c64] : memref<1x8x128xf32, #tpu.memory_space<vmem>>, vector<1x8x32xf32>
    tpu.vector_store %arg15[%c0_35, %c0_36, %c64], %104 {strides = array<i32>} : memref<1x8x128xf32, #tpu.memory_space<vmem>>, vector<1x8x32xf32>,
    %106 = vector.extract_strided_slice %36 {offsets = [0, 0, 96], sizes = [1, 8, 32], strides = [1, 1, 1]} : vector<1x8x128xbf16> to vector<1x8x32xbf16>
    %107 = vector.extract_strided_slice %39 {offsets = [0, 0, 96], sizes = [1, 8, 32], strides = [1, 1, 1]} : vector<1x8x128xbf16> to vector<1x8x32xbf16>
    "tpu.trace_start"() <{level = 10 : i32, message = "bnd,bmd->bnm"}> : () -> ()
    %cst_37 = arith.constant dense<0.000000e+00> : vector<1x8x8xf32>
    %108 = tpu.matmul %106, %107, %cst_37 {dimension_numbers = #tpu.dot_dimension_numbers<[2], [2], [1], [1], [0, 0, 0, 1, 1, 1], [0], [0]>} : vector<1x8x32xbf16>, vector<1x8x32xbf16>, vector<1x8x8xf32> -> vector<1x8x8xf32>
    "tpu.trace_stop"() : () -> ()
    %109 = vector.broadcast %48 : vector<1x1x8xf32> to vector<1x8x8xf32>
    %110 = arith.addf %108, %109 : vector<1x8x8xf32>
    %cst_38 = arith.constant dense<0xFF800000> : vector<1x8xf32>
    %111 = vector.multi_reduction <maximumf>, %110, %cst_38 [2] : vector<1x8x8xf32> to vector<1x8xf32>
    %112 = vector.shape_cast %111 : vector<1x8xf32> to vector<1x8x1xf32>
    %113 = vector.broadcast %112 : vector<1x8x1xf32> to vector<1x8x8xf32>
    %114 = arith.subf %110, %113 : vector<1x8x8xf32>
    %115 = math.exp %114 : vector<1x8x8xf32>
    %cst_39 = arith.constant dense<0.000000e+00> : vector<1x8xf32>
    %116 = vector.multi_reduction <add>, %115, %cst_39 [2] : vector<1x8x8xf32> to vector<1x8xf32>
    %117 = vector.shape_cast %116 : vector<1x8xf32> to vector<1x8x1xf32>
    %118 = tpu.reciprocal %117 {approx = true} : vector<1x8x1xf32> -> vector<1x8x1xf32>
    %119 = vector.broadcast %118 : vector<1x8x1xf32> to vector<1x8x8xf32>
    %120 = arith.mulf %115, %119 : vector<1x8x8xf32>
    %121 = arith.truncf %120 : vector<1x8x8xf32> to vector<1x8x8xbf16>
    %122 = vector.extract_strided_slice %42 {offsets = [0, 0, 96], sizes = [1, 8, 32], strides = [1, 1, 1]} : vector<1x8x128xbf16> to vector<1x8x32xbf16>
    "tpu.trace_start"() <{level = 10 : i32, message = "bnm,bmd->bnd"}> : () -> ()
    %cst_40 = arith.constant dense<0.000000e+00> : vector<1x8x32xf32>
    %123 = tpu.matmul %121, %122, %cst_40 {dimension_numbers = #tpu.dot_dimension_numbers<[2], [1], [1], [2], [0, 0, 0, 1, 1, 2], [0], [0]>} : vector<1x8x8xbf16>, vector<1x8x32xbf16>, vector<1x8x32xf32> -> vector<1x8x32xf32>
    "tpu.trace_stop"() : () -> ()
    %c0_41 = arith.constant 0 : index
    %c0_42 = arith.constant 0 : index
    %c96 = arith.constant 96 : index
    %124 = vector.load %arg15[%c0_41, %c0_42, %c96] : memref<1x8x128xf32, #tpu.memory_space<vmem>>, vector<1x8x32xf32>
    tpu.vector_store %arg15[%c0_41, %c0_42, %c96], %123 {strides = array<i32>} : memref<1x8x128xf32, #tpu.memory_space<vmem>>, vector<1x8x32xf32>,
    %c0_43 = arith.constant 0 : index
    %c0_44 = arith.constant 0 : index
    %c0_45 = arith.constant 0 : index
    %125 = vector.load %arg15[%c0_43, %c0_44, %c0_45] : memref<1x8x128xf32, #tpu.memory_space<vmem>>, vector<1x8x128xf32>
    %126 = vector.shape_cast %125 : vector<1x8x128xf32> to vector<8x128xf32>
    %127 = arith.truncf %126 : vector<8x128xf32> to vector<8x128xbf16>
    %c0_46 = arith.constant 0 : index
    %c0_47 = arith.constant 0 : index
    %128 = vector.load %arg6[%c0_46, %c0_47] : memref<128x128xbf16, #tpu.memory_space<vmem>>, vector<128x128xbf16>
    %cst_48 = arith.constant dense<0.000000e+00> : vector<8x128xf32>
    %129 = tpu.matmul %127, %128, %cst_48 {dimension_numbers = #tpu.dot_dimension_numbers<[1], [0], [0], [1], [0, 0, 1, 1], [], []>} : vector<8x128xbf16>, vector<128x128xbf16>, vector<8x128xf32> -> vector<8x128xf32>
    %c0_49 = arith.constant 0 : index
    %c0_50 = arith.constant 0 : index
    %130 = vector.load %arg7[%c0_49, %c0_50] : memref<1x128xf32, #tpu.memory_space<vmem>>, vector<1x128xf32>
    %131 = vector.broadcast %130 : vector<1x128xf32> to vector<8x128xf32>
    %132 = arith.addf %129, %131 : vector<8x128xf32>
    %133 = arith.addf %1, %132 : vector<8x128xf32>
    %c0_51 = arith.constant 0 : index
    %c0_52 = arith.constant 0 : index
    %134 = vector.load %arg8[%c0_51, %c0_52] : memref<1x128xf32, #tpu.memory_space<vmem>>, vector<1x128xf32>
    %c0_53 = arith.constant 0 : index
    %c0_54 = arith.constant 0 : index
    %135 = vector.load %arg9[%c0_53, %c0_54] : memref<1x128xf32, #tpu.memory_space<vmem>>, vector<1x128xf32>
    %cst_55 = arith.constant dense<0.000000e+00> : vector<8xf32>
    %136 = vector.multi_reduction <add>, %133, %cst_55 [1] : vector<8x128xf32> to vector<8xf32>
    %137 = vector.shape_cast %136 : vector<8xf32> to vector<8x1xf32>
    %cst_56 = arith.constant 1.280000e+02 : f32
    %138 = vector.broadcast %cst_56 : f32 to vector<8x1xf32>
    %139 = arith.divf %137, %138 : vector<8x1xf32>
    %140 = vector.broadcast %139 : vector<8x1xf32> to vector<8x128xf32>
    %141 = arith.subf %133, %140 : vector<8x128xf32>
    %142 = arith.mulf %141, %141 : vector<8x128xf32>
    %cst_57 = arith.constant dense<0.000000e+00> : vector<8xf32>
    %143 = vector.multi_reduction <add>, %142, %cst_57 [1] : vector<8x128xf32> to vector<8xf32>
    %144 = vector.shape_cast %143 : vector<8xf32> to vector<8x1xf32>
    %cst_58 = arith.constant 1.280000e+02 : f32
    %145 = vector.broadcast %cst_58 : f32 to vector<8x1xf32>
    %146 = arith.divf %144, %145 : vector<8x1xf32>
    %147 = vector.broadcast %139 : vector<8x1xf32> to vector<8x128xf32>
    %148 = arith.subf %133, %147 : vector<8x128xf32>
    %cst_59 = arith.constant 9.99999997E-7 : f32
    %149 = vector.broadcast %cst_59 : f32 to vector<8x1xf32>
    %150 = arith.addf %146, %149 : vector<8x1xf32>
    %151 = math.rsqrt %150 : vector<8x1xf32>
    %152 = vector.broadcast %151 : vector<8x1xf32> to vector<8x128xf32>
    %153 = arith.mulf %148, %152 : vector<8x128xf32>
    %154 = vector.broadcast %134 : vector<1x128xf32> to vector<8x128xf32>
    %155 = arith.mulf %153, %154 : vector<8x128xf32>
    %156 = vector.broadcast %135 : vector<1x128xf32> to vector<8x128xf32>
    %157 = arith.addf %155, %156 : vector<8x128xf32>
    %158 = arith.truncf %157 : vector<8x128xf32> to vector<8x128xbf16>
    %c0_60 = arith.constant 0 : index
    %c0_61 = arith.constant 0 : index
    %159 = vector.load %arg13[%c0_60, %c0_61] : memref<1x128xf32, #tpu.memory_space<vmem>>, vector<1x128xf32>
    %160 = vector.broadcast %159 : vector<1x128xf32> to vector<8x128xf32>
    %161 = arith.addf %133, %160 : vector<8x128xf32>
    %c0_62 = arith.constant 0 : index
    %c0_63 = arith.constant 0 : index
    %162 = vector.load %arg10[%c0_62, %c0_63] : memref<128x512xbf16, #tpu.memory_space<vmem>>, vector<128x512xbf16>
    %cst_64 = arith.constant dense<0.000000e+00> : vector<8x512xf32>
    %163 = tpu.matmul %158, %162, %cst_64 {dimension_numbers = #tpu.dot_dimension_numbers<[1], [0], [0], [1], [0, 0, 1, 1], [], []>} : vector<8x128xbf16>, vector<128x512xbf16>, vector<8x512xf32> -> vector<8x512xf32>
    %c0_65 = arith.constant 0 : index
    %c0_66 = arith.constant 0 : index
    %164 = vector.load %arg11[%c0_65, %c0_66] : memref<1x512xf32, #tpu.memory_space<vmem>>, vector<1x512xf32>
    %165 = vector.broadcast %164 : vector<1x512xf32> to vector<8x512xf32>
    %166 = arith.addf %163, %165 : vector<8x512xf32>
    %cst_67 = arith.constant 5.000000e-01 : f32
    %167 = vector.broadcast %cst_67 : f32 to vector<8x512xf32>
    %168 = arith.mulf %167, %166 : vector<8x512xf32>
    %cst_68 = arith.constant 0.707106769 : f32
    %169 = vector.broadcast %cst_68 : f32 to vector<8x512xf32>
    %170 = arith.mulf %166, %169 : vector<8x512xf32>
    %cst_69 = arith.constant 0.000000e+00 : f32
    %171 = vector.broadcast %cst_69 : f32 to vector<8x512xf32>
    %172 = arith.cmpf oge, %170, %171 : vector<8x512xf32>
    %cst_70 = arith.constant 1.000000e+00 : f32
    %cst_71 = arith.constant -1.000000e+00 : f32
    %173 = vector.broadcast %cst_70 : f32 to vector<8x512xf32>
    %174 = vector.broadcast %cst_71 : f32 to vector<8x512xf32>
    %175 = arith.select %172, %173, %174 : vector<8x512xi1>, vector<8x512xf32>
    %176 = math.absf %170 : vector<8x512xf32>
    %cst_72 = arith.constant 0.327591091 : f32
    %177 = vector.broadcast %cst_72 : f32 to vector<8x512xf32>
    %178 = arith.mulf %177, %176 : vector<8x512xf32>
    %cst_73 = arith.constant 1.000000e+00 : f32
    %179 = vector.broadcast %cst_73 : f32 to vector<8x512xf32>
    %180 = arith.addf %179, %178 : vector<8x512xf32>
    %181 = tpu.reciprocal %180 {approx = true} : vector<8x512xf32> -> vector<8x512xf32>
    %cst_74 = arith.constant 1.06140542 : f32
    %182 = vector.broadcast %cst_74 : f32 to vector<8x512xf32>
    %183 = arith.mulf %182, %181 : vector<8x512xf32>
    %cst_75 = arith.constant -1.45315206 : f32
    %184 = vector.broadcast %cst_75 : f32 to vector<8x512xf32>
    %185 = arith.addf %183, %184 : vector<8x512xf32>
    %186 = arith.mulf %185, %181 : vector<8x512xf32>
    %cst_76 = arith.constant 1.42141378 : f32
    %187 = vector.broadcast %cst_76 : f32 to vector<8x512xf32>
    %188 = arith.addf %186, %187 : vector<8x512xf32>
    %189 = arith.mulf %188, %181 : vector<8x512xf32>
    %cst_77 = arith.constant -0.284496725 : f32
    %190 = vector.broadcast %cst_77 : f32 to vector<8x512xf32>
    %191 = arith.addf %189, %190 : vector<8x512xf32>
    %192 = arith.mulf %191, %181 : vector<8x512xf32>
    %cst_78 = arith.constant 0.254829586 : f32
    %193 = vector.broadcast %cst_78 : f32 to vector<8x512xf32>
    %194 = arith.addf %192, %193 : vector<8x512xf32>
    %195 = arith.mulf %194, %181 : vector<8x512xf32>
    %cst_79 = arith.constant 0.000000e+00 : f32
    %196 = vector.broadcast %cst_79 : f32 to vector<8x512xf32>
    %197 = arith.subf %196, %176 : vector<8x512xf32>
    %198 = arith.mulf %197, %176 : vector<8x512xf32>
    %199 = math.exp %198 : vector<8x512xf32>
    %200 = arith.mulf %195, %199 : vector<8x512xf32>
    %cst_80 = arith.constant 1.000000e+00 : f32
    %201 = vector.broadcast %cst_80 : f32 to vector<8x512xf32>
    %202 = arith.subf %201, %200 : vector<8x512xf32>
    %203 = arith.mulf %175, %202 : vector<8x512xf32>
    %cst_81 = arith.constant 1.000000e+00 : f32
    %204 = vector.broadcast %cst_81 : f32 to vector<8x512xf32>
    %205 = arith.addf %204, %203 : vector<8x512xf32>
    %206 = arith.mulf %168, %205 : vector<8x512xf32>
    %207 = arith.truncf %206 : vector<8x512xf32> to vector<8x512xbf16>
    %c0_82 = arith.constant 0 : index
    %c0_83 = arith.constant 0 : index
    %208 = vector.load %arg12[%c0_82, %c0_83] : memref<512x128xbf16, #tpu.memory_space<vmem>>, vector<512x128xbf16>
    %cst_84 = arith.constant dense<0.000000e+00> : vector<8x128xf32>
    %209 = tpu.matmul %207, %208, %cst_84 {dimension_numbers = #tpu.dot_dimension_numbers<[1], [0], [0], [1], [0, 0, 1, 1], [], []>} : vector<8x512xbf16>, vector<512x128xbf16>, vector<8x128xf32> -> vector<8x128xf32>
    %210 = arith.addf %161, %209 : vector<8x128xf32>
    %211 = vector.shape_cast %210 : vector<8x128xf32> to vector<1x8x128xf32>
    %c0_85 = arith.constant 0 : index
    %c0_86 = arith.constant 0 : index
    %c0_87 = arith.constant 0 : index
    %212 = vector.load %arg14[%c0_85, %c0_86, %c0_87] : memref<1x8x128xf32, #tpu.memory_space<vmem>>, vector<1x8x128xf32>
    tpu.vector_store %arg14[%c0_85, %c0_86, %c0_87], %211 {strides = array<i32>} : memref<1x8x128xf32, #tpu.memory_space<vmem>>, vector<1x8x128xf32>,
    return
  }
  func.func @transform_0(%arg0: i32) -> (i32, i32, i32) {
    %c0_i32 = arith.constant 0 : i32
    %c0_i32_0 = arith.constant 0 : i32
    %c0_i32_1 = arith.constant 0 : i32
    return %arg0, %c0_i32, %c0_i32_0 : i32, i32, i32
  }
  func.func @transform_1(%arg0: i32) -> (i32, i32) {
    %c0_i32 = arith.constant 0 : i32
    %c0_i32_0 = arith.constant 0 : i32
    %c0_i32_1 = arith.constant 0 : i32
    return %c0_i32, %c0_i32_0 : i32, i32
  }
  func.func @transform_2(%arg0: i32) -> (i32, i32) {
    %c0_i32 = arith.constant 0 : i32
    %c0_i32_0 = arith.constant 0 : i32
    %c0_i32_1 = arith.constant 0 : i32
    return %c0_i32, %c0_i32_0 : i32, i32
  }
  func.func @transform_3(%arg0: i32) -> (i32, i32) {
    %c0_i32 = arith.constant 0 : i32
    %c0_i32_0 = arith.constant 0 : i32
    %c0_i32_1 = arith.constant 0 : i32
    return %c0_i32, %c0_i32_0 : i32, i32
  }
  func.func @transform_4(%arg0: i32) -> (i32, i32) {
    %c0_i32 = arith.constant 0 : i32
    %c0_i32_0 = arith.constant 0 : i32
    %c0_i32_1 = arith.constant 0 : i32
    return %c0_i32, %c0_i32_0 : i32, i32
  }
  func.func @transform_5(%arg0: i32) -> (i32, i32) {
    %c0_i32 = arith.constant 0 : i32
    %c0_i32_0 = arith.constant 0 : i32
    %c0_i32_1 = arith.constant 0 : i32
    return %c0_i32, %c0_i32_0 : i32, i32
  }
  func.func @transform_6(%arg0: i32) -> (i32, i32) {
    %c0_i32 = arith.constant 0 : i32
    %c0_i32_0 = arith.constant 0 : i32
    %c0_i32_1 = arith.constant 0 : i32
    return %c0_i32, %c0_i32_0 : i32, i32
  }
  func.func @transform_7(%arg0: i32) -> (i32, i32) {
    %c0_i32 = arith.constant 0 : i32
    %c0_i32_0 = arith.constant 0 : i32
    %c0_i32_1 = arith.constant 0 : i32
    return %c0_i32, %c0_i32_0 : i32, i32
  }
  func.func @transform_8(%arg0: i32) -> (i32, i32) {
    %c0_i32 = arith.constant 0 : i32
    %c0_i32_0 = arith.constant 0 : i32
    %c0_i32_1 = arith.constant 0 : i32
    return %c0_i32, %c0_i32_0 : i32, i32
  }
  func.func @transform_9(%arg0: i32) -> (i32, i32) {
    %c0_i32 = arith.constant 0 : i32
    %c0_i32_0 = arith.constant 0 : i32
    %c0_i32_1 = arith.constant 0 : i32
    return %c0_i32, %c0_i32_0 : i32, i32
  }
  func.func @transform_10(%arg0: i32) -> (i32, i32) {
    %c0_i32 = arith.constant 0 : i32
    %c0_i32_0 = arith.constant 0 : i32
    %c0_i32_1 = arith.constant 0 : i32
    return %c0_i32, %c0_i32_0 : i32, i32
  }
  func.func @transform_11(%arg0: i32) -> (i32, i32) {
    %c0_i32 = arith.constant 0 : i32
    %c0_i32_0 = arith.constant 0 : i32
    %c0_i32_1 = arith.constant 0 : i32
    return %c0_i32, %c0_i32_0 : i32, i32
  }
  func.func @transform_12(%arg0: i32) -> (i32, i32) {
    %c0_i32 = arith.constant 0 : i32
    %c0_i32_0 = arith.constant 0 : i32
    %c0_i32_1 = arith.constant 0 : i32
    return %c0_i32, %c0_i32_0 : i32, i32
  }
  func.func @transform_13(%arg0: i32) -> (i32, i32, i32) {
    %c0_i32 = arith.constant 0 : i32
    %c0_i32_0 = arith.constant 0 : i32
    %c0_i32_1 = arith.constant 0 : i32
    return %arg0, %c0_i32, %c0_i32_0 : i32, i32, i32
  }
}

module attributes {stable_mosaic.version = 11 : i64} {
  func.func @cls_ln_kernel(%arg0: i32, %arg1: memref<2x128xf32, #tpu.memory_space<vmem>>, %arg2: memref<1x128xf32, #tpu.memory_space<vmem>>, %arg3: memref<1x128xf32, #tpu.memory_space<vmem>>, %arg4: memref<2x128xf32, #tpu.memory_space<vmem>>) attributes {dimension_semantics = [#tpu.dimension_semantics<arbitrary>], iteration_bounds = array<i64: 1>, scalar_prefetch = 0 : i64, scratch_operands = 0 : i64, tpu.core_type = #tpu.core_type<tc>, window_params = [{pipeline_mode = #tpu.pipeline_mode<synchronous>, transform_indices = @transform_0, window_bounds = array<i64: 2, 128>}, {pipeline_mode = #tpu.pipeline_mode<synchronous>, transform_indices = @transform_1, window_bounds = array<i64: 1, 128>}, {pipeline_mode = #tpu.pipeline_mode<synchronous>, transform_indices = @transform_2, window_bounds = array<i64: 1, 128>}, {pipeline_mode = #tpu.pipeline_mode<synchronous>, transform_indices = @transform_3, window_bounds = array<i64: 2, 128>}]} {
    %c0 = arith.constant 0 : index
    %c0_0 = arith.constant 0 : index
    %0 = vector.load %arg1[%c0, %c0_0] : memref<2x128xf32, #tpu.memory_space<vmem>>, vector<2x128xf32>
    %c0_1 = arith.constant 0 : index
    %c0_2 = arith.constant 0 : index
    %1 = vector.load %arg2[%c0_1, %c0_2] : memref<1x128xf32, #tpu.memory_space<vmem>>, vector<1x128xf32>
    %c0_3 = arith.constant 0 : index
    %c0_4 = arith.constant 0 : index
    %2 = vector.load %arg3[%c0_3, %c0_4] : memref<1x128xf32, #tpu.memory_space<vmem>>, vector<1x128xf32>
    %cst = arith.constant dense<0.000000e+00> : vector<2xf32>
    %3 = vector.multi_reduction <add>, %0, %cst [1] : vector<2x128xf32> to vector<2xf32>
    %4 = vector.shape_cast %3 : vector<2xf32> to vector<2x1xf32>
    %cst_5 = arith.constant 1.280000e+02 : f32
    %5 = vector.broadcast %cst_5 : f32 to vector<2x1xf32>
    %6 = arith.divf %4, %5 : vector<2x1xf32>
    %7 = vector.broadcast %6 : vector<2x1xf32> to vector<2x128xf32>
    %8 = arith.subf %0, %7 : vector<2x128xf32>
    %9 = arith.mulf %8, %8 : vector<2x128xf32>
    %cst_6 = arith.constant dense<0.000000e+00> : vector<2xf32>
    %10 = vector.multi_reduction <add>, %9, %cst_6 [1] : vector<2x128xf32> to vector<2xf32>
    %11 = vector.shape_cast %10 : vector<2xf32> to vector<2x1xf32>
    %cst_7 = arith.constant 1.280000e+02 : f32
    %12 = vector.broadcast %cst_7 : f32 to vector<2x1xf32>
    %13 = arith.divf %11, %12 : vector<2x1xf32>
    %14 = vector.broadcast %6 : vector<2x1xf32> to vector<2x128xf32>
    %15 = arith.subf %0, %14 : vector<2x128xf32>
    %cst_8 = arith.constant 9.99999997E-7 : f32
    %16 = vector.broadcast %cst_8 : f32 to vector<2x1xf32>
    %17 = arith.addf %13, %16 : vector<2x1xf32>
    %18 = math.rsqrt %17 : vector<2x1xf32>
    %19 = vector.broadcast %18 : vector<2x1xf32> to vector<2x128xf32>
    %20 = arith.mulf %15, %19 : vector<2x128xf32>
    %21 = vector.broadcast %1 : vector<1x128xf32> to vector<2x128xf32>
    %22 = arith.mulf %20, %21 : vector<2x128xf32>
    %23 = vector.broadcast %2 : vector<1x128xf32> to vector<2x128xf32>
    %24 = arith.addf %22, %23 : vector<2x128xf32>
    %c0_9 = arith.constant 0 : index
    %c0_10 = arith.constant 0 : index
    %25 = vector.load %arg4[%c0_9, %c0_10] : memref<2x128xf32, #tpu.memory_space<vmem>>, vector<2x128xf32>
    tpu.vector_store %arg4[%c0_9, %c0_10], %24 {strides = array<i32>} : memref<2x128xf32, #tpu.memory_space<vmem>>, vector<2x128xf32>,
    return
  }
  func.func @transform_0(%arg0: i32) -> (i32, i32) {
    %c0_i32 = arith.constant 0 : i32
    %c0_i32_0 = arith.constant 0 : i32
    %c0_i32_1 = arith.constant 0 : i32
    return %c0_i32, %c0_i32_0 : i32, i32
  }
  func.func @transform_1(%arg0: i32) -> (i32, i32) {
    %c0_i32 = arith.constant 0 : i32
    %c0_i32_0 = arith.constant 0 : i32
    %c0_i32_1 = arith.constant 0 : i32
    return %c0_i32, %c0_i32_0 : i32, i32
  }
  func.func @transform_2(%arg0: i32) -> (i32, i32) {
    %c0_i32 = arith.constant 0 : i32
    %c0_i32_0 = arith.constant 0 : i32
    %c0_i32_1 = arith.constant 0 : i32
    return %c0_i32, %c0_i32_0 : i32, i32
  }
  func.func @transform_3(%arg0: i32) -> (i32, i32) {
    %c0_i32 = arith.constant 0 : i32
    %c0_i32_0 = arith.constant 0 : i32
    %c0_i32_1 = arith.constant 0 : i32
    return %c0_i32, %c0_i32_0 : i32, i32
  }
}

</mosaic_0001>

<bundles_post_ra>
// kernel: vit_forward.4
= control target key start
LH: loop header
LB: loop body
LE: loop exit
PB: predicated region body
PF: predicated region fallthrough
CT: control target
= control target key end

     0   :  { %v205_v0 = vmov 0   ;;  %vm125_vm0 = vcmask 523264   ;;  %s271_s1 = inlined_call_operand.vmem [shape: bf16[192,128], index: 1, kind: input, shape index: {}]   ;;  %s272_s0 = inlined_call_operand.vmem [shape: bf16[8,192], index: 0, kind: input, shape index: {}]   ;;  %s273_s2 = inlined_call_operand.vmem [shape: f32[1,128], index: 2, kind: input, shape index: {}]   ;;  %s274_s3 = inlined_call_operand.vmem [shape: f32[8,128], index: 3, kind: output, shape index: {}]  }
   0x1   :  { %129 = vmatprep.subr.bf16.mxu0 %v205_v0  ;;  %v191_v1 = vld [vmem:[%s271_s1 + $0x38] sm:$0xff]   ;;  %v192_v2 = vld [vmem:[%s271_s1 + $0x30] sm:$0xff]   ;;  %v193_v3 = vld [vmem:[%s271_s1 + $0x28] sm:$0xff]  }
   0x2   :  { %130 = vmatpush1.bf16.msra.mxu0 %v191_v1  ;;  %v194_v4 = vld [vmem:[%s271_s1 + $0x20] sm:$0xff]   ;;  %v195_v7 = vld [vmem:[%s271_s1 + $0x18] sm:$0xff]   ;;  %v196_v8 = vld [vmem:[%s271_s1 + $0x10] sm:$0xff]  }
   0x3   :  { %131 = vmatprep.subr.bf16.mxu0 %v205_v0  ;;  %v15_v5 = vld [vmem:[%s272_s0] sm:$0xff]  ;;  %v197_v9 = vld [vmem:[%s271_s1 + $0x8] sm:$0xff]   ;;  %v199_v11 = vld [vmem:[%s271_s1 + $0x58] sm:$0xff]  }
   0x4   :  { %v176_v6 = vcombine.high %v15_v5, %v15_v5  ;;  %v198_v10 = vld [vmem:[%s271_s1] sm:$0xff]   ;;  %v200_v12 = vld [vmem:[%s271_s1 + $0x50] sm:$0xff]   ;;  %v201_v13 = vld [vmem:[%s271_s1 + $0x48] sm:$0xff]   ;;  %v175_v15 = vcombine.low %v15_v5, %v15_v5 }
   0x5   :  { %v202_v14 = vld [vmem:[%s271_s1 + $0x40] sm:$0xff]  }
   0x6   :  { %132 = vmatpush1.bf16.msra.mxu0 %v192_v2  ;;  %189 = vmatprep.mubr.msk.bf16.mxu0 %vm125_vm0, %v176_v6  ;;  %v174_v16 = vld [vmem:[%s273_s2] ss:$0 sm:$0xff] }
   0x7   :  { %133 = vmatprep.subr.bf16.mxu0 %v205_v0 }
   0xa   :  { %134 = vmatpush1.bf16.msra.mxu0 %v193_v3 }
   0xb   :  { %135 = vmatprep.subr.bf16.mxu0 %v205_v0 }
   0xe   :  { %136 = vmatpush1.bf16.msra.mxu0 %v194_v4 }
   0xf   :  { %137 = vmatprep.subr.bf16.mxu0 %v205_v0 }
  0x12   :  { %138 = vmatpush1.bf16.msra.mxu0 %v195_v7 }
  0x13   :  { %139 = vmatprep.subr.bf16.mxu0 %v205_v0 }
  0x16   :  { %140 = vmatpush1.bf16.msra.mxu0 %v196_v8 }
  0x17   :  { %141 = vmatprep.subr.bf16.mxu0 %v205_v0 }
  0x1a   :  { %142 = vmatpush1.bf16.msra.mxu0 %v197_v9 }
  0x1b   :  { %143 = vmatprep.subr.bf16.mxu0 %v205_v0 }
  0x1e   :  { %144 = vmatpush1.bf16.msra.mxu0 %v198_v10 }
  0x1f   :  { %153 = vmatprep.subr.bf16.mxu0 %v205_v0 }
  0x22   :  { %154 = vmatpush2.bf16.msra.mxu0 %v199_v11 }
  0x23   :  { %155 = vmatprep.subr.bf16.mxu0 %v205_v0 }
  0x26   :  { %156 = vmatpush2.bf16.msra.mxu0 %v200_v12 }
  0x27   :  { %157 = vmatprep.subr.bf16.mxu0 %v205_v0 }
  0x2a   :  { %158 = vmatpush2.bf16.msra.mxu0 %v201_v13 }
  0x2b   :  { %159 = vmatprep.subr.bf16.mxu0 %v205_v0 }
  0x2e   :  { %160 = vmatpush2.bf16.msra.mxu0 %v202_v14 }
  0x31   :  { %162 = vmatmul.mubr.bf16.vlgmr.msra.gmra.mxu0 %v175_v15 }
  0xf1   :  { %v163_v17 = vpop.f32.mrf.mxu0 }
  0xf2   :  { %v164_v18 = vadd.f32 %v174_v16, %v163_v17 }
  0xf3   :  { %v165_v19 = vpop.f32.mrf.mxu0 }
  0xf4   :  { %169 = vst [vmem:[%s274_s3] sm:$0xff] %v164_v18 }
  0xf5   :  { %v166_v20 = vpop.f32.mrf.mxu0 }
  0xf7   :  { %v167_v21 = vpop.f32.mrf.mxu0 }

// kernel: vit_forward.7
= control target key start
LH: loop header
LB: loop body
LE: loop exit
PB: predicated region body
PF: predicated region fallthrough
CT: control target
= control target key end

     0   :  { %vm18_vm0 = vcmask 1041408   ;;  %s122_s0 = inlined_call_operand.vmem [shape: f32[2,128], index: 0, kind: input, shape index: {}]   ;;  %s123_s1 = inlined_call_operand.vmem [shape: f32[1,128], index: 1, kind: input, shape index: {}]   ;;  %s124_s2 = inlined_call_operand.vmem [shape: f32[1,128], index: 2, kind: input, shape index: {}]   ;;  %s125_s3 = inlined_call_operand.hbm [shape: f32[2,128], index: 3, kind: output, shape index: {}]  }
   0x1   :  { %v15_v0 = vld [vmem:[%s122_s0] sm:$0x3] }
   0x2   :  { %8 = vsyncpa [#allocation3], 0  ;;  %v19_v1 = vsel %vm18_vm0, %v15_v0, 0.0  ;;  %v62_v11 = vld [vmem:[%s123_s1] ss:$0 sm:$0xff]  ;;  %s89_s17 = smov [#allocation2]  }
   0x3   :  { %20 = vadd.xlane.f32.xlu0 %v19_v1  ;;  %v63_v13 = vld [vmem:[%s124_s2] ss:$0 sm:$0xff]  ;;  %s54_s18 = sshll.u32 %s89_s17, 4  ;;  %s55_s18 = int_to_ptr.vmem [resolvable:$true] %s54_s18 }
   0x4   :  { %s67_s19 = scalar_lea.vmem %s55_s18, 32  ;;  %p72_p1 = scmp.lt.s32.totalorder %s55_s18, %s55_s18 }
   0x5   :  { %p68_p0 = scmp.ne.s32.totalorder %s55_s18, %s67_s19  ;;  %p73_p2 = scmp.lt.s32.totalorder %s67_s19, %s67_s19 }
   0x7   :  { %p74_p3 = por %p73_p2, %p72_p1 }
   0x9   :  { %p75_p4 = pnand %p74_p3, %p68_p0 }
  0x8c   :  { %v21_v2 = vpop.xlane.xlu0 %20 }
  0x8d   :  { %v23_v3 = vmul.f32 0.0078125, %v21_v2 }
  0x8f   :  { %v24_v4 = vsub.f32 %v15_v0, %v23_v3 }
  0x91   :  { %v25_v5 = vmul.f32 %v24_v4, %v24_v4 }
  0x93   :  { %v26_v6 = vsel %vm18_vm0, %v25_v5, 0.0 }
  0x94   :  { %27 = vadd.xlane.f32.xlu0 %v26_v6 }
 0x11d   :  { %v28_v7 = vpop.xlane.xlu0 %27 }
 0x11e   :  { %v29_v8 = vmul.f32 0.0078125, %v28_v7 }
 0x120   :  { %v30_v9 = vadd.f32 1e-06, %v29_v8 }
 0x122   :  { %65 = vrsqrt.f32 %v30_v9 }
 0x12f   :  { %v66_v10 = vpop.eup %65 }
 0x130   :  { %v32_v12 = vmul.f32 %v66_v10, %v24_v4 }
 0x132   :  { %v39_v14 = vmul.f32 %v62_v11, %v32_v12 }
 0x134   :  { %v46_v15 = vadd.f32 %v63_v13, %v39_v14 }
 0x136   :  { %47 = vst [vmem:[#allocation2] sm:$0x3] %v46_v15 }
 0x137   :  { %78 = shalt.err (!%p75_p4)
}
 0x138   :  { %57 = dma.vmem_to_hbm [thread:$0]  %s55_s18, 32, %s125_s3, [#allocation3]  }
 0x139   :  { %87 = dma.done.wait [#allocation3], 32  }
 0x13a   :  { %88 = vsyncadd [#allocation3], 4294967264 }
 0x13b   :  { %61 = vsyncpa [#allocation3], 1 }

// kernel: vit_forward.5
= control target key start
LH: loop header
LB: loop body
LE: loop exit
PB: predicated region body
PF: predicated region fallthrough
CT: control target
= control target key end

     0   :  { %19 = vsyncpa [#allocation4], 0  ;;  %s3866_s0 = inlined_call_operand.vmem [shape: f32[2,8,128], index: 0, kind: input, shape index: {}]   ;;  %s3867_s1 = inlined_call_operand.vmem [shape: f32[1,8,128], index: 1, kind: input, shape index: {}]   ;;  %s3868_s2 = inlined_call_operand.hbm [shape: f32[1,128], index: 2, kind: input, shape index: {}]   ;;  %s3869_s3 = inlined_call_operand.hbm [shape: f32[1,128], index: 3, kind: input, shape index: {}]   ;;  %s3870_s4 = inlined_call_operand.vmem [shape: bf16[128,384], index: 4, kind: input, shape index: {}]   ;;  %s3871_s5 = inlined_call_operand.hbm [shape: f32[1,384], index: 5, kind: input, shape index: {}]   ;;  %s3872_s6 = inlined_call_operand.hbm [shape: bf16[128,128], index: 6, kind: input, shape index: {}]   ;;  %s3873_s7 = inlined_call_operand.hbm [shape: f32[1,128], index: 7, kind: input, shape index: {}]   ;;  %s3874_s8 = inlined_call_operand.hbm [shape: f32[1,128], index: 8, kind: input, shape index: {}]   ;;  %s3875_s9 = inlined_call_operand.hbm [shape: f32[1,128], index: 9, kind: input, shape index: {}]   ;;  %s3876_s10 = inlined_call_operand.vmem [shape: bf16[128,512], index: 10, kind: input, shape index: {}]   ;;  %s3877_s11 = inlined_call_operand.hbm [shape: f32[1,512], index: 11, kind: input, shape index: {}]   ;;  %s3878_s12 = inlined_call_operand.vmem [shape: bf16[512,128], index: 12, kind: input, shape index: {}]   ;;  %s3879_s13 = inlined_call_operand.hbm [shape: f32[1,128], index: 13, kind: input, shape index: {}]   ;;  %s3880_s14 = inlined_call_operand.vmem [shape: f32[2,8,128], index: 14, kind: output, shape index: {}]  }
   0x1   :  { %20 = vsyncpa [#allocation6], 0 }
   0x2   :  { %21 = vsyncpa [#allocation9], 0 }
   0x3   :  { %22 = vsyncpa [#allocation12], 0 }
   0x4   :  { %23 = vsyncpa [#allocation15], 0  ;;  %s3293_s29 = smov 0  }
   0x5 LB: > { %s3199_s30 = smov [#allocation5]   ;;  %s3299_s16 = sadd.s32 4294967295, %s3197_s29   ;;  %s3197_s29 = sphi %s3293_s29, %s29_s29  }
   0x6   : > { %s386_s15 = sshll.u32 %s3199_s30, 4  ;;  %p2371_p0 = scmp.ge.s32.totalorder %s3197_s29, 1  ;;  %s387_s15 = int_to_ptr.vmem [resolvable:$true] %s386_s15 }
   0x7   : > { %p359_p1 = scmp.lt.s32.totalorder %s3197_s29, 3  ;;  %p3881_p2 = scmp.eq.s32.totalorder %s3299_s16, 0 }
   0x8   : > { %s3200_s18 = smov [#allocation8]   ;;  %s3201_s21 = smov [#allocation11]  }
   0x9   : > { %p3304_p3 = pnand %p2371_p0, %p359_p1  ;;  %s410_s19 = sshll.u32 %s3200_s18, 4  ;;  %s3310_s19 = int_to_ptr.vmem [resolvable:$true] %s410_s19 }
   0xa   : > { %s435_s22 = sshll.u32 %s3201_s21, 4  ;;  %s3202_s23 = smov [#allocation14]   ;;  %s3318_s22 = int_to_ptr.vmem [resolvable:$true] %s435_s22 }
   0xb   : > { %p2708_p4 = pneg %p3304_p3  ;;  %s3320_s24 = sshll.u32 %s3202_s23, 4  ;;  %s461_s24 = int_to_ptr.vmem [resolvable:$true] %s3320_s24 }
   0xc   : > { %s2948_s26 = scalar_lea.vmem %s387_s15, 16  ;;  %s2955_s27 = scalar_lea.vmem %s387_s15, 32 }
   0xd   : > { %p3314_p5 = pnand %p3881_p2, %p2708_p4  ;;  %p2949_p7 = scmp.ne.s32.totalorder %s387_s15, %s2948_s26 }
   0xe   : > { %p2956_p10 = scmp.lt.s32.totalorder %s387_s15, %s387_s15  ;;  %p2957_p11 = scmp.lt.s32.totalorder %s2955_s27, %s2948_s26 }
   0xf   : > { %p3324_p6 = pneg %p3314_p5 }
  0x10   : > { %p2958_p12 = por %p2957_p11, %p2956_p10 }
  0x11   : > { %p2951_p8 = pnand %p2949_p7, %p3324_p6 }
  0x13   : > { %p2952_p9 = pneg %p2951_p8 }
  0x15   : > { %p2959_p13 = pnand %p2958_p12, %p2952_p9 }
  0x17   : > { %2962 = shalt.err (!%p2959_p13)
}
  0x18   : > { %2714 = dma.hbm_to_vmem [thread:$0]  (!%p3314_p5), %s3869_s3, 16, %s387_s15, [#allocation6]  }
  0x19   : > { %s2974_s18 = scalar_lea.vmem %s3310_s19, 1024  ;;  %p2982_p7 = scmp.lt.s32.totalorder %s3310_s19, %s3310_s19 }
  0x1a   : > { %p2975_p0 = scmp.ne.s32.totalorder %s3310_s19, %s2974_s18  ;;  %p2983_p8 = scmp.lt.s32.totalorder %s2974_s18, %s2974_s18 }
  0x1c   : > { %p2977_p1 = pnand %p2975_p0, %p3324_p6  ;;  %p2984_p9 = por %p2983_p8, %p2982_p7 }
  0x1e   : > { %p2978_p4 = pneg %p2977_p1 }
  0x20   : > { %p2985_p10 = pnand %p2984_p9, %p2978_p4 }
  0x22   : > { %2988 = shalt.err (!%p2985_p10)
}
  0x23   : > { %s3203_s21 = smov 64   ;;  %s3204_s15 = smov 4  }
  0x24   : > { %2720 = dma.hbm_to_vmem [thread:$0]  (!%p3314_p5), %s3872_s6, 1024, %s3310_s19, [#allocation9], %s3203_s21, %s3203_s21, %s3204_s15  }
  0x25   : > { %s3000_s27 = scalar_lea.vmem %s3318_s22, 16  ;;  %s3007_s28 = scalar_lea.vmem %s3318_s22, 32 }
  0x26   : > { %p3001_p11 = scmp.ne.s32.totalorder %s3318_s22, %s3000_s27  ;;  %p3008_p0 = scmp.lt.s32.totalorder %s3318_s22, %s3318_s22 }
  0x27   : > { %p3009_p1 = scmp.lt.s32.totalorder %s3007_s28, %s3000_s27 }
  0x28   : > { %p3003_p12 = pnand %p3001_p11, %p3324_p6 }
  0x29   : > { %p3010_p4 = por %p3009_p1, %p3008_p0 }
  0x2a   : > { %p3004_p13 = pneg %p3003_p12 }
  0x2c   : > { %p3011_p7 = pnand %p3010_p4, %p3004_p13 }
  0x2e   : > { %3014 = shalt.err (!%p3011_p7)
}
  0x2f   : > { %2726 = dma.hbm_to_vmem [thread:$0]  (!%p3314_p5), %s3874_s8, 16, %s3318_s22, [#allocation12]  }
  0x30   : > { %s3026_s19 = scalar_lea.vmem %s461_s24, 64  ;;  %p3034_p11 = scmp.lt.s32.totalorder %s461_s24, %s461_s24 }
  0x31   : > { %p3027_p8 = scmp.ne.s32.totalorder %s461_s24, %s3026_s19  ;;  %p3035_p12 = scmp.lt.s32.totalorder %s3026_s19, %s3026_s19 }
  0x33   : > { %p3029_p9 = pnand %p3027_p8, %p3324_p6  ;;  %p3036_p0 = por %p3035_p12, %p3034_p11 }
  0x35   : > { %p3030_p10 = pneg %p3029_p9 }
  0x37   : > { %p3037_p13 = pnand %p3036_p0, %p3030_p10 }
  0x39   : > { %3040 = shalt.err (!%p3037_p13)
}
  0x3a   : > { %2732 = dma.hbm_to_vmem [thread:$0]  (!%p3314_p5), %s3877_s11, 64, %s461_s24, [#allocation15]  }
  0x3b   : > { %s3205_s23 = smov [#allocation3]   ;;  %s3206_s26 = smov [#allocation7]  }
  0x3c   : > { %s375_s22 = sshll.u32 %s3205_s23, 4  ;;  %s400_s27 = sshll.u32 %s3206_s26, 4  ;;  %s376_s22 = int_to_ptr.vmem [resolvable:$true] %s375_s22  ;;  %s401_s27 = int_to_ptr.vmem [resolvable:$true] %s400_s27 }
  0x3d   : > { %s3052_s28 = scalar_lea.vmem %s376_s22, 16  ;;  %s3059_s30 = scalar_lea.vmem %s376_s22, 32 }
  0x3e   : > { %p3053_p1 = scmp.ne.s32.totalorder %s376_s22, %s3052_s28  ;;  %p3060_p8 = scmp.lt.s32.totalorder %s376_s22, %s376_s22 }
  0x3f   : > { %p3061_p9 = scmp.lt.s32.totalorder %s3059_s30, %s3052_s28 }
  0x40   : > { %p3055_p4 = pnand %p3053_p1, %p3324_p6 }
  0x41   : > { %p3062_p10 = por %p3061_p9, %p3060_p8 }
  0x42   : > { %p3056_p7 = pneg %p3055_p4 }
  0x44   : > { %p3063_p11 = pnand %p3062_p10, %p3056_p7 }
  0x46   : > { %3066 = shalt.err (!%p3063_p11)
}
  0x47   : > { %2711 = dma.hbm_to_vmem [thread:$0]  (!%p3314_p5), %s3868_s2, 16, %s376_s22, [#allocation4]  }
  0x48   : > { %s3078_s19 = scalar_lea.vmem %s401_s27, 48  ;;  %s3085_s21 = scalar_lea.vmem %s401_s27, 64 }
  0x49   : > { %p3079_p12 = scmp.ne.s32.totalorder %s401_s27, %s3078_s19  ;;  %p3086_p1 = scmp.lt.s32.totalorder %s401_s27, %s401_s27 }
  0x4a   : > { %p3087_p4 = scmp.lt.s32.totalorder %s3085_s21, %s3078_s19 }
  0x4b   : > { %p3081_p0 = pnand %p3079_p12, %p3324_p6 }
  0x4c   : > { %p3088_p2 = por %p3087_p4, %p3086_p1 }
  0x4d   : > { %p3082_p13 = pneg %p3081_p0 }
  0x4f   : > { %p3089_p8 = pnand %p3088_p2, %p3082_p13 }
  0x51   : > { %3092 = shalt.err (!%p3089_p8)
}
  0x52   : > { %2717 = dma.hbm_to_vmem [thread:$0]  (!%p3314_p5), %s3871_s5, 48, %s401_s27, [#allocation6]  }
  0x53   : > { %s3207_s22 = smov [#allocation10]   ;;  %s3208_s28 = smov [#allocation13]  }
  0x54   : > { %s424_s26 = sshll.u32 %s3207_s22, 4  ;;  %s446_s30 = sshll.u32 %s3208_s28, 4  ;;  %s425_s26 = int_to_ptr.vmem [resolvable:$true] %s424_s26  ;;  %s447_s30 = int_to_ptr.vmem [resolvable:$true] %s446_s30 }
  0x55   : > { %s3104_s18 = scalar_lea.vmem %s425_s26, 16  ;;  %s3111_s24 = scalar_lea.vmem %s425_s26, 32 }
  0x56   : > { %p3105_p7 = scmp.ne.s32.totalorder %s425_s26, %s3104_s18  ;;  %p3112_p2 = scmp.lt.s32.totalorder %s425_s26, %s425_s26 }
  0x57   : > { %p3113_p11 = scmp.lt.s32.totalorder %s3111_s24, %s3104_s18 }
  0x58   : > { %p3107_p9 = pnand %p3105_p7, %p3324_p6 }
  0x59   : > { %p3114_p12 = por %p3113_p11, %p3112_p2 }
  0x5a   : > { %p3108_p10 = pneg %p3107_p9 }
  0x5c   : > { %p3115_p0 = pnand %p3114_p12, %p3108_p10 }
  0x5e   : > { %3118 = shalt.err (!%p3115_p0)
}
  0x5f   : > { %2723 = dma.hbm_to_vmem [thread:$0]  (!%p3314_p5), %s3873_s7, 16, %s425_s26, [#allocation9]  }
  0x60   : > { %s3130_s21 = scalar_lea.vmem %s447_s30, 16  ;;  %s3137_s15 = scalar_lea.vmem %s447_s30, 32 }
  0x61   : > { %p3131_p13 = scmp.ne.s32.totalorder %s447_s30, %s3130_s21  ;;  %p3138_p8 = scmp.lt.s32.totalorder %s447_s30, %s447_s30 }
  0x62   : > { %p3139_p7 = scmp.lt.s32.totalorder %s3137_s15, %s3130_s21 }
  0x63   : > { %p3133_p1 = pnand %p3131_p13, %p3324_p6 }
  0x64   : > { %p3140_p9 = por %p3139_p7, %p3138_p8 }
  0x65   : > { %p3134_p4 = pneg %p3133_p1 }
  0x67   : > { %p3141_p2 = pnand %p3140_p9, %p3134_p4 }
  0x69   : > { %3144 = shalt.err (!%p3141_p2)
}
  0x6a   : > { %2729 = dma.hbm_to_vmem [thread:$0]  (!%p3314_p5), %s3875_s9, 16, %s447_s30, [#allocation12]  }
  0x6b   : > { %s3209_s26 = smov [#allocation16]  }
  0x6c   : > { %s474_s28 = sshll.u32 %s3209_s26, 4  ;;  %s475_s28 = int_to_ptr.vmem [resolvable:$true] %s474_s28 }
  0x6d   : > { %s3156_s18 = scalar_lea.vmem %s475_s28, 16  ;;  %s3163_s24 = scalar_lea.vmem %s475_s28, 32 }
  0x6e   : > { %p3157_p10 = scmp.ne.s32.totalorder %s475_s28, %s3156_s18  ;;  %p3164_p0 = scmp.lt.s32.totalorder %s475_s28, %s475_s28 }
  0x6f   : > { %p3165_p13 = scmp.lt.s32.totalorder %s3163_s24, %s3156_s18 }
  0x70   : > { %p3159_p11 = pnand %p3157_p10, %p3324_p6 }
  0x71   : > { %p3166_p1 = por %p3165_p13, %p3164_p0 }
  0x72   : > { %p3160_p12 = pneg %p3159_p11 }
  0x74   : > { %p3167_p4 = pnand %p3166_p1, %p3160_p12 }
  0x76   : > { %3170 = shalt.err (!%p3167_p4)
}
  0x77   : > { %2735 = dma.hbm_to_vmem [thread:$0]  (!%p3314_p5), %s3879_s13, 16, %s475_s28, [#allocation15]  }
  0x78   : > { %494 = sbr.rel (%p3304_p3) target bundleno = 2980 (0xba4), region = 76  ;;  %p3885_p8 = scmp.eq.s32.totalorder (!%p3304_p3), %s3299_s16, 0 }
  0x7d   : > { %3176 = dma.done.wait (%p3885_p8), [#allocation4], 16   ;;  %p3886_p6 = pmov %p3885_p8 }
  0x7f   : > { %3178 = vsyncadd (%p3886_p6), [#allocation4], 4294967280  ;;  %p3887_p7 = pmov %p3886_p6 }
  0x80   : > { %p3888_p9 = pmov %p3886_p6 }
  0x81   : > { %3180 = dma.done.wait (%p3887_p7), [#allocation6], 64  }
  0x82   : > { %3182 = vsyncadd (%p3888_p9), [#allocation6], 4294967232  ;;  %p3889_p2 = pmov %p3886_p6 }
  0x84   : > { %3184 = dma.done.wait (%p3889_p2), [#allocation9], 1040   ;;  %p3890_p5 = pmov %p3889_p2 }
  0x85   : > { %p3891_p3 = pmov %p3889_p2 }
  0x86   : > { %3186 = vsyncadd (%p3890_p5), [#allocation9], 4294966256 }
  0x87   : > { %3188 = dma.done.wait (%p3891_p3), [#allocation12], 32   ;;  %p3892_p10 = pmov %p3889_p2 }
  0x88   : > { %p3893_p11 = pmov %p3889_p2 }
  0x89   : > { %3190 = vsyncadd (%p3892_p10), [#allocation12], 4294967264 }
  0x8a   : > { %3192 = dma.done.wait (%p3893_p11), [#allocation15], 80   ;;  %p3894_p12 = pmov %p3889_p2 }
  0x8b   : > { %p570_p0 = scmp.lt.s32.totalorder %s3299_s16, 1  ;;  %v580_v1 = vld [vmem:[%s3867_s1] sm:$0xff]  ;;  %v2781_v3 = vld [vmem:[%s3870_s4 + $0xac] ss:$12 sps:$4 sm:$0xff]   ;;  %v2783_v4 = vld [vmem:[%s3870_s4 + $0xa8] ss:$12 sps:$4 sm:$0xff]   ;;  %v645_v43 = vlaneseq }
  0x8c   : > { %3194 = vsyncadd (%p3894_p12), [#allocation15], 4294967216  ;;  %v3210_v5 = vmov 0.0   ;;  %v2784_v6 = vld [vmem:[%s3870_s4 + $0xb0] ss:$12 sps:$4 sm:$0xff]   ;;  %788 = vmatprep.subr.bf16.mxu0 %v2781_v3  ;;  %v3211_v24 = vmov 0  }
  0x8d   : > { %s3896_s16 = smov (!%p570_p0, %s3299_s16), 1  ;;  %2584 = vmatprep.subr.bf16.mxu1 %v3210_v5  ;;  %v2785_v7 = vld [vmem:[%s3870_s4 + $0x94] ss:$12 sps:$4 sm:$0xff]   ;;  %v2787_v8 = vld [vmem:[%s3870_s4 + $0x90] ss:$12 sps:$4 sm:$0xff]   ;;  %789 = vmatpush1.bf16.msra.mxu0 %v2783_v4  ;;  %vm3212_vm0 = vmmov 0  }
  0x8e   : > { %s2392_s17 = sshll.u32 %s3896_s16, 3  ;;  %v2788_v9 = vld [vmem:[%s3870_s4 + $0x98] ss:$12 sps:$4 sm:$0xff]   ;;  %2585 = vmatpush3.bf16.msra.mxu1 %v2784_v6  ;;  %790 = vmatprep.subr.bf16.mxu0 %v2785_v7  ;;  %v2789_v14 = vld [vmem:[%s3870_s4 + $0x7c] ss:$12 sps:$4 sm:$0xff]   ;;  %v3531_v44 = vshrl.u32 %v645_v43, 7 }
  0x8f   : > { %s573_s30 = scalar_lea.vmem %s3866_s0, %s2392_s17  ;;  %2586 = vmatprep.subr.bf16.mxu1 %v3210_v5  ;;  %v2791_v15 = vld [vmem:[%s3870_s4 + $0x78] ss:$12 sps:$4 sm:$0xff]   ;;  %v2792_v16 = vld [vmem:[%s3870_s4 + $0x80] ss:$12 sps:$4 sm:$0xff]   ;;  %v2796_v19 = vld [vmem:[%s3870_s4 + $0x68] ss:$12 sps:$4 sm:$0xff]   ;;  %820 = vmatprep.mubr.bf16.mxu0 %v3211_v24  ;;  %s577_s15 = scalar_lea.vmem %s3880_s14, %s2392_s17 }
  0x90   : > { %v579_v0 = vld [vmem:[%s573_s30] sm:$0xff]  ;;  %v2797_v20 = vld [vmem:[%s3870_s4 + $0x4c] ss:$12 sps:$4 sm:$0xff]   ;;  %v2799_v21 = vld [vmem:[%s3870_s4 + $0x48] ss:$12 sps:$4 sm:$0xff]   ;;  %2600 = vmatprep.mubr.msk.bf16.mxu1 %vm3212_vm0, %v3210_v5  ;;  %v651_v45 = vsub.s32 1, %v3531_v44 }
  0x91   : > { %v3438_v2 = vadd.f32 %v580_v1, %v579_v0  ;;  %791 = vmatpush1.bf16.msra.mxu0 %v2787_v8  ;;  %v2793_v17 = vld [vmem:[%s3870_s4 + $0x64] ss:$12 sps:$4 sm:$0xff]   ;;  %v2795_v18 = vld [vmem:[%s3870_s4 + $0x60] ss:$12 sps:$4 sm:$0xff]   ;;  %v2805_v27 = vld [vmem:[%s3870_s4 + $0x1c] ss:$12 sps:$4 sm:$0xff]  }
  0x92   : > { %2587 = vmatpush3.bf16.msra.mxu1 %v2788_v9  ;;  %792 = vmatprep.subr.bf16.mxu0 %v2789_v14  ;;  %v2800_v22 = vld [vmem:[%s3870_s4 + $0x50] ss:$12 sps:$4 sm:$0xff]   ;;  %v2801_v23 = vld [vmem:[%s3870_s4 + $0x34] ss:$12 sps:$4 sm:$0xff]   ;;  %v2804_v26 = vld [vmem:[%s3870_s4 + $0x38] ss:$12 sps:$4 sm:$0xff]  }
  0x93   : > { %584 = vadd.xlane.f32.xlu0 %v3438_v2  ;;  %2588 = vmatprep.subr.bf16.mxu1 %v3210_v5  ;;  %v2803_v25 = vld [vmem:[%s3870_s4 + $0x30] ss:$12 sps:$4 sm:$0xff]   ;;  %v2807_v28 = vld [vmem:[%s3870_s4 + $0x18] ss:$12 sps:$4 sm:$0xff]   ;;  %v2808_v29 = vld [vmem:[%s3870_s4 + $0x20] ss:$12 sps:$4 sm:$0xff]  }
  0x94   : > { %v2809_v30 = vld [vmem:[%s3870_s4 + $0x4] ss:$12 sps:$4 sm:$0xff]   ;;  %v2811_v31 = vld [vmem:[%s3870_s4] ss:$12 sps:$4 sm:$0xff]   ;;  %v2812_v32 = vld [vmem:[%s3870_s4 + $0x8] ss:$12 sps:$4 sm:$0xff]  }
  0x95   : > { %793 = vmatpush1.bf16.msra.mxu0 %v2791_v15  ;;  %v2394_v37 = vld [vmem:[#allocation3] ss:$0 sm:$0xff]  ;;  %v2395_v39 = vld [vmem:[#allocation5] ss:$0 sm:$0xff]  ;;  %v647_v46 = vsub.s32 0, %v3531_v44  ;;  %v655_v48 = vsub.s32 2, %v3531_v44 }
  0x96   : > { %2589 = vmatpush3.bf16.msra.mxu1 %v2792_v16  ;;  %794 = vmatprep.subr.bf16.mxu0 %v2793_v17  ;;  %v643_v47 = vld [vmem:[#allocation7] sm:$0x7]  ;;  %vm877_vm1 = vcmask 261120   ;;  %s3213_s25 = smov 96   ;;  %s3214_s30 = smov 32   ;;  %vm940_vm2 = vcmask 1043456  }
  0x97   : > { %2590 = vmatprep.subr.bf16.mxu1 %v3210_v5  ;;  %v652_v49 = vrot.slane %v643_v47, %v651_v45  ;;  %v648_v52 = vrot.slane %v643_v47, %v647_v46  ;;  %v656_v55 = vrot.slane %v643_v47, %v655_v48  ;;  %v874_v7 = vand.u32 127, %v645_v43  ;;  %s3216_s21 = smov 64  }
  0x98   : > { %v3215_v8 = vmov -1e+30   ;;  %vm924_vm4 = vcmask 64512   ;;  %vm1102_vm5 = vcmask 523520   ;;  %vm1218_vm6 = vcmask 785920  }
  0x99   : > { %795 = vmatpush1.bf16.msra.mxu0 %v2795_v18  ;;  %vm875_vm3 = vcmp.lt.s32.totalorder %v874_v7, 5  ;;  %vm1334_vm7 = vcmask 1048320  }
  0x9a   : > { %2591 = vmatpush3.bf16.msra.mxu1 %v2796_v19  ;;  %796 = vmatprep.subr.bf16.mxu0 %v2797_v20  ;;  %v3554_v9 = vsel %vm875_vm3, 0.0, %v3215_v8 }
  0x9b   : > { %2592 = vmatprep.subr.bf16.mxu1 %v3210_v5 }
  0x9d   : > { %797 = vmatpush1.bf16.msra.mxu0 %v2799_v21 }
  0x9e   : > { %2593 = vmatpush3.bf16.msra.mxu1 %v2800_v22  ;;  %798 = vmatprep.subr.bf16.mxu0 %v2801_v23 }
  0x9f   : > { %2594 = vmatprep.subr.bf16.mxu1 %v3210_v5 }
  0xa1   : > { %799 = vmatpush1.bf16.msra.mxu0 %v2803_v25 }
  0xa2   : > { %2595 = vmatpush3.bf16.msra.mxu1 %v2804_v26  ;;  %800 = vmatprep.subr.bf16.mxu0 %v2805_v27 }
  0xa3   : > { %2596 = vmatprep.subr.bf16.mxu1 %v3210_v5 }
  0xa5   : > { %801 = vmatpush1.bf16.msra.mxu0 %v2807_v28 }
  0xa6   : > { %2597 = vmatpush3.bf16.msra.mxu1 %v2808_v29  ;;  %802 = vmatprep.subr.bf16.mxu0 %v2809_v30 }
  0xa7   : > { %2598 = vmatprep.subr.bf16.mxu1 %v3210_v5 }
  0xa9   : > { %803 = vmatpush1.bf16.msra.mxu0 %v2811_v31 }
  0xaa   : > { %2599 = vmatpush3.bf16.msra.mxu1 %v2812_v32  ;;  %2628 = vmatprep.subr.bf16.mxu0 %v3210_v5 }
  0xab   : > { %2604 = vmatprep.subr.bf16.mxu1 %v3210_v5 }
 0x11c   : > { %v585_v10 = vpop.xlane.xlu0 %584 }
 0x11d   : > { %v587_v11 = vmul.f32 0.0078125, %v585_v10 }
 0x11f   : > { %v588_v12 = vsub.f32 %v3438_v2, %v587_v11 }
 0x121   : > { %v589_v13 = vmul.f32 %v588_v12, %v588_v12 }
 0x123   : > { %590 = vadd.xlane.f32.xlu0 %v589_v13 }
 0x1ac   : > { %v591_v33 = vpop.xlane.xlu0 %590 }
 0x1ad   : > { %v592_v34 = vmul.f32 0.0078125, %v591_v33 }
 0x1af   : > { %v593_v35 = vadd.f32 1e-06, %v592_v34 }
 0x1b1   : > { %2901 = vrsqrt.f32 %v593_v35 }
 0x1be   : > { %v2902_v36 = vpop.eup %2901 }
 0x1bf   : > { %v595_v38 = vmul.f32 %v2902_v36, %v588_v12 }
 0x1c1   : > { %v602_v40 = vmul.f32 %v2394_v37, %v595_v38 }
 0x1c3   : > { %v609_v41 = vadd.f32 %v2395_v39, %v602_v40 }
 0x1c5   : > { %v610_v42 = vpack.c.bf16 %v609_v41, %v609_v41 }
 0x1c7   : > { %821 = vmatmul.mubr.bf16.vlgmr.msra.gmra.mxu0 %v610_v42  ;;  %2601 = vmatmul.mubr.bf16.vlgmr.msra.gmra.mxu1 %v610_v42 }
 0x1c8   : > { %2606 = vmatprep.mubr.msk.bf16.mxu1 %vm3212_vm0, %v3210_v5  ;;  %2630 = vmatprep.mubr.msk.bf16.mxu0 %vm3212_vm0, %v3210_v5 }
 0x287   : > { %v822_v50 = vpop.f32.mrf.mxu0  ;;  %v863_v51 = vpop.f32.mrf.mxu1 }
 0x288   : > { %v823_v59 = vadd.f32 %v822_v50, %v648_v52  ;;  %v864_v63 = vadd.f32 %v863_v51, %v656_v55 }
 0x289   : > { %v824_v53 = vpop.f32.mrf.mxu0  ;;  %v2602_v54 = vpop.f32.mrf.mxu1 }
 0x28a   : > { %v825_v56 = vadd.f32 %v824_v53, %v652_v49  ;;  %v869_v1 = vmul.f32 0.17677669, %v823_v59  ;;  %v3545_v3 = vpack.c.bf16 %v864_v63, %v864_v63 }
 0x28b   : > { %v826_v57 = vpop.f32.mrf.mxu0  ;;  %v866_v58 = vpop.f32.mrf.mxu1 }
 0x28c   : > { %v871_v60 = vpack.c.bf16 %v825_v56, %v825_v56  ;;  %v870_v4 = vpack.c.bf16 %v869_v1, %v869_v1  ;;  %v942_v6 = vsel %vm940_vm2, %v3545_v3, 0 }
 0x28d   : > { %v827_v61 = vpop.f32.mrf.mxu0  ;;  %v2603_v62 = vpop.f32.mrf.mxu1 }
 0x28e   : > { %989 = vrot.lane.b32.xlu0 %v871_v60, %s3213_s25  ;;  %v882_v0 = vsel %vm877_vm1, %v871_v60, 0 }
 0x28f   : > { %2605 = vmatpush3.bf16.xpose.msra.mxu1 %v882_v0 }
 0x290   : > { %2610 = vmatprep.subr.bf16.mxu1 %v3210_v5 }
 0x292   : > { %1222 = vrot.lane.b32.xlu0 %v871_v60, %s3214_s30 }
 0x296   : > { %2607 = vmatmul.mubr.msk.bf16.vlgmr.msra.gmra.mxu1 %vm877_vm1, %v870_v4 }
 0x297   : > { %2611 = vmatpush3.bf16.msra.mxu1 %v942_v6  ;;  %2612 = vmatprep.mubr.msk.bf16.mxu1 %vm3212_vm0, %v3210_v5 }
 0x298   : > { %2616 = vmatprep.subr.bf16.mxu1 %v3210_v5 }
 0x300   : > { %v990_v23 = vpop.permute.xlu0 %989 }
 0x301   : > { %v995_v33 = vsel %vm877_vm1, %v990_v23, 0 }
 0x304   : > { %v1223_v28 = vpop.permute.xlu0 %1222 }
 0x305   : > { %v1228_v31 = vsel %vm877_vm1, %v1223_v28, 0 }
 0x356   : > { %v918_v10 = vpop.f32.mrf.mxu1 }
 0x357   : > { %v919_v11 = vadd.f32 %v918_v10, %v3554_v9 }
 0x358   : > { %v2608_v12 = vpop.f32.mrf.mxu1 }
 0x359   : > { %v925_v13 = vsel %vm924_vm4, %v919_v11, -inf }
 0x35a   : > { %926 = vmax.xlane.f32.xlu1 %v925_v13  ;;  %v921_v14 = vpop.f32.mrf.mxu1 }
 0x35c   : > { %v2609_v15 = vpop.f32.mrf.mxu1 }
 0x3e3   : > { %v927_v16 = vpop.xlane.xlu1 %926 }
 0x3e4   : > { %v928_v17 = vsub.f32 %v919_v11, %v927_v16 }
 0x3e6   : > { %v929_v18 = vmul.f32 1.442695, %v928_v17 }
 0x3e8   : > { %2903 = vpow2.f32 %v929_v18 }
 0x3f5   : > { %v2904_v19 = vpop.eup %2903 }
 0x3f6   : > { %v931_v20 = vsel %vm924_vm4, %v2904_v19, 0.0 }
 0x3f7   : > { %932 = vadd.xlane.f32.xlu1 %v931_v20 }
 0x408   : > { %986 = vrot.lane.b32.xlu1 %v870_v4, %s3213_s25 }
 0x40c   : > { %1106 = vrot.lane.b32.xlu1 %v871_v60, %s3216_s21 }
 0x410   : > { %1104 = vrot.lane.b32.xlu1 %v870_v4, %s3216_s21 }
 0x414   : > { %1220 = vrot.lane.b32.xlu1 %v870_v4, %s3214_s30 }
 0x480   : > { %v933_v21 = vpop.xlane.xlu1 %932 }
 0x481   : > { %2905 = vrcp.f32 %v933_v21 }
 0x484   : > { %v987_v22 = vpop.permute.xlu1 %986 }
 0x488   : > { %v1107_v25 = vpop.permute.xlu1 %1106 }
 0x489   : > { %v1112_v26 = vsel %vm877_vm1, %v1107_v25, 0 }
 0x48a   : > { %2629 = vmatpush3.bf16.xpose.msra.mxu0 %v1112_v26 }
 0x48b   : > { %2640 = vmatprep.subr.bf16.mxu0 %v3210_v5 }
 0x48c   : > { %v1105_v30 = vpop.permute.xlu1 %1104 }
 0x48e   : > { %v2906_v27 = vpop.eup %2905 }
 0x48f   : > { %v935_v29 = vmul.f32 %v2906_v27, %v2904_v19 }
 0x490   : > { %v1221_v34 = vpop.permute.xlu1 %1220 }
 0x491   : > { %2631 = vmatmul.mubr.msk.bf16.vlgmr.msra.gmra.mxu0 %vm877_vm1, %v1105_v30  ;;  %v936_v32 = vpack.c.bf16 %v935_v29, %v935_v29 }
 0x492   : > { %2641 = vmatpush3.bf16.xpose.msra.mxu0 %v1228_v31  ;;  %2642 = vmatprep.mubr.msk.bf16.mxu0 %vm3212_vm0, %v3210_v5 }
 0x493   : > { %2613 = vmatmul.mubr.msk.bf16.vlgmr.msra.gmra.mxu1 %vm924_vm4, %v936_v32  ;;  %2652 = vmatprep.subr.bf16.mxu0 %v3210_v5 }
 0x494   : > { %2617 = vmatpush3.bf16.xpose.msra.mxu1 %v995_v33  ;;  %2618 = vmatprep.mubr.msk.bf16.mxu1 %vm3212_vm0, %v3210_v5  ;;  %v2813_v33 = vld [vmem:[#allocation8 + $0x38] sm:$0xff]  }
 0x495   : > { %2622 = vmatprep.subr.bf16.mxu1 %v3210_v5 }
 0x499   : > { %2643 = vmatmul.mubr.msk.bf16.vlgmr.msra.gmra.mxu0 %vm877_vm1, %v1221_v34  ;;  %v2814_v34 = vld [vmem:[#allocation8 + $0x30] sm:$0xff]  }
 0x49a   : > { %2668 = vmatprep.mubr.msk.bf16.mxu0 %vm3212_vm0, %v3210_v5  ;;  %2653 = vmatpush3.bf16.msra.mxu0 %v2813_v33  ;;  %v2859_v33 = vld [vmem:[%s3876_s10 + $0x24] ss:$16 sps:$4 sm:$0xff]  }
 0x49b   : > { %2619 = vmatmul.mubr.msk.bf16.vlgmr.msra.gmra.mxu1 %vm877_vm1, %v987_v22  ;;  %2654 = vmatprep.subr.bf16.mxu0 %v3210_v5 }
 0x49c   : > { %2624 = vmatprep.mubr.msk.bf16.mxu1 %vm3212_vm0, %v3210_v5 }
 0x49e   : > { %2655 = vmatpush3.bf16.msra.mxu0 %v2814_v34  ;;  %v2862_v34 = vld [vmem:[%s3876_s10 + $0x2c] ss:$16 sps:$4 sm:$0xff]  }
 0x49f   : > { %2656 = vmatprep.subr.bf16.mxu0 %v3210_v5 }
 0x551   : > { %v1148_v35 = vpop.f32.mrf.mxu0 }
 0x552   : > { %v1149_v36 = vadd.f32 %v1148_v35, %v3554_v9  ;;  %v2815_v35 = vld [vmem:[#allocation8 + $0x28] sm:$0xff]  }
 0x553   : > { %v978_v37 = vpop.f32.mrf.mxu1  ;;  %v2632_v38 = vpop.f32.mrf.mxu0  ;;  %2657 = vmatpush3.bf16.msra.mxu0 %v2815_v35  ;;  %v2857_v35 = vld [vmem:[%s3876_s10 + $0x20] ss:$16 sps:$4 sm:$0xff]  }
 0x554   : > { %984 = vst.msk [vmem:[#allocation2] sm:$0xff] %vm877_vm1, %v978_v37  ;;  %v1154_v39 = vsel %vm924_vm4, %v1149_v36, -inf  ;;  %2658 = vmatprep.subr.bf16.mxu0 %v3210_v5  ;;  %v2817_v37 = vld [vmem:[#allocation8 + $0x18] sm:$0xff]   ;;  %v2818_v38 = vld [vmem:[#allocation8 + $0x10] sm:$0xff]  }
 0x555   : > { %1155 = vmax.xlane.f32.xlu1 %v1154_v39  ;;  %v2614_v40 = vpop.f32.mrf.mxu1  ;;  %v1151_v41 = vpop.f32.mrf.mxu0 }
 0x557   : > { %v981_v42 = vpop.f32.mrf.mxu1  ;;  %v2633_v43 = vpop.f32.mrf.mxu0 }
 0x558   : > { %v2819_v42 = vld [vmem:[#allocation8 + $0x8] sm:$0xff]  }
 0x559   : > { %v2615_v47 = vpop.f32.mrf.mxu1  ;;  %v1264_v49 = vpop.f32.mrf.mxu0 }
 0x55a   : > { %v1265_v55 = vadd.f32 %v1264_v49, %v3554_v9  ;;  %v2820_v47 = vld [vmem:[#allocation8] sm:$0xff]  }
 0x55b   : > { %v1031_v50 = vpop.f32.mrf.mxu1  ;;  %v2644_v51 = vpop.f32.mrf.mxu0 }
 0x55c   : > { %v1032_v52 = vadd.f32 %v1031_v50, %v3554_v9  ;;  %v1270_v60 = vsel %vm924_vm4, %v1265_v55, -inf }
 0x55d   : > { %v2620_v53 = vpop.f32.mrf.mxu1  ;;  %v1267_v54 = vpop.f32.mrf.mxu0 }
 0x55e   : > { %v1037_v56 = vsel %vm924_vm4, %v1032_v52, -inf }
 0x55f   : > { %v2645_v57 = vpop.f32.mrf.mxu0  ;;  %1038 = vmax.xlane.f32.xlu0 %v1037_v56  ;;  %v1034_v58 = vpop.f32.mrf.mxu1 }
 0x561   : > { %v2621_v59 = vpop.f32.mrf.mxu1 }
 0x563   : > { %1271 = vmax.xlane.f32.xlu0 %v1270_v60 }
 0x5de   : > { %v1156_v61 = vpop.xlane.xlu1 %1155 }
 0x5df   : > { %v1157_v62 = vsub.f32 %v1149_v36, %v1156_v61  ;;  %v2816_v36 = vld [vmem:[#allocation8 + $0x20] sm:$0xff]  }
 0x5e0   : > { %2659 = vmatpush3.bf16.msra.mxu0 %v2816_v36  ;;  %v2428_v61 = vld [vmem:[#allocation10] ss:$0 sm:$0xff]  ;;  %v2860_v36 = vld [vmem:[%s3876_s10 + $0x28] ss:$16 sps:$4 sm:$0xff]  }
 0x5e1   : > { %v1158_v63 = vmul.f32 1.442695, %v1157_v62  ;;  %2660 = vmatprep.subr.bf16.mxu0 %v3210_v5 }
 0x5e3   : > { %2907 = vpow2.f32 %v1158_v63 }
 0x5e4   : > { %2661 = vmatpush3.bf16.msra.mxu0 %v2817_v37  ;;  %v2865_v37 = vld [vmem:[%s3876_s10 + $0x4] ss:$16 sps:$4 sm:$0xff]  }
 0x5e5   : > { %2662 = vmatprep.subr.bf16.mxu0 %v3210_v5 }
 0x5e8   : > { %v1039_v0 = vpop.xlane.xlu0 %1038  ;;  %2663 = vmatpush3.bf16.msra.mxu0 %v2818_v38  ;;  %v2868_v38 = vld [vmem:[%s3876_s10 + $0xc] ss:$16 sps:$4 sm:$0xff]  }
 0x5e9   : > { %v1040_v1 = vsub.f32 %v1032_v52, %v1039_v0  ;;  %2664 = vmatprep.subr.bf16.mxu0 %v3210_v5 }
 0x5eb   : > { %v1041_v4 = vmul.f32 1.442695, %v1040_v1 }
 0x5ec   : > { %v1272_v6 = vpop.xlane.xlu0 %1271  ;;  %2665 = vmatpush3.bf16.msra.mxu0 %v2819_v42 }
 0x5ed   : > { %2909 = vpow2.f32 %v1041_v4  ;;  %v1273_v7 = vsub.f32 %v1265_v55, %v1272_v6  ;;  %2666 = vmatprep.subr.bf16.mxu0 %v3210_v5 }
 0x5ef   : > { %v1274_v8 = vmul.f32 1.442695, %v1273_v7  ;;  %v2821_v7 = vld [vmem:[%s3876_s10 + $0xe0] ss:$16 sps:$4 sm:$0xff]  }
 0x5f0   : > { %v2908_v9 = vpop.eup %2907  ;;  %2667 = vmatpush3.bf16.msra.mxu0 %v2820_v47 }
 0x5f1   : > { %2911 = vpow2.f32 %v1274_v8  ;;  %v1160_v10 = vsel %vm924_vm4, %v2908_v9, 0.0  ;;  %v2823_v8 = vld [vmem:[%s3876_s10 + $0xe4] ss:$16 sps:$4 sm:$0xff]  }
 0x5f2   : > { %1161 = vadd.xlane.f32.xlu0 %v1160_v10  ;;  %v2832_v10 = vld [vmem:[%s3876_s10 + $0xcc] ss:$16 sps:$4 sm:$0xff]  }
 0x5fa   : > { %v2910_v11 = vpop.eup %2909 }
 0x5fb   : > { %v1043_v12 = vsel %vm924_vm4, %v2910_v11, 0.0 }
 0x5fc   : > { %1044 = vadd.xlane.f32.xlu0 %v1043_v12  ;;  %v2830_v12 = vld [vmem:[%s3876_s10 + $0xc8] ss:$16 sps:$4 sm:$0xff]  }
 0x5fe   : > { %v2912_v13 = vpop.eup %2911 }
 0x5ff   : > { %v1276_v14 = vsel %vm924_vm4, %v2912_v13, 0.0 }
 0x600   : > { %1277 = vadd.xlane.f32.xlu1 %v1276_v14 }
 0x611   : > { %1166 = vrot.lane.b32.xlu1 %v3545_v3, %s3216_s21 }
 0x612   : > { %1050 = vrot.lane.b32.xlu0 %v3545_v3, %s3213_s25 }
 0x615   : > { %1282 = vrot.lane.b32.xlu1 %v3545_v3, %s3214_s30 }
 0x67b   : > { %v1162_v15 = vpop.xlane.xlu0 %1161 }
 0x685   : > { %v1045_v16 = vpop.xlane.xlu0 %1044 }
 0x686   : > { %2913 = vrcp.f32 %v1045_v16 }
 0x687   : > { %2915 = vrcp.f32 %v1162_v15 }
 0x689   : > { %v1051_v17 = vpop.permute.xlu0 %1050  ;;  %v1278_v19 = vpop.xlane.xlu1 %1277 }
 0x68a   : > { %v1056_v18 = vsel %vm940_vm2, %v1051_v17, 0  ;;  %2917 = vrcp.f32 %v1278_v19  ;;  %v2835_v17 = vld [vmem:[%s3876_s10 + $0xa4] ss:$16 sps:$4 sm:$0xff]   ;;  %v2833_v19 = vld [vmem:[%s3876_s10 + $0xa0] ss:$16 sps:$4 sm:$0xff]  }
 0x68b   : > { %2623 = vmatpush3.bf16.msra.mxu1 %v1056_v18  ;;  %v2838_v18 = vld [vmem:[%s3876_s10 + $0xac] ss:$16 sps:$4 sm:$0xff]  }
 0x68c   : > { %2634 = vmatprep.subr.bf16.mxu1 %v3210_v5 }
 0x68d   : > { %v1167_v22 = vpop.permute.xlu1 %1166 }
 0x68e   : > { %v1172_v26 = vsel %vm940_vm2, %v1167_v22, 0  ;;  %v2841_v22 = vld [vmem:[%s3876_s10 + $0x84] ss:$16 sps:$4 sm:$0xff]  }
 0x691   : > { %v1283_v27 = vpop.permute.xlu1 %1282 }
 0x692   : > { %v1288_v30 = vsel %vm940_vm2, %v1283_v27, 0  ;;  %v2845_v27 = vld [vmem:[%s3876_s10 + $0x60] ss:$16 sps:$4 sm:$0xff]  }
 0x693   : > { %v2914_v20 = vpop.eup %2913 }
 0x694   : > { %v1047_v21 = vmul.f32 %v2914_v20, %v2910_v11  ;;  %v2916_v25 = vpop.eup %2915  ;;  %v2827_v11 = vld [vmem:[%s3876_s10 + $0xc0] ss:$16 sps:$4 sm:$0xff]   ;;  %v2836_v20 = vld [vmem:[%s3876_s10 + $0xa8] ss:$16 sps:$4 sm:$0xff]  }
 0x695   : > { %v1164_v3 = vmul.f32 %v2916_v25, %v2908_v9  ;;  %v2829_v9 = vld [vmem:[%s3876_s10 + $0xc4] ss:$16 sps:$4 sm:$0xff]   ;;  %v2844_v25 = vld [vmem:[%s3876_s10 + $0x8c] ss:$16 sps:$4 sm:$0xff]  }
 0x696   : > { %v1048_v23 = vpack.c.bf16 %v1047_v21, %v1047_v21  ;;  %v2839_v21 = vld [vmem:[%s3876_s10 + $0x80] ss:$16 sps:$4 sm:$0xff]  }
 0x697   : > { %v1165_v28 = vpack.c.bf16 %v1164_v3, %v1164_v3  ;;  %v2918_v29 = vpop.eup %2917  ;;  %v2850_v3 = vld [vmem:[%s3876_s10 + $0x6c] ss:$16 sps:$4 sm:$0xff]  }
 0x698   : > { %2625 = vmatmul.mubr.msk.bf16.vlgmr.msra.gmra.mxu1 %vm924_vm4, %v1048_v23  ;;  %v1280_v31 = vmul.f32 %v2918_v29, %v2912_v13  ;;  %v2842_v23 = vld [vmem:[%s3876_s10 + $0x88] ss:$16 sps:$4 sm:$0xff]   ;;  %v2853_v29 = vld [vmem:[%s3876_s10 + $0x44] ss:$16 sps:$4 sm:$0xff]  }
 0x699   : > { %2635 = vmatpush3.bf16.msra.mxu1 %v1172_v26  ;;  %2636 = vmatprep.mubr.msk.bf16.mxu1 %vm3212_vm0, %v3210_v5  ;;  %v2847_v26 = vld [vmem:[%s3876_s10 + $0x64] ss:$16 sps:$4 sm:$0xff]  }
 0x69a   : > { %2646 = vmatprep.subr.bf16.mxu1 %v3210_v5  ;;  %v1281_v32 = vpack.c.bf16 %v1280_v31, %v1280_v31  ;;  %v2851_v31 = vld [vmem:[%s3876_s10 + $0x40] ss:$16 sps:$4 sm:$0xff]  }
 0x6a0   : > { %2637 = vmatmul.mubr.msk.bf16.vlgmr.msra.gmra.mxu1 %vm924_vm4, %v1165_v28  ;;  %v2848_v28 = vld [vmem:[%s3876_s10 + $0x68] ss:$16 sps:$4 sm:$0xff]  }
 0x6a1   : > { %2647 = vmatpush3.bf16.msra.mxu1 %v1288_v30  ;;  %2648 = vmatprep.mubr.msk.bf16.mxu1 %vm3212_vm0, %v3210_v5  ;;  %v2856_v30 = vld [vmem:[%s3876_s10 + $0x4c] ss:$16 sps:$4 sm:$0xff]  }
 0x6a2   : > { %1700 = vmatprep.subr.bf16.mxu1 %v2823_v8  ;;  %v2883_v8 = vld [vmem:[%s3878_s12 + $0x20] sm:$0xff]  }
 0x6a8   : > { %2649 = vmatmul.mubr.msk.bf16.vlgmr.msra.gmra.mxu1 %vm924_vm4, %v1281_v32  ;;  %v2854_v32 = vld [vmem:[%s3876_s10 + $0x48] ss:$16 sps:$4 sm:$0xff]  }
 0x6a9   : > { %1732 = vmatprep.mubr.bf16.mxu1 %v3211_v24  ;;  %1701 = vmatpush1.bf16.msra.mxu1 %v2821_v7  ;;  %v2882_v7 = vld [vmem:[%s3878_s12 + $0xe0] sm:$0xff]  }
 0x6aa   : > { %1702 = vmatprep.subr.bf16.mxu1 %v2829_v9  ;;  %v2886_v9 = vld [vmem:[%s3878_s12 + $0xd8] sm:$0xff]  }
 0x6ad   : > { %1703 = vmatpush1.bf16.msra.mxu1 %v2827_v11  ;;  %v2888_v11 = vld [vmem:[%s3878_s12 + $0x98] sm:$0xff]  }
 0x6ae   : > { %1704 = vmatprep.subr.bf16.mxu1 %v2835_v17  ;;  %v2894_v17 = vld [vmem:[%s3878_s12 + $0xc8] sm:$0xff]  }
 0x6b1   : > { %1705 = vmatpush1.bf16.msra.mxu1 %v2833_v19  ;;  %v2896_v19 = vld [vmem:[%s3878_s12 + $0x88] sm:$0xff]  }
 0x6b2   : > { %1706 = vmatprep.subr.bf16.mxu1 %v2841_v22  ;;  %v2899_v22 = vld [vmem:[%s3878_s12] sm:$0xff]  }
 0x6b5   : > { %1707 = vmatpush1.bf16.msra.mxu1 %v2839_v21  ;;  %v2898_v21 = vld [vmem:[%s3878_s12 + $0xc0] sm:$0xff]  }
 0x6b6   : > { %1708 = vmatprep.subr.bf16.mxu1 %v2847_v26  ;;  %v1534_v26 = vsub.s32 3, %v3531_v44 }
 0x6b9   : > { %1709 = vmatpush1.bf16.msra.mxu1 %v2845_v27 }
 0x6ba   : > { %1710 = vmatprep.subr.bf16.mxu1 %v2853_v29 }
 0x6bd   : > { %1711 = vmatpush1.bf16.msra.mxu1 %v2851_v31 }
 0x6be   : > { %1712 = vmatprep.subr.bf16.mxu1 %v2859_v33 }
 0x6c1   : > { %1713 = vmatpush1.bf16.msra.mxu1 %v2857_v35 }
 0x6c2   : > { %1714 = vmatprep.subr.bf16.mxu1 %v2865_v37 }
 0x758   : > { %v1092_v39 = vpop.f32.mrf.mxu1 }
 0x759   : > { %1099 = vrot.lane.b32.xlu1 %v1092_v39, %s3214_s30  ;;  %v2863_v39 = vld [vmem:[%s3876_s10] ss:$16 sps:$4 sm:$0xff]  }
 0x75a   : > { %v2626_v40 = vpop.f32.mrf.mxu1  ;;  %1715 = vmatpush1.bf16.msra.mxu1 %v2863_v39 }
 0x75b   : > { %v2866_v40 = vld [vmem:[%s3876_s10 + $0x8] ss:$16 sps:$4 sm:$0xff]  }
 0x75c   : > { %v1095_v41 = vpop.f32.mrf.mxu1 }
 0x75e   : > { %v2627_v43 = vpop.f32.mrf.mxu1 }
 0x760   : > { %v1208_v49 = vpop.f32.mrf.mxu1 }
 0x761   : > { %1215 = vrot.lane.b32.xlu0 %v1208_v49, %s3216_s21  ;;  %v2437_v49 = vld [vmem:[#allocation11] ss:$0 sm:$0xff] }
 0x762   : > { %v2638_v50 = vpop.f32.mrf.mxu1 }
 0x764   : > { %v1211_v51 = vpop.f32.mrf.mxu1 }
 0x765   : > { %v2438_v51 = vld [vmem:[#allocation13] ss:$0 sm:$0xff] }
 0x766   : > { %v2639_v52 = vpop.f32.mrf.mxu1 }
 0x768   : > { %v1324_v53 = vpop.f32.mrf.mxu1 }
 0x769   : > { %1331 = vrot.lane.b32.xlu1 %v1324_v53, %s3213_s25 }
 0x76a   : > { %v2650_v54 = vpop.f32.mrf.mxu1 }
 0x76c   : > { %v1327_v55 = vpop.f32.mrf.mxu1 }
 0x76d   : > { %v2869_v55 = vld [vmem:[%s3878_s12 + $0x78] sm:$0xff]  }
 0x76e   : > { %v2651_v56 = vpop.f32.mrf.mxu1  ;;  %2540 = vmatprep.subr.bf16.mxu1 %v2869_v55 }
 0x76f   : > { %v2870_v56 = vld [vmem:[%s3878_s12 + $0xf8] sm:$0xff]  }
 0x7cb   : > { %v1100_v57 = vpop.permute.xlu1 %1099 }
 0x7cc   : > { %1103 = vst.msk [vmem:[#allocation2] sm:$0xff] %vm1102_vm5, %v1100_v57  ;;  %v2871_v57 = vld [vmem:[%s3878_s12 + $0x38] sm:$0xff]  }
 0x7d3   : > { %v1216_v58 = vpop.permute.xlu0 %1215 }
 0x7d4   : > { %1219 = vst.msk [vmem:[#allocation2] sm:$0xff] %vm1218_vm6, %v1216_v58  ;;  %v2872_v58 = vld [vmem:[%s3878_s12 + $0xb8] sm:$0xff]  }
 0x7db   : > { %v1332_v5 = vpop.permute.xlu1 %1331 }
 0x7dc   : > { %1335 = vst.msk [vmem:[#allocation2] sm:$0xff] %vm1334_vm7, %v1332_v5  ;;  %v2873_v5 = vld [vmem:[%s3878_s12 + $0x70] sm:$0xff]  }
 0x7e3   : > { %v1336_v59 = vld [vmem:[#allocation2] sm:$0xff] }
 0x7e4   : > { %v1337_v60 = vpack.c.bf16 %v1336_v59, %v1336_v59  ;;  %v2874_v59 = vld [vmem:[%s3878_s12 + $0xf0] sm:$0xff]  }
 0x7e6   : > { %2669 = vmatmul.mubr.bf16.vlgmr.msra.gmra.mxu0 %v1337_v60  ;;  %v2875_v60 = vld [vmem:[%s3878_s12 + $0x30] sm:$0xff]  }
 0x7e7   : > { %1773 = vmatprep.mubr.bf16.mxu0 %v3211_v24  ;;  %v2824_v24 = vld [vmem:[%s3876_s10 + $0xe8] ss:$16 sps:$4 sm:$0xff]  }
 0x8a6   : > { %v1443_v62 = vpop.f32.mrf.mxu0 }
 0x8a7   : > { %v1444_v63 = vadd.f32 %v2428_v61, %v1443_v62  ;;  %v2876_v61 = vld [vmem:[%s3878_s12 + $0xb0] sm:$0xff]   ;;  %v2877_v62 = vld [vmem:[%s3878_s12 + $0x68] sm:$0xff]  }
 0x8a8   : > { %v2670_v0 = vpop.f32.mrf.mxu0 }
 0x8a9   : > { %v3622_v1 = vadd.f32 %v1444_v63, %v3438_v2  ;;  %v2826_v2 = vld [vmem:[%s3876_s10 + $0xec] ss:$16 sps:$4 sm:$0xff]  }
 0x8aa   : > { %v1446_v4 = vpop.f32.mrf.mxu0  ;;  %1741 = vmatprep.subr.bf16.mxu0 %v2826_v2  ;;  %v2878_v63 = vld [vmem:[%s3878_s12 + $0xe8] sm:$0xff]   ;;  %v2885_v2 = vld [vmem:[%s3878_s12 + $0x58] sm:$0xff]  }
 0x8ab   : > { %1452 = vadd.xlane.f32.xlu0 %v3622_v1  ;;  %1742 = vmatpush1.bf16.msra.mxu0 %v2824_v24  ;;  %v2879_v0 = vld [vmem:[%s3878_s12 + $0x28] sm:$0xff]   ;;  %v2884_v24 = vld [vmem:[%s3878_s12 + $0xa0] sm:$0xff]  }
 0x8ac   : > { %v2671_v6 = vpop.f32.mrf.mxu0  ;;  %1743 = vmatprep.subr.bf16.mxu0 %v2832_v10  ;;  %v2880_v4 = vld [vmem:[%s3878_s12 + $0xa8] sm:$0xff]   ;;  %v2887_v10 = vld [vmem:[%s3878_s12 + $0x18] sm:$0xff]  }
 0x8ad   : > { %v2881_v6 = vld [vmem:[%s3878_s12 + $0x60] sm:$0xff]  }
 0x8af   : > { %1744 = vmatpush1.bf16.msra.mxu0 %v2830_v12  ;;  %v2889_v12 = vld [vmem:[%s3878_s12 + $0x50] sm:$0xff]  }
 0x8b0   : > { %1745 = vmatprep.subr.bf16.mxu0 %v2838_v18  ;;  %v2895_v18 = vld [vmem:[%s3878_s12 + $0x8] sm:$0xff]  }
 0x8b3   : > { %1746 = vmatpush1.bf16.msra.mxu0 %v2836_v20  ;;  %v2897_v20 = vld [vmem:[%s3878_s12 + $0x40] sm:$0xff]  }
 0x8b4   : > { %1747 = vmatprep.subr.bf16.mxu0 %v2844_v25  ;;  %v1518_v25 = vld [vmem:[#allocation14] sm:$0xf] }
 0x8b5   : > { %v1531_v27 = vrot.slane %v1518_v25, %v655_v48  ;;  %v1535_v31 = vrot.slane %v1518_v25, %v1534_v26 }
 0x8b7   : > { %1748 = vmatpush1.bf16.msra.mxu0 %v2842_v23  ;;  %v2900_v23 = vld [vmem:[%s3878_s12 + $0x80] sm:$0xff]  }
 0x8b8   : > { %1749 = vmatprep.subr.bf16.mxu0 %v2850_v3  ;;  %v1523_v3 = vrot.slane %v1518_v25, %v647_v46 }
 0x8bb   : > { %1750 = vmatpush1.bf16.msra.mxu0 %v2848_v28 }
 0x8bc   : > { %1751 = vmatprep.subr.bf16.mxu0 %v2856_v30  ;;  %v1527_v30 = vrot.slane %v1518_v25, %v651_v45 }
 0x8bf   : > { %1752 = vmatpush1.bf16.msra.mxu0 %v2854_v32 }
 0x8c0   : > { %1753 = vmatprep.subr.bf16.mxu0 %v2862_v34 }
 0x8c3   : > { %1754 = vmatpush1.bf16.msra.mxu0 %v2860_v36 }
 0x8c4   : > { %1755 = vmatprep.subr.bf16.mxu0 %v2868_v38 }
 0x8c7   : > { %1756 = vmatpush1.bf16.msra.mxu0 %v2866_v40 }
 0x8c8   : > { %2562 = vmatprep.subr.bf16.mxu0 %v2870_v56 }
 0x934   : > { %v1453_v13 = vpop.xlane.xlu0 %1452 }
 0x935   : > { %v1454_v14 = vmul.f32 0.0078125, %v1453_v13  ;;  %v2890_v13 = vld [vmem:[%s3878_s12 + $0xd0] sm:$0xff]  }
 0x937   : > { %v1455_v15 = vsub.f32 %v3622_v1, %v1454_v14  ;;  %v2891_v14 = vld [vmem:[%s3878_s12 + $0x10] sm:$0xff]  }
 0x939   : > { %v1456_v16 = vmul.f32 %v1455_v15, %v1455_v15 }
 0x93b   : > { %1457 = vadd.xlane.f32.xlu1 %v1456_v16  ;;  %v2893_v16 = vld [vmem:[%s3878_s12 + $0x48] sm:$0xff]  }
 0x9c4   : > { %v1458_v41 = vpop.xlane.xlu1 %1457 }
 0x9c5   : > { %v1459_v42 = vmul.f32 0.0078125, %v1458_v41 }
 0x9c7   : > { %v1460_v43 = vadd.f32 1e-06, %v1459_v42 }
 0x9c9   : > { %2919 = vrsqrt.f32 %v1460_v43 }
 0x9d6   : > { %v2920_v47 = vpop.eup %2919 }
 0x9d7   : > { %v1462_v50 = vmul.f32 %v2920_v47, %v1455_v15  ;;  %v2892_v15 = vld [vmem:[%s3878_s12 + $0x90] sm:$0xff]  }
 0x9d9   : > { %v1469_v52 = vmul.f32 %v2437_v49, %v1462_v50 }
 0x9db   : > { %v1476_v53 = vadd.f32 %v2438_v51, %v1469_v52 }
 0x9dd   : > { %v1477_v54 = vpack.c.bf16 %v1476_v53, %v1476_v53 }
 0x9df   : > { %1733 = vmatmul.mubr.bf16.vlgmr.msra.gmra.mxu1 %v1477_v54  ;;  %1774 = vmatmul.mubr.bf16.vlgmr.msra.gmra.mxu0 %v1477_v54 }
 0x9e0   : > { %2541 = vmatpush3.bf16.msra.mxu1 %v2871_v57  ;;  %2563 = vmatpush3.bf16.msra.mxu0 %v2872_v58 }
 0x9e1   : > { %2542 = vmatprep.subr.bf16.mxu1 %v2873_v5  ;;  %2564 = vmatprep.subr.bf16.mxu0 %v2874_v59 }
 0x9e4   : > { %2543 = vmatpush3.bf16.msra.mxu1 %v2875_v60  ;;  %2565 = vmatpush3.bf16.msra.mxu0 %v2876_v61 }
 0x9e5   : > { %2544 = vmatprep.subr.bf16.mxu1 %v2877_v62  ;;  %2566 = vmatprep.subr.bf16.mxu0 %v2878_v63 }
 0x9e8   : > { %2545 = vmatpush3.bf16.msra.mxu1 %v2879_v0  ;;  %2567 = vmatpush3.bf16.msra.mxu0 %v2880_v4 }
 0x9e9   : > { %2546 = vmatprep.subr.bf16.mxu1 %v2881_v6  ;;  %2568 = vmatprep.subr.bf16.mxu0 %v2882_v7 }
 0x9ec   : > { %2547 = vmatpush3.bf16.msra.mxu1 %v2883_v8  ;;  %2569 = vmatpush3.bf16.msra.mxu0 %v2884_v24 }
 0x9ed   : > { %2548 = vmatprep.subr.bf16.mxu1 %v2885_v2  ;;  %2570 = vmatprep.subr.bf16.mxu0 %v2886_v9 }
 0x9f0   : > { %2549 = vmatpush3.bf16.msra.mxu1 %v2887_v10  ;;  %2571 = vmatpush3.bf16.msra.mxu0 %v2888_v11 }
 0x9f1   : > { %2550 = vmatprep.subr.bf16.mxu1 %v2889_v12  ;;  %2572 = vmatprep.subr.bf16.mxu0 %v2890_v13 }
 0x9f4   : > { %2551 = vmatpush3.bf16.msra.mxu1 %v2891_v14  ;;  %2573 = vmatpush3.bf16.msra.mxu0 %v2892_v15 }
 0x9f5   : > { %2552 = vmatprep.subr.bf16.mxu1 %v2893_v16  ;;  %2574 = vmatprep.subr.bf16.mxu0 %v2894_v17 }
 0x9f8   : > { %2553 = vmatpush3.bf16.msra.mxu1 %v2895_v18  ;;  %2575 = vmatpush3.bf16.msra.mxu0 %v2896_v19 }
 0x9f9   : > { %2554 = vmatprep.subr.bf16.mxu1 %v2897_v20  ;;  %2576 = vmatprep.subr.bf16.mxu0 %v2898_v21 }
 0x9fc   : > { %2555 = vmatpush3.bf16.msra.mxu1 %v2899_v22  ;;  %2577 = vmatpush3.bf16.msra.mxu0 %v2900_v23 }
 0xa9f   : > { %v1734_v28 = vpop.f32.mrf.mxu1  ;;  %v1775_v29 = vpop.f32.mrf.mxu0 }
 0xaa0   : > { %v3825_v32 = vadd.f32 %v1734_v28, %v1523_v3  ;;  %v3827_v33 = vadd.f32 %v1775_v29, %v1531_v27 }
 0xaa1   : > { %v1736_v34 = vpop.f32.mrf.mxu1  ;;  %v1777_v35 = vpop.f32.mrf.mxu0 }
 0xaa2   : > { %v3830_v36 = vmul.f32 0.70710677, %v3825_v32  ;;  %v3833_v46 = vmul.f32 0.70710677, %v3827_v33  ;;  %v3835_v37 = vadd.f32 %v1736_v34, %v1527_v30  ;;  %v3837_v48 = vadd.f32 %v1777_v35, %v1535_v31 }
 0xaa3   : > { %v1738_v38 = vpop.f32.mrf.mxu1  ;;  %v1779_v44 = vpop.f32.mrf.mxu0 }
 0xaa4   : > { %v1798_v45 = vand.u32 2147483647, %v3830_v36  ;;  %v1800_v39 = vand.u32 2147483647, %v3833_v46  ;;  %v3842_v40 = vmul.f32 0.70710677, %v3835_v37 }
 0xaa5   : > { %v1739_v41 = vpop.f32.mrf.mxu1  ;;  %v1780_v42 = vpop.f32.mrf.mxu0  ;;  %v3846_v50 = vmul.f32 0.70710677, %v3837_v48  ;;  %vm1790_vm8 = vcmp.ge.f32.partialorder %v3830_v36, 0.0  ;;  %vm1792_vm9 = vcmp.ge.f32.partialorder %v3833_v46, 0.0 }
 0xaa6   : > { %v1802_v43 = vmul.f32 0.3275911, %v1798_v45  ;;  %v1804_v47 = vmul.f32 0.3275911, %v1800_v39  ;;  %v1799_v49 = vand.u32 2147483647, %v3842_v40 }
 0xaa7   : > { %v1801_v55 = vand.u32 2147483647, %v3846_v50  ;;  %v1850_v58 = vsub.f32 0.0, %v1798_v45  ;;  %v1852_v5 = vsub.f32 0.0, %v1800_v39  ;;  %vm1791_vm10 = vcmp.ge.f32.partialorder %v3842_v40, 0.0 }
 0xaa8   : > { %v1806_v51 = vadd.f32 1.0, %v1802_v43  ;;  %v1808_v52 = vadd.f32 1.0, %v1804_v47  ;;  %v1803_v53 = vmul.f32 0.3275911, %v1799_v49  ;;  %v1851_v60 = vsub.f32 0.0, %v1799_v49 }
 0xaa9   : > { %v1805_v56 = vmul.f32 0.3275911, %v1801_v55  ;;  %v1854_v59 = vmul.f32 %v1850_v58, %v1798_v45  ;;  %v1856_v61 = vmul.f32 %v1852_v5, %v1800_v39  ;;  %v1853_v63 = vsub.f32 0.0, %v1801_v55 }
 0xaaa   : > { %2921 = vrcp.f32 %v1806_v51  ;;  %v1807_v54 = vadd.f32 1.0, %v1803_v53  ;;  %v1855_v7 = vmul.f32 %v1851_v60, %v1799_v49  ;;  %v3217_v5 = vmov -1.0  }
 0xaab   : > { %2923 = vrcp.f32 %v1808_v52  ;;  %v1809_v57 = vadd.f32 1.0, %v1805_v56  ;;  %v1858_v6 = vmul.f32 1.442695, %v1854_v59  ;;  %v1862_v24 = vmul.f32 1.442695, %v1856_v61 }
 0xaac   : > { %2925 = vrcp.f32 %v1807_v54  ;;  %v1857_v11 = vmul.f32 %v1853_v63, %v1801_v55  ;;  %v1860_v14 = vmul.f32 1.442695, %v1855_v7  ;;  %v1794_v59 = vsel %vm1790_vm8, 1.0, %v3217_v5 }
 0xaad   : > { %2927 = vrcp.f32 %v1809_v57  ;;  %vm1793_vm11 = vcmp.ge.f32.partialorder %v3846_v50, 0.0 }
 0xaae   : > { %2929 = vpow2.f32 %v1858_v6  ;;  %v1864_v21 = vmul.f32 1.442695, %v1857_v11 }
 0xaaf   : > { %2931 = vpow2.f32 %v1862_v24  ;;  %v1795_v24 = vsel %vm1791_vm10, 1.0, %v3217_v5 }
 0xab0   : > { %2933 = vpow2.f32 %v1860_v14 }
 0xab1   : > { %2935 = vpow2.f32 %v1864_v21 }
 0xab7   : > { %v2922_v62 = vpop.eup %2921 }
 0xab8   : > { %v2924_v0 = vpop.eup %2923  ;;  %v1814_v4 = vmul.f32 1.0614054, %v2922_v62 }
 0xab9   : > { %v1816_v8 = vmul.f32 1.0614054, %v2924_v0  ;;  %v2926_v9 = vpop.eup %2925 }
 0xaba   : > { %v1818_v2 = vadd.f32 -1.4531521, %v1814_v4  ;;  %v1815_v13 = vmul.f32 1.0614054, %v2926_v9  ;;  %v2928_v16 = vpop.eup %2927 }
 0xabb   : > { %v1820_v10 = vadd.f32 -1.4531521, %v1816_v8  ;;  %v1817_v20 = vmul.f32 1.0614054, %v2928_v16  ;;  %v2930_v43 = vpop.eup %2929 }
 0xabc   : > { %v1822_v12 = vmul.f32 %v2922_v62, %v1818_v2  ;;  %v1819_v18 = vadd.f32 -1.4531521, %v1815_v13  ;;  %v2932_v51 = vpop.eup %2931  ;;  %v1797_v13 = vsel %vm1793_vm11, 1.0, %v3217_v5 }
 0xabd   : > { %v1824_v15 = vmul.f32 %v2924_v0, %v1820_v10  ;;  %v1821_v26 = vadd.f32 -1.4531521, %v1817_v20  ;;  %v2934_v58 = vpop.eup %2933 }
 0xabe   : > { %v1826_v17 = vadd.f32 1.4214138, %v1822_v12  ;;  %v1823_v23 = vmul.f32 %v2926_v9, %v1819_v18  ;;  %v2936_v36 = vpop.eup %2935  ;;  %v1783_v12 = vmul.f32 0.5, %v3835_v37  ;;  %v1785_v18 = vmul.f32 0.5, %v3837_v48 }
 0xabf   : > { %v1828_v19 = vadd.f32 1.4214138, %v1824_v15  ;;  %v1825_v29 = vmul.f32 %v2928_v16, %v1821_v26 }
 0xac0   : > { %v1830_v22 = vmul.f32 %v2922_v62, %v1826_v17  ;;  %v1827_v27 = vadd.f32 1.4214138, %v1823_v23 }
 0xac1   : > { %v1832_v25 = vmul.f32 %v2924_v0, %v1828_v19  ;;  %v1829_v35 = vadd.f32 1.4214138, %v1825_v29 }
 0xac2   : > { %v1834_v3 = vadd.f32 -0.28449672, %v1830_v22  ;;  %v1831_v31 = vmul.f32 %v2926_v9, %v1827_v27  ;;  %v2439_v27 = vld [vmem:[#allocation16] ss:$0 sm:$0xff] }
 0xac3   : > { %v1836_v28 = vadd.f32 -0.28449672, %v1832_v25  ;;  %v1833_v39 = vmul.f32 %v2928_v16, %v1829_v35 }
 0xac4   : > { %v1838_v30 = vmul.f32 %v2922_v62, %v1834_v3  ;;  %v1835_v44 = vadd.f32 -0.28449672, %v1831_v31  ;;  %v1485_v31 = vadd.f32 %v2439_v27, %v3622_v1 }
 0xac5   : > { %v1840_v34 = vmul.f32 %v2924_v0, %v1836_v28  ;;  %v1837_v49 = vadd.f32 -0.28449672, %v1833_v39 }
 0xac6   : > { %v1842_v38 = vadd.f32 0.2548296, %v1838_v30  ;;  %v1839_v42 = vmul.f32 %v2926_v9, %v1835_v44 }
 0xac7   : > { %v1844_v45 = vadd.f32 0.2548296, %v1840_v34  ;;  %v1841_v55 = vmul.f32 %v2928_v16, %v1837_v49 }
 0xac8   : > { %v1846_v41 = vmul.f32 %v2922_v62, %v1842_v38  ;;  %v1843_v53 = vadd.f32 0.2548296, %v1839_v42 }
 0xac9   : > { %v1848_v47 = vmul.f32 %v2924_v0, %v1844_v45  ;;  %v1845_v61 = vadd.f32 0.2548296, %v1841_v55  ;;  %v1796_v0 = vsel %vm1792_vm9, 1.0, %v3217_v5 }
 0xaca   : > { %v1866_v52 = vmul.f32 %v2930_v43, %v1846_v41  ;;  %v1847_v57 = vmul.f32 %v2926_v9, %v1843_v53  ;;  %v1782_v9 = vmul.f32 0.5, %v3825_v32 }
 0xacb   : > { %v1868_v54 = vmul.f32 %v2932_v51, %v1848_v47  ;;  %v1849_v4 = vmul.f32 %v2928_v16, %v1845_v61  ;;  %v1784_v16 = vmul.f32 0.5, %v3827_v33 }
 0xacc   : > { %v1870_v56 = vsub.f32 1.0, %v1866_v52  ;;  %v1867_v63 = vmul.f32 %v2934_v58, %v1847_v57 }
 0xacd   : > { %v1872_v60 = vsub.f32 1.0, %v1868_v54  ;;  %v1869_v46 = vmul.f32 %v2936_v36, %v1849_v4 }
 0xace   : > { %v1874_v62 = vmul.f32 %v1870_v56, %v1794_v59  ;;  %v1871_v7 = vsub.f32 1.0, %v1867_v63 }
 0xacf   : > { %v1876_v6 = vmul.f32 %v1872_v60, %v1796_v0  ;;  %v1873_v10 = vsub.f32 1.0, %v1869_v46 }
 0xad0   : > { %v1878_v8 = vadd.f32 1.0, %v1874_v62  ;;  %v1875_v2 = vmul.f32 %v1871_v7, %v1795_v24 }
 0xad1   : > { %v1880_v11 = vadd.f32 1.0, %v1876_v6  ;;  %v1877_v15 = vmul.f32 %v1873_v10, %v1797_v13 }
 0xad2   : > { %v1879_v40 = vadd.f32 1.0, %v1875_v2  ;;  %v1882_v14 = vmul.f32 %v1878_v8, %v1782_v9 }
 0xad3   : > { %v1881_v19 = vadd.f32 1.0, %v1877_v15  ;;  %v1884_v20 = vmul.f32 %v1880_v11, %v1784_v16 }
 0xad4   : > { %v1883_v17 = vmul.f32 %v1879_v40, %v1783_v12  ;;  %v1886_v21 = vpack.c.bf16 %v1882_v14, %v1882_v14 }
 0xad5   : > { %v1885_v22 = vmul.f32 %v1881_v19, %v1785_v18  ;;  %v1888_v23 = vpack.c.bf16 %v1884_v20, %v1884_v20 }
 0xad6   : > { %v1887_v50 = vpack.c.bf16 %v1883_v17, %v1883_v17 }
 0xad7   : > { %v1889_v32 = vpack.c.bf16 %v1885_v22, %v1885_v22 }
 0xad8   : > { %2178 = vmatprep.mubr.bf16.mxu1 %v1887_v50 }
 0xad9   : > { %2179 = vmatmul.mubr.bf16.vlgmr.msra.gmra.mxu1 %v1886_v21  ;;  %2218 = vmatprep.mubr.bf16.mxu0 %v1889_v32 }
 0xada   : > { %2219 = vmatmul.mubr.bf16.vlgmr.msra.gmra.mxu0 %v1888_v23 }
 0xb99   : > { %v2556_v37 = vpop.f32.mrf.mxu1 }
 0xb9a   : > { %v2578_v26 = vpop.f32.mrf.mxu0 }
 0xb9b   : > { %v2557_v25 = vpop.f32.mrf.mxu1 }
 0xb9c   : > { %v2558_v3 = vadd.f32 %v2557_v25, %v2556_v37  ;;  %v2579_v28 = vpop.f32.mrf.mxu0 }
 0xb9d   : > { %v2559_v33 = vpop.f32.mrf.mxu1  ;;  %v2580_v48 = vadd.f32 %v2579_v28, %v2578_v26 }
 0xb9e   : > { %v2581_v30 = vpop.f32.mrf.mxu0 }
 0xb9f   : > { %v2560_v29 = vpop.f32.mrf.mxu1  ;;  %v2221_v34 = vadd.f32 %v2580_v48, %v2558_v3 }
 0xba0   : > { %v2582_v35 = vpop.f32.mrf.mxu0 }
 0xba1   : > { %v2226_v38 = vadd.f32 %v2221_v34, %v1485_v31 }
 0xba3   : > { %2227 = vst [vmem:[%s577_s15] sm:$0xff] %v2226_v38 }
 0xba4 PF: > { %s29_s29 = sadd.s32 1, %s3197_s29  }
 0xba5   : > { %p26_p13 = scmp.ge.s32.totalorder %s29_s29, 4  }
 0xba7   :  { %28 = sbr.rel (!%p26_p13) target bundleno = 5 (0x5), region = 143 }
 0xbac   :  { %2247 = vsyncpa [#allocation4], 1 }
 0xbad   :  { %2249 = vsyncpa [#allocation4 + $0x1], 1 }
 0xbae   :  { %2250 = vsyncpa [#allocation6], 1 }
 0xbaf   :  { %2251 = vsyncpa [#allocation9], 1 }
 0xbb0   :  { %2252 = vsyncpa [#allocation12], 1 }
 0xbb1   :  { %2253 = vsyncpa [#allocation15], 1 }

// kernel: vit_forward.6
= control target key start
LH: loop header
LB: loop body
LE: loop exit
PB: predicated region body
PF: predicated region fallthrough
CT: control target
= control target key end

     0   :  { %s2680_s25 = smov 0   ;;  %s3172_s0 = inlined_call_operand.vmem [shape: f32[2,8,128], index: 0, kind: input, shape index: {}]   ;;  %s3173_s1 = inlined_call_operand.vmem [shape: f32[1,128], index: 1, kind: input, shape index: {}]   ;;  %s3174_s2 = inlined_call_operand.vmem [shape: f32[1,128], index: 2, kind: input, shape index: {}]   ;;  %s3175_s3 = inlined_call_operand.vmem [shape: bf16[128,384], index: 3, kind: input, shape index: {}]   ;;  %s3176_s4 = inlined_call_operand.vmem [shape: f32[1,384], index: 4, kind: input, shape index: {}]   ;;  %s3177_s5 = inlined_call_operand.vmem [shape: bf16[128,128], index: 5, kind: input, shape index: {}]   ;;  %s3178_s6 = inlined_call_operand.vmem [shape: f32[1,128], index: 6, kind: input, shape index: {}]   ;;  %s3179_s7 = inlined_call_operand.vmem [shape: f32[1,128], index: 7, kind: input, shape index: {}]   ;;  %s3180_s8 = inlined_call_operand.vmem [shape: f32[1,128], index: 8, kind: input, shape index: {}]   ;;  %s3181_s9 = inlined_call_operand.vmem [shape: bf16[128,512], index: 9, kind: input, shape index: {}]   ;;  %s3182_s10 = inlined_call_operand.vmem [shape: f32[1,512], index: 10, kind: input, shape index: {}]   ;;  %s3183_s11 = inlined_call_operand.vmem [shape: bf16[512,128], index: 11, kind: input, shape index: {}]   ;;  %s3184_s12 = inlined_call_operand.vmem [shape: f32[1,128], index: 12, kind: input, shape index: {}]   ;;  %s3185_s13 = inlined_call_operand.vmem [shape: f32[2,8,128], index: 13, kind: output, shape index: {}]  }
   0x1 LB: > { %s2137_s26 = sadd.s32 4294967295, %s2600_s25   ;;  %p2141_p0 = scmp.ge.s32.totalorder %s2600_s25, 1  ;;  %s2600_s25 = sphi %s2680_s25, %s23_s25  }
   0x2   : > { %p386_p1 = scmp.lt.s32.totalorder %s2600_s25, 3 }
   0x4   : > { %p387_p2 = pnand %p2141_p0, %p386_p1 }
   0x5   : > { %p428_p3 = scmp.lt.s32.totalorder (!%p387_p2), %s2137_s26, 1  ;;  %s2605_s29 = smov (!%p387_p2), 96  }
   0x6   : > { %390 = sbr.rel (%p387_p2) target bundleno = 2848 (0xb20), region = 72  ;;  %s2608_s14 = smov (!%p387_p2), 64  }
   0xb   : > { %s3187_s26 = smov (!%p428_p3, %s2137_s26), 1  ;;  %v2438_v1 = vld [vmem:[%s3175_s3 + $0xac] ss:$12 sps:$4 sm:$0xff]   ;;  %v2440_v2 = vld [vmem:[%s3175_s3 + $0xa8] ss:$12 sps:$4 sm:$0xff]   ;;  %v2602_v3 = vmov 0.0   ;;  %v501_v41 = vlaneseq }
   0xc   : > { %s2142_s27 = sshll.u32 %s3187_s26, 3  ;;  %2334 = vmatprep.subr.bf16.mxu1 %v2602_v3  ;;  %v2441_v4 = vld [vmem:[%s3175_s3 + $0xb0] ss:$12 sps:$4 sm:$0xff]   ;;  %v2442_v5 = vld [vmem:[%s3175_s3 + $0x94] ss:$12 sps:$4 sm:$0xff]   ;;  %644 = vmatprep.subr.bf16.mxu0 %v2438_v1  ;;  %v2603_v22 = vmov 0  }
   0xd   : > { %s431_s30 = scalar_lea.vmem %s3172_s0, %s2142_s27  ;;  %v2444_v6 = vld [vmem:[%s3175_s3 + $0x90] ss:$12 sps:$4 sm:$0xff]   ;;  %v2445_v7 = vld [vmem:[%s3175_s3 + $0x98] ss:$12 sps:$4 sm:$0xff]   ;;  %645 = vmatpush1.bf16.msra.mxu0 %v2440_v2  ;;  %2335 = vmatpush3.bf16.msra.mxu1 %v2441_v4  ;;  %v2449_v14 = vld [vmem:[%s3175_s3 + $0x80] ss:$12 sps:$4 sm:$0xff]  }
   0xe   : > { %v2696_v0 = vld [vmem:[%s431_s30] sm:$0xff]  ;;  %646 = vmatprep.subr.bf16.mxu0 %v2442_v5  ;;  %2336 = vmatprep.subr.bf16.mxu1 %v2602_v3  ;;  %v2446_v12 = vld [vmem:[%s3175_s3 + $0x7c] ss:$12 sps:$4 sm:$0xff]   ;;  %v2454_v18 = vld [vmem:[%s3175_s3 + $0x4c] ss:$12 sps:$4 sm:$0xff]   ;;  %vm2604_vm0 = vmmov 0  }
   0xf   : > { %440 = vadd.xlane.f32.xlu0 %v2696_v0  ;;  %v2448_v13 = vld [vmem:[%s3175_s3 + $0x78] ss:$12 sps:$4 sm:$0xff]   ;;  %v2452_v16 = vld [vmem:[%s3175_s3 + $0x60] ss:$12 sps:$4 sm:$0xff]   ;;  %v2453_v17 = vld [vmem:[%s3175_s3 + $0x68] ss:$12 sps:$4 sm:$0xff]   ;;  %676 = vmatprep.mubr.bf16.mxu0 %v2603_v22 }
  0x10   : > { %v2450_v15 = vld [vmem:[%s3175_s3 + $0x64] ss:$12 sps:$4 sm:$0xff]   ;;  %v2456_v19 = vld [vmem:[%s3175_s3 + $0x48] ss:$12 sps:$4 sm:$0xff]   ;;  %2350 = vmatprep.mubr.msk.bf16.mxu1 %vm2604_vm0, %v2602_v3  ;;  %v2465_v27 = vld [vmem:[%s3175_s3 + $0x20] ss:$12 sps:$4 sm:$0xff]  }
  0x11   : > { %647 = vmatpush1.bf16.msra.mxu0 %v2444_v6  ;;  %2337 = vmatpush3.bf16.msra.mxu1 %v2445_v7  ;;  %v2457_v20 = vld [vmem:[%s3175_s3 + $0x50] ss:$12 sps:$4 sm:$0xff]   ;;  %v2458_v21 = vld [vmem:[%s3175_s3 + $0x34] ss:$12 sps:$4 sm:$0xff]   ;;  %v2461_v24 = vld [vmem:[%s3175_s3 + $0x38] ss:$12 sps:$4 sm:$0xff]  }
  0x12   : > { %2338 = vmatprep.subr.bf16.mxu1 %v2602_v3  ;;  %648 = vmatprep.subr.bf16.mxu0 %v2446_v12  ;;  %v2460_v23 = vld [vmem:[%s3175_s3 + $0x30] ss:$12 sps:$4 sm:$0xff]   ;;  %v2464_v26 = vld [vmem:[%s3175_s3 + $0x18] ss:$12 sps:$4 sm:$0xff]   ;;  %v2468_v29 = vld [vmem:[%s3175_s3] ss:$12 sps:$4 sm:$0xff]  }
  0x13   : > { %v2462_v25 = vld [vmem:[%s3175_s3 + $0x1c] ss:$12 sps:$4 sm:$0xff]   ;;  %v2466_v28 = vld [vmem:[%s3175_s3 + $0x4] ss:$12 sps:$4 sm:$0xff]   ;;  %v2144_v35 = vld [vmem:[%s3173_s1] ss:$0 sm:$0xff] }
  0x14   : > { %v2469_v30 = vld [vmem:[%s3175_s3 + $0x8] ss:$12 sps:$4 sm:$0xff]   ;;  %v2145_v37 = vld [vmem:[%s3174_s2] ss:$0 sm:$0xff]  ;;  %v2795_v42 = vshrl.u32 %v501_v41, 7  ;;  %vm733_vm1 = vcmask 261120  }
  0x15   : > { %649 = vmatpush1.bf16.msra.mxu0 %v2448_v13  ;;  %2339 = vmatpush3.bf16.msra.mxu1 %v2449_v14  ;;  %v499_v45 = vld [vmem:[%s3176_s4] sm:$0x7]  ;;  %s2606_s30 = smov 32   ;;  %vm796_vm2 = vcmask 1043456   ;;  %v730_v5 = vand.u32 127, %v501_v41  ;;  %vm780_vm4 = vcmask 64512  }
  0x16   : > { %2340 = vmatprep.subr.bf16.mxu1 %v2602_v3  ;;  %650 = vmatprep.subr.bf16.mxu0 %v2450_v15  ;;  %v507_v43 = vsub.s32 1, %v2795_v42  ;;  %v503_v44 = vsub.s32 0, %v2795_v42  ;;  %v511_v46 = vsub.s32 2, %v2795_v42  ;;  %v2607_v6 = vmov -1e+30  }
  0x17   : > { %vm731_vm3 = vcmp.lt.s32.totalorder %v730_v5, 5  ;;  %vm958_vm5 = vcmask 523520   ;;  %vm1074_vm6 = vcmask 785920   ;;  %vm1190_vm7 = vcmask 1048320  }
  0x18   : > { %v508_v47 = vrot.slane %v499_v45, %v507_v43  ;;  %v504_v50 = vrot.slane %v499_v45, %v503_v44  ;;  %v512_v53 = vrot.slane %v499_v45, %v511_v46  ;;  %v2821_v7 = vsel %vm731_vm3, 0.0, %v2607_v6 }
  0x19   : > { %651 = vmatpush1.bf16.msra.mxu0 %v2452_v16  ;;  %2341 = vmatpush3.bf16.msra.mxu1 %v2453_v17 }
  0x1a   : > { %652 = vmatprep.subr.bf16.mxu0 %v2454_v18  ;;  %2342 = vmatprep.subr.bf16.mxu1 %v2602_v3 }
  0x1d   : > { %653 = vmatpush1.bf16.msra.mxu0 %v2456_v19  ;;  %2343 = vmatpush3.bf16.msra.mxu1 %v2457_v20 }
  0x1e   : > { %654 = vmatprep.subr.bf16.mxu0 %v2458_v21  ;;  %2344 = vmatprep.subr.bf16.mxu1 %v2602_v3 }
  0x21   : > { %655 = vmatpush1.bf16.msra.mxu0 %v2460_v23  ;;  %2345 = vmatpush3.bf16.msra.mxu1 %v2461_v24 }
  0x22   : > { %656 = vmatprep.subr.bf16.mxu0 %v2462_v25  ;;  %2346 = vmatprep.subr.bf16.mxu1 %v2602_v3 }
  0x25   : > { %657 = vmatpush1.bf16.msra.mxu0 %v2464_v26  ;;  %2347 = vmatpush3.bf16.msra.mxu1 %v2465_v27 }
  0x26   : > { %658 = vmatprep.subr.bf16.mxu0 %v2466_v28  ;;  %2348 = vmatprep.subr.bf16.mxu1 %v2602_v3 }
  0x29   : > { %659 = vmatpush1.bf16.msra.mxu0 %v2468_v29  ;;  %2349 = vmatpush3.bf16.msra.mxu1 %v2469_v30 }
  0x2a   : > { %2354 = vmatprep.subr.bf16.mxu1 %v2602_v3  ;;  %2378 = vmatprep.subr.bf16.mxu0 %v2602_v3 }
  0x98   : > { %v441_v8 = vpop.xlane.xlu0 %440 }
  0x99   : > { %v443_v9 = vmul.f32 0.0078125, %v441_v8 }
  0x9b   : > { %v444_v10 = vsub.f32 %v2696_v0, %v443_v9 }
  0x9d   : > { %v445_v11 = vmul.f32 %v444_v10, %v444_v10 }
  0x9f   : > { %446 = vadd.xlane.f32.xlu0 %v445_v11 }
 0x128   : > { %v447_v31 = vpop.xlane.xlu0 %446 }
 0x129   : > { %v448_v32 = vmul.f32 0.0078125, %v447_v31 }
 0x12b   : > { %v449_v33 = vadd.f32 1e-06, %v448_v32 }
 0x12d   : > { %2558 = vrsqrt.f32 %v449_v33 }
 0x13a   : > { %v2559_v34 = vpop.eup %2558 }
 0x13b   : > { %v451_v36 = vmul.f32 %v2559_v34, %v444_v10 }
 0x13d   : > { %v458_v38 = vmul.f32 %v2144_v35, %v451_v36 }
 0x13f   : > { %v465_v39 = vadd.f32 %v2145_v37, %v458_v38 }
 0x141   : > { %v466_v40 = vpack.c.bf16 %v465_v39, %v465_v39 }
 0x143   : > { %677 = vmatmul.mubr.bf16.vlgmr.msra.gmra.mxu0 %v466_v40  ;;  %2351 = vmatmul.mubr.bf16.vlgmr.msra.gmra.mxu1 %v466_v40 }
 0x144   : > { %2356 = vmatprep.mubr.msk.bf16.mxu1 %vm2604_vm0, %v2602_v3  ;;  %2380 = vmatprep.mubr.msk.bf16.mxu0 %vm2604_vm0, %v2602_v3 }
 0x203   : > { %v678_v48 = vpop.f32.mrf.mxu0  ;;  %v719_v49 = vpop.f32.mrf.mxu1 }
 0x204   : > { %v679_v57 = vadd.f32 %v678_v48, %v504_v50  ;;  %v720_v61 = vadd.f32 %v719_v49, %v512_v53 }
 0x205   : > { %v680_v51 = vpop.f32.mrf.mxu0  ;;  %v2352_v52 = vpop.f32.mrf.mxu1 }
 0x206   : > { %v681_v54 = vadd.f32 %v680_v51, %v508_v47  ;;  %v725_v63 = vmul.f32 0.17677669, %v679_v57  ;;  %v2812_v1 = vpack.c.bf16 %v720_v61, %v720_v61 }
 0x207   : > { %v682_v55 = vpop.f32.mrf.mxu0  ;;  %v722_v56 = vpop.f32.mrf.mxu1 }
 0x208   : > { %v727_v58 = vpack.c.bf16 %v681_v54, %v681_v54  ;;  %v726_v2 = vpack.c.bf16 %v725_v63, %v725_v63  ;;  %v798_v4 = vsel %vm796_vm2, %v2812_v1, 0 }
 0x209   : > { %v683_v59 = vpop.f32.mrf.mxu0  ;;  %v2353_v60 = vpop.f32.mrf.mxu1 }
 0x20a   : > { %845 = vrot.lane.b32.xlu0 %v727_v58, %s2605_s29  ;;  %v738_v62 = vsel %vm733_vm1, %v727_v58, 0 }
 0x20b   : > { %2355 = vmatpush3.bf16.xpose.msra.mxu1 %v738_v62 }
 0x20c   : > { %2360 = vmatprep.subr.bf16.mxu1 %v2602_v3 }
 0x20e   : > { %1078 = vrot.lane.b32.xlu0 %v727_v58, %s2606_s30 }
 0x212   : > { %2357 = vmatmul.mubr.msk.bf16.vlgmr.msra.gmra.mxu1 %vm733_vm1, %v726_v2 }
 0x213   : > { %2361 = vmatpush3.bf16.msra.mxu1 %v798_v4  ;;  %2362 = vmatprep.mubr.msk.bf16.mxu1 %vm2604_vm0, %v2602_v3 }
 0x214   : > { %2366 = vmatprep.subr.bf16.mxu1 %v2602_v3 }
 0x27c   : > { %v846_v21 = vpop.permute.xlu0 %845 }
 0x27d   : > { %v851_v31 = vsel %vm733_vm1, %v846_v21, 0 }
 0x280   : > { %v1079_v26 = vpop.permute.xlu0 %1078 }
 0x281   : > { %v1084_v29 = vsel %vm733_vm1, %v1079_v26, 0 }
 0x2d2   : > { %v774_v8 = vpop.f32.mrf.mxu1 }
 0x2d3   : > { %v775_v9 = vadd.f32 %v774_v8, %v2821_v7 }
 0x2d4   : > { %v2358_v10 = vpop.f32.mrf.mxu1 }
 0x2d5   : > { %v781_v11 = vsel %vm780_vm4, %v775_v9, -inf }
 0x2d6   : > { %782 = vmax.xlane.f32.xlu1 %v781_v11  ;;  %v777_v12 = vpop.f32.mrf.mxu1 }
 0x2d8   : > { %v2359_v13 = vpop.f32.mrf.mxu1 }
 0x35f   : > { %v783_v14 = vpop.xlane.xlu1 %782 }
 0x360   : > { %v784_v15 = vsub.f32 %v775_v9, %v783_v14 }
 0x362   : > { %v785_v16 = vmul.f32 1.442695, %v784_v15 }
 0x364   : > { %2560 = vpow2.f32 %v785_v16 }
 0x371   : > { %v2561_v17 = vpop.eup %2560 }
 0x372   : > { %v787_v18 = vsel %vm780_vm4, %v2561_v17, 0.0 }
 0x373   : > { %788 = vadd.xlane.f32.xlu1 %v787_v18 }
 0x384   : > { %842 = vrot.lane.b32.xlu1 %v726_v2, %s2605_s29 }
 0x388   : > { %962 = vrot.lane.b32.xlu1 %v727_v58, %s2608_s14 }
 0x38c   : > { %960 = vrot.lane.b32.xlu1 %v726_v2, %s2608_s14 }
 0x390   : > { %1076 = vrot.lane.b32.xlu1 %v726_v2, %s2606_s30 }
 0x3fc   : > { %v789_v19 = vpop.xlane.xlu1 %788 }
 0x3fd   : > { %2562 = vrcp.f32 %v789_v19 }
 0x400   : > { %v843_v20 = vpop.permute.xlu1 %842 }
 0x404   : > { %v963_v23 = vpop.permute.xlu1 %962 }
 0x405   : > { %v968_v24 = vsel %vm733_vm1, %v963_v23, 0 }
 0x406   : > { %2379 = vmatpush3.bf16.xpose.msra.mxu0 %v968_v24 }
 0x407   : > { %2390 = vmatprep.subr.bf16.mxu0 %v2602_v3 }
 0x408   : > { %v961_v28 = vpop.permute.xlu1 %960 }
 0x40a   : > { %v2563_v25 = vpop.eup %2562 }
 0x40b   : > { %v791_v27 = vmul.f32 %v2563_v25, %v2561_v17 }
 0x40c   : > { %v1077_v32 = vpop.permute.xlu1 %1076 }
 0x40d   : > { %2381 = vmatmul.mubr.msk.bf16.vlgmr.msra.gmra.mxu0 %vm733_vm1, %v961_v28  ;;  %v792_v30 = vpack.c.bf16 %v791_v27, %v791_v27 }
 0x40e   : > { %2391 = vmatpush3.bf16.xpose.msra.mxu0 %v1084_v29  ;;  %2392 = vmatprep.mubr.msk.bf16.mxu0 %vm2604_vm0, %v2602_v3 }
 0x40f   : > { %2363 = vmatmul.mubr.msk.bf16.vlgmr.msra.gmra.mxu1 %vm780_vm4, %v792_v30  ;;  %2402 = vmatprep.subr.bf16.mxu0 %v2602_v3 }
 0x410   : > { %2367 = vmatpush3.bf16.xpose.msra.mxu1 %v851_v31  ;;  %2368 = vmatprep.mubr.msk.bf16.mxu1 %vm2604_vm0, %v2602_v3  ;;  %v2470_v31 = vld [vmem:[%s3177_s5 + $0x38] sm:$0xff]  }
 0x411   : > { %2372 = vmatprep.subr.bf16.mxu1 %v2602_v3 }
 0x415   : > { %2393 = vmatmul.mubr.msk.bf16.vlgmr.msra.gmra.mxu0 %vm733_vm1, %v1077_v32  ;;  %v2471_v32 = vld [vmem:[%s3177_s5 + $0x30] sm:$0xff]  }
 0x416   : > { %2418 = vmatprep.mubr.msk.bf16.mxu0 %vm2604_vm0, %v2602_v3  ;;  %2403 = vmatpush3.bf16.msra.mxu0 %v2470_v31  ;;  %v2516_v31 = vld [vmem:[%s3181_s9 + $0x24] ss:$16 sps:$4 sm:$0xff]  }
 0x417   : > { %2369 = vmatmul.mubr.msk.bf16.vlgmr.msra.gmra.mxu1 %vm733_vm1, %v843_v20  ;;  %2404 = vmatprep.subr.bf16.mxu0 %v2602_v3 }
 0x418   : > { %2374 = vmatprep.mubr.msk.bf16.mxu1 %vm2604_vm0, %v2602_v3 }
 0x41a   : > { %2405 = vmatpush3.bf16.msra.mxu0 %v2471_v32  ;;  %v2519_v32 = vld [vmem:[%s3181_s9 + $0x2c] ss:$16 sps:$4 sm:$0xff]  }
 0x41b   : > { %2406 = vmatprep.subr.bf16.mxu0 %v2602_v3 }
 0x4cd   : > { %v1004_v33 = vpop.f32.mrf.mxu0 }
 0x4ce   : > { %v1005_v34 = vadd.f32 %v1004_v33, %v2821_v7  ;;  %v2472_v33 = vld [vmem:[%s3177_s5 + $0x28] sm:$0xff]  }
 0x4cf   : > { %v834_v35 = vpop.f32.mrf.mxu1  ;;  %v2382_v36 = vpop.f32.mrf.mxu0  ;;  %2407 = vmatpush3.bf16.msra.mxu0 %v2472_v33  ;;  %v2514_v33 = vld [vmem:[%s3181_s9 + $0x20] ss:$16 sps:$4 sm:$0xff]  }
 0x4d0   : > { %840 = vst.msk [vmem:[#allocation2] sm:$0xff] %vm733_vm1, %v834_v35  ;;  %v1010_v37 = vsel %vm780_vm4, %v1005_v34, -inf  ;;  %2408 = vmatprep.subr.bf16.mxu0 %v2602_v3  ;;  %v2474_v35 = vld [vmem:[%s3177_s5 + $0x18] sm:$0xff]   ;;  %v2475_v36 = vld [vmem:[%s3177_s5 + $0x10] sm:$0xff]  }
 0x4d1   : > { %1011 = vmax.xlane.f32.xlu1 %v1010_v37  ;;  %v2364_v38 = vpop.f32.mrf.mxu1  ;;  %v1007_v39 = vpop.f32.mrf.mxu0 }
 0x4d3   : > { %v837_v40 = vpop.f32.mrf.mxu1  ;;  %v2383_v41 = vpop.f32.mrf.mxu0 }
 0x4d4   : > { %v2476_v40 = vld [vmem:[%s3177_s5 + $0x8] sm:$0xff]  }
 0x4d5   : > { %v2365_v45 = vpop.f32.mrf.mxu1  ;;  %v1120_v47 = vpop.f32.mrf.mxu0 }
 0x4d6   : > { %v1121_v53 = vadd.f32 %v1120_v47, %v2821_v7  ;;  %v2477_v45 = vld [vmem:[%s3177_s5] sm:$0xff]  }
 0x4d7   : > { %v887_v48 = vpop.f32.mrf.mxu1  ;;  %v2394_v49 = vpop.f32.mrf.mxu0 }
 0x4d8   : > { %v888_v50 = vadd.f32 %v887_v48, %v2821_v7  ;;  %v1126_v58 = vsel %vm780_vm4, %v1121_v53, -inf }
 0x4d9   : > { %v2370_v51 = vpop.f32.mrf.mxu1  ;;  %v1123_v52 = vpop.f32.mrf.mxu0 }
 0x4da   : > { %v893_v54 = vsel %vm780_vm4, %v888_v50, -inf }
 0x4db   : > { %v2395_v55 = vpop.f32.mrf.mxu0  ;;  %894 = vmax.xlane.f32.xlu0 %v893_v54  ;;  %v890_v56 = vpop.f32.mrf.mxu1 }
 0x4dd   : > { %v2371_v57 = vpop.f32.mrf.mxu1 }
 0x4df   : > { %1127 = vmax.xlane.f32.xlu0 %v1126_v58 }
 0x55a   : > { %v1012_v59 = vpop.xlane.xlu1 %1011 }
 0x55b   : > { %v1013_v60 = vsub.f32 %v1005_v34, %v1012_v59  ;;  %v2473_v34 = vld [vmem:[%s3177_s5 + $0x20] sm:$0xff]  }
 0x55c   : > { %2409 = vmatpush3.bf16.msra.mxu0 %v2473_v34  ;;  %v2178_v59 = vld [vmem:[%s3178_s6] ss:$0 sm:$0xff]  ;;  %v2517_v34 = vld [vmem:[%s3181_s9 + $0x28] ss:$16 sps:$4 sm:$0xff]  }
 0x55d   : > { %v1014_v61 = vmul.f32 1.442695, %v1013_v60  ;;  %2410 = vmatprep.subr.bf16.mxu0 %v2602_v3 }
 0x55f   : > { %2564 = vpow2.f32 %v1014_v61 }
 0x560   : > { %2411 = vmatpush3.bf16.msra.mxu0 %v2474_v35  ;;  %v2522_v35 = vld [vmem:[%s3181_s9 + $0x4] ss:$16 sps:$4 sm:$0xff]  }
 0x561   : > { %2412 = vmatprep.subr.bf16.mxu0 %v2602_v3 }
 0x564   : > { %v895_v62 = vpop.xlane.xlu0 %894  ;;  %2413 = vmatpush3.bf16.msra.mxu0 %v2475_v36  ;;  %v2525_v36 = vld [vmem:[%s3181_s9 + $0xc] ss:$16 sps:$4 sm:$0xff]  }
 0x565   : > { %v896_v63 = vsub.f32 %v888_v50, %v895_v62  ;;  %2414 = vmatprep.subr.bf16.mxu0 %v2602_v3 }
 0x567   : > { %v897_v2 = vmul.f32 1.442695, %v896_v63 }
 0x568   : > { %v1128_v4 = vpop.xlane.xlu0 %1127  ;;  %2415 = vmatpush3.bf16.msra.mxu0 %v2476_v40 }
 0x569   : > { %2566 = vpow2.f32 %v897_v2  ;;  %v1129_v5 = vsub.f32 %v1121_v53, %v1128_v4  ;;  %2416 = vmatprep.subr.bf16.mxu0 %v2602_v3 }
 0x56b   : > { %v1130_v6 = vmul.f32 1.442695, %v1129_v5  ;;  %v2478_v5 = vld [vmem:[%s3181_s9 + $0xe0] ss:$16 sps:$4 sm:$0xff]  }
 0x56c   : > { %v2565_v7 = vpop.eup %2564  ;;  %2417 = vmatpush3.bf16.msra.mxu0 %v2477_v45 }
 0x56d   : > { %2568 = vpow2.f32 %v1130_v6  ;;  %v1016_v8 = vsel %vm780_vm4, %v2565_v7, 0.0  ;;  %v2481_v6 = vld [vmem:[%s3181_s9 + $0xe8] ss:$16 sps:$4 sm:$0xff]  }
 0x56e   : > { %1017 = vadd.xlane.f32.xlu0 %v1016_v8  ;;  %v2489_v8 = vld [vmem:[%s3181_s9 + $0xcc] ss:$16 sps:$4 sm:$0xff]  }
 0x576   : > { %v2567_v9 = vpop.eup %2566 }
 0x577   : > { %v899_v10 = vsel %vm780_vm4, %v2567_v9, 0.0 }
 0x578   : > { %900 = vadd.xlane.f32.xlu0 %v899_v10  ;;  %v2487_v10 = vld [vmem:[%s3181_s9 + $0xc8] ss:$16 sps:$4 sm:$0xff]  }
 0x57a   : > { %v2569_v11 = vpop.eup %2568 }
 0x57b   : > { %v1132_v12 = vsel %vm780_vm4, %v2569_v11, 0.0 }
 0x57c   : > { %1133 = vadd.xlane.f32.xlu1 %v1132_v12 }
 0x58d   : > { %1022 = vrot.lane.b32.xlu1 %v2812_v1, %s2608_s14 }
 0x58e   : > { %906 = vrot.lane.b32.xlu0 %v2812_v1, %s2605_s29 }
 0x591   : > { %1138 = vrot.lane.b32.xlu1 %v2812_v1, %s2606_s30 }
 0x5f7   : > { %v1018_v13 = vpop.xlane.xlu0 %1017 }
 0x601   : > { %v901_v14 = vpop.xlane.xlu0 %900 }
 0x602   : > { %2570 = vrcp.f32 %v901_v14 }
 0x603   : > { %2572 = vrcp.f32 %v1018_v13 }
 0x605   : > { %v907_v15 = vpop.permute.xlu0 %906  ;;  %v1134_v17 = vpop.xlane.xlu1 %1133 }
 0x606   : > { %v912_v16 = vsel %vm796_vm2, %v907_v15, 0  ;;  %2574 = vrcp.f32 %v1134_v17  ;;  %v2492_v15 = vld [vmem:[%s3181_s9 + $0xa4] ss:$16 sps:$4 sm:$0xff]   ;;  %v2490_v17 = vld [vmem:[%s3181_s9 + $0xa0] ss:$16 sps:$4 sm:$0xff]  }
 0x607   : > { %2373 = vmatpush3.bf16.msra.mxu1 %v912_v16  ;;  %v2495_v16 = vld [vmem:[%s3181_s9 + $0xac] ss:$16 sps:$4 sm:$0xff]  }
 0x608   : > { %2384 = vmatprep.subr.bf16.mxu1 %v2602_v3 }
 0x609   : > { %v1023_v20 = vpop.permute.xlu1 %1022 }
 0x60a   : > { %v1028_v24 = vsel %vm796_vm2, %v1023_v20, 0  ;;  %v2498_v20 = vld [vmem:[%s3181_s9 + $0x84] ss:$16 sps:$4 sm:$0xff]  }
 0x60d   : > { %v1139_v25 = vpop.permute.xlu1 %1138 }
 0x60e   : > { %v1144_v28 = vsel %vm796_vm2, %v1139_v25, 0  ;;  %v2502_v25 = vld [vmem:[%s3181_s9 + $0x60] ss:$16 sps:$4 sm:$0xff]  }
 0x60f   : > { %v2571_v18 = vpop.eup %2570 }
 0x610   : > { %v903_v19 = vmul.f32 %v2571_v18, %v2567_v9  ;;  %v2573_v23 = vpop.eup %2572  ;;  %v2484_v9 = vld [vmem:[%s3181_s9 + $0xc0] ss:$16 sps:$4 sm:$0xff]   ;;  %v2493_v18 = vld [vmem:[%s3181_s9 + $0xa8] ss:$16 sps:$4 sm:$0xff]  }
 0x611   : > { %v1020_v1 = vmul.f32 %v2573_v23, %v2565_v7  ;;  %v2486_v7 = vld [vmem:[%s3181_s9 + $0xc4] ss:$16 sps:$4 sm:$0xff]   ;;  %v2501_v23 = vld [vmem:[%s3181_s9 + $0x8c] ss:$16 sps:$4 sm:$0xff]  }
 0x612   : > { %v904_v21 = vpack.c.bf16 %v903_v19, %v903_v19  ;;  %v2496_v19 = vld [vmem:[%s3181_s9 + $0x80] ss:$16 sps:$4 sm:$0xff]  }
 0x613   : > { %v1021_v26 = vpack.c.bf16 %v1020_v1, %v1020_v1  ;;  %v2575_v27 = vpop.eup %2574  ;;  %v2507_v1 = vld [vmem:[%s3181_s9 + $0x6c] ss:$16 sps:$4 sm:$0xff]  }
 0x614   : > { %2375 = vmatmul.mubr.msk.bf16.vlgmr.msra.gmra.mxu1 %vm780_vm4, %v904_v21  ;;  %v1136_v29 = vmul.f32 %v2575_v27, %v2569_v11  ;;  %v2499_v21 = vld [vmem:[%s3181_s9 + $0x88] ss:$16 sps:$4 sm:$0xff]   ;;  %v2510_v27 = vld [vmem:[%s3181_s9 + $0x44] ss:$16 sps:$4 sm:$0xff]  }
 0x615   : > { %2385 = vmatpush3.bf16.msra.mxu1 %v1028_v24  ;;  %2386 = vmatprep.mubr.msk.bf16.mxu1 %vm2604_vm0, %v2602_v3  ;;  %v2504_v24 = vld [vmem:[%s3181_s9 + $0x64] ss:$16 sps:$4 sm:$0xff]  }
 0x616   : > { %2396 = vmatprep.subr.bf16.mxu1 %v2602_v3  ;;  %v1137_v30 = vpack.c.bf16 %v1136_v29, %v1136_v29  ;;  %v2508_v29 = vld [vmem:[%s3181_s9 + $0x40] ss:$16 sps:$4 sm:$0xff]  }
 0x61c   : > { %2387 = vmatmul.mubr.msk.bf16.vlgmr.msra.gmra.mxu1 %vm780_vm4, %v1021_v26  ;;  %v2505_v26 = vld [vmem:[%s3181_s9 + $0x68] ss:$16 sps:$4 sm:$0xff]  }
 0x61d   : > { %2397 = vmatpush3.bf16.msra.mxu1 %v1144_v28  ;;  %2398 = vmatprep.mubr.msk.bf16.mxu1 %vm2604_vm0, %v2602_v3  ;;  %v2513_v28 = vld [vmem:[%s3181_s9 + $0x4c] ss:$16 sps:$4 sm:$0xff]  }
 0x624   : > { %2399 = vmatmul.mubr.msk.bf16.vlgmr.msra.gmra.mxu1 %vm780_vm4, %v1137_v30  ;;  %v2511_v30 = vld [vmem:[%s3181_s9 + $0x48] ss:$16 sps:$4 sm:$0xff]  }
 0x625   : > { %1588 = vmatprep.mubr.bf16.mxu1 %v2603_v22 }
 0x6d4   : > { %v948_v37 = vpop.f32.mrf.mxu1 }
 0x6d5   : > { %955 = vrot.lane.b32.xlu1 %v948_v37, %s2606_s30  ;;  %v2520_v37 = vld [vmem:[%s3181_s9] ss:$16 sps:$4 sm:$0xff]   ;;  %s435_s30 = scalar_lea.vmem %s3185_s13, %s2142_s27 }
 0x6d6   : > { %v2376_v38 = vpop.f32.mrf.mxu1 }
 0x6d7   : > { %v2523_v38 = vld [vmem:[%s3181_s9 + $0x8] ss:$16 sps:$4 sm:$0xff]  }
 0x6d8   : > { %v951_v39 = vpop.f32.mrf.mxu1 }
 0x6da   : > { %v2377_v41 = vpop.f32.mrf.mxu1 }
 0x6dc   : > { %v1064_v47 = vpop.f32.mrf.mxu1 }
 0x6dd   : > { %1071 = vrot.lane.b32.xlu0 %v1064_v47, %s2608_s14  ;;  %v2187_v47 = vld [vmem:[%s3179_s7] ss:$0 sm:$0xff] }
 0x6de   : > { %v2388_v48 = vpop.f32.mrf.mxu1 }
 0x6e0   : > { %v1067_v49 = vpop.f32.mrf.mxu1 }
 0x6e1   : > { %v2188_v49 = vld [vmem:[%s3180_s8] ss:$0 sm:$0xff] }
 0x6e2   : > { %v2389_v50 = vpop.f32.mrf.mxu1 }
 0x6e4   : > { %v1180_v51 = vpop.f32.mrf.mxu1 }
 0x6e5   : > { %1187 = vrot.lane.b32.xlu1 %v1180_v51, %s2605_s29 }
 0x6e6   : > { %v2400_v52 = vpop.f32.mrf.mxu1 }
 0x6e8   : > { %v1183_v53 = vpop.f32.mrf.mxu1 }
 0x6e9   : > { %v2526_v53 = vld [vmem:[%s3183_s11 + $0x78] sm:$0xff]  }
 0x6ea   : > { %v2401_v54 = vpop.f32.mrf.mxu1 }
 0x6eb   : > { %v2527_v54 = vld [vmem:[%s3183_s11 + $0xf8] sm:$0xff]  }
 0x747   : > { %v956_v55 = vpop.permute.xlu1 %955 }
 0x748   : > { %959 = vst.msk [vmem:[#allocation2] sm:$0xff] %vm958_vm5, %v956_v55  ;;  %v2528_v55 = vld [vmem:[%s3183_s11 + $0x38] sm:$0xff]  }
 0x74f   : > { %v1072_v56 = vpop.permute.xlu0 %1071 }
 0x750   : > { %1075 = vst.msk [vmem:[#allocation2] sm:$0xff] %vm1074_vm6, %v1072_v56  ;;  %v2529_v56 = vld [vmem:[%s3183_s11 + $0xb8] sm:$0xff]  }
 0x757   : > { %v1188_v3 = vpop.permute.xlu1 %1187 }
 0x758   : > { %1191 = vst.msk [vmem:[#allocation2] sm:$0xff] %vm1190_vm7, %v1188_v3  ;;  %v2530_v3 = vld [vmem:[%s3183_s11 + $0x70] sm:$0xff]  }
 0x75f   : > { %v1192_v57 = vld [vmem:[#allocation2] sm:$0xff] }
 0x760   : > { %v1193_v58 = vpack.c.bf16 %v1192_v57, %v1192_v57  ;;  %v2531_v57 = vld [vmem:[%s3183_s11 + $0xf0] sm:$0xff]  }
 0x762   : > { %2419 = vmatmul.mubr.bf16.vlgmr.msra.gmra.mxu0 %v1193_v58  ;;  %v2532_v58 = vld [vmem:[%s3183_s11 + $0x30] sm:$0xff]  }
 0x763   : > { %1629 = vmatprep.mubr.bf16.mxu0 %v2603_v22  ;;  %v2480_v22 = vld [vmem:[%s3181_s9 + $0xe4] ss:$16 sps:$4 sm:$0xff]  }
 0x764   : > { %1556 = vmatprep.subr.bf16.mxu1 %v2480_v22  ;;  %v2540_v22 = vld [vmem:[%s3183_s11 + $0x20] sm:$0xff]  }
 0x765   : > { %1557 = vmatpush1.bf16.msra.mxu1 %v2478_v5  ;;  %v2539_v5 = vld [vmem:[%s3183_s11 + $0xe0] sm:$0xff]  }
 0x766   : > { %1558 = vmatprep.subr.bf16.mxu1 %v2486_v7  ;;  %v2543_v7 = vld [vmem:[%s3183_s11 + $0xd8] sm:$0xff]  }
 0x769   : > { %1559 = vmatpush1.bf16.msra.mxu1 %v2484_v9  ;;  %v2545_v9 = vld [vmem:[%s3183_s11 + $0x98] sm:$0xff]  }
 0x76a   : > { %1560 = vmatprep.subr.bf16.mxu1 %v2492_v15  ;;  %v2551_v15 = vld [vmem:[%s3183_s11 + $0xc8] sm:$0xff]  }
 0x76d   : > { %1561 = vmatpush1.bf16.msra.mxu1 %v2490_v17  ;;  %v2553_v17 = vld [vmem:[%s3183_s11 + $0x88] sm:$0xff]  }
 0x76e   : > { %1562 = vmatprep.subr.bf16.mxu1 %v2498_v20  ;;  %v2556_v20 = vld [vmem:[%s3183_s11] sm:$0xff]  }
 0x771   : > { %1563 = vmatpush1.bf16.msra.mxu1 %v2496_v19  ;;  %v2555_v19 = vld [vmem:[%s3183_s11 + $0xc0] sm:$0xff]  }
 0x772   : > { %1564 = vmatprep.subr.bf16.mxu1 %v2504_v24  ;;  %v1390_v24 = vsub.s32 3, %v2795_v42 }
 0x775   : > { %1565 = vmatpush1.bf16.msra.mxu1 %v2502_v25 }
 0x776   : > { %1566 = vmatprep.subr.bf16.mxu1 %v2510_v27 }
 0x779   : > { %1567 = vmatpush1.bf16.msra.mxu1 %v2508_v29 }
 0x77a   : > { %1568 = vmatprep.subr.bf16.mxu1 %v2516_v31 }
 0x77d   : > { %1569 = vmatpush1.bf16.msra.mxu1 %v2514_v33 }
 0x77e   : > { %1570 = vmatprep.subr.bf16.mxu1 %v2522_v35 }
 0x781   : > { %1571 = vmatpush1.bf16.msra.mxu1 %v2520_v37 }
 0x782   : > { %2290 = vmatprep.subr.bf16.mxu1 %v2526_v53 }
 0x822   : > { %v1299_v60 = vpop.f32.mrf.mxu0 }
 0x823   : > { %v1300_v61 = vadd.f32 %v2178_v59, %v1299_v60  ;;  %v2533_v59 = vld [vmem:[%s3183_s11 + $0xb0] sm:$0xff]   ;;  %v2534_v60 = vld [vmem:[%s3183_s11 + $0x68] sm:$0xff]  }
 0x824   : > { %v2420_v62 = vpop.f32.mrf.mxu0 }
 0x825   : > { %v2916_v63 = vadd.f32 %v1300_v61, %v2696_v0  ;;  %v2483_v0 = vld [vmem:[%s3181_s9 + $0xec] ss:$16 sps:$4 sm:$0xff]  }
 0x826   : > { %v1302_v2 = vpop.f32.mrf.mxu0  ;;  %1597 = vmatprep.subr.bf16.mxu0 %v2483_v0  ;;  %v2535_v61 = vld [vmem:[%s3183_s11 + $0xe8] sm:$0xff]   ;;  %v2542_v0 = vld [vmem:[%s3183_s11 + $0x58] sm:$0xff]  }
 0x827   : > { %1308 = vadd.xlane.f32.xlu0 %v2916_v63  ;;  %1598 = vmatpush1.bf16.msra.mxu0 %v2481_v6  ;;  %v2536_v62 = vld [vmem:[%s3183_s11 + $0x28] sm:$0xff]   ;;  %v2541_v6 = vld [vmem:[%s3183_s11 + $0xa0] sm:$0xff]  }
 0x828   : > { %v2421_v4 = vpop.f32.mrf.mxu0  ;;  %1599 = vmatprep.subr.bf16.mxu0 %v2489_v8  ;;  %v2537_v2 = vld [vmem:[%s3183_s11 + $0xa8] sm:$0xff]   ;;  %v2544_v8 = vld [vmem:[%s3183_s11 + $0x18] sm:$0xff]  }
 0x829   : > { %v2538_v4 = vld [vmem:[%s3183_s11 + $0x60] sm:$0xff]  }
 0x82b   : > { %1600 = vmatpush1.bf16.msra.mxu0 %v2487_v10  ;;  %v2546_v10 = vld [vmem:[%s3183_s11 + $0x50] sm:$0xff]  }
 0x82c   : > { %1601 = vmatprep.subr.bf16.mxu0 %v2495_v16  ;;  %v2552_v16 = vld [vmem:[%s3183_s11 + $0x8] sm:$0xff]  }
 0x82f   : > { %1602 = vmatpush1.bf16.msra.mxu0 %v2493_v18  ;;  %v2554_v18 = vld [vmem:[%s3183_s11 + $0x40] sm:$0xff]  }
 0x830   : > { %1603 = vmatprep.subr.bf16.mxu0 %v2501_v23  ;;  %v1374_v23 = vld [vmem:[%s3182_s10] sm:$0xf] }
 0x831   : > { %v1387_v25 = vrot.slane %v1374_v23, %v511_v46  ;;  %v1391_v29 = vrot.slane %v1374_v23, %v1390_v24 }
 0x833   : > { %1604 = vmatpush1.bf16.msra.mxu0 %v2499_v21  ;;  %v2557_v21 = vld [vmem:[%s3183_s11 + $0x80] sm:$0xff]  }
 0x834   : > { %1605 = vmatprep.subr.bf16.mxu0 %v2507_v1  ;;  %v1379_v1 = vrot.slane %v1374_v23, %v503_v44 }
 0x837   : > { %1606 = vmatpush1.bf16.msra.mxu0 %v2505_v26 }
 0x838   : > { %1607 = vmatprep.subr.bf16.mxu0 %v2513_v28  ;;  %v1383_v28 = vrot.slane %v1374_v23, %v507_v43 }
 0x83b   : > { %1608 = vmatpush1.bf16.msra.mxu0 %v2511_v30 }
 0x83c   : > { %1609 = vmatprep.subr.bf16.mxu0 %v2519_v32 }
 0x83f   : > { %1610 = vmatpush1.bf16.msra.mxu0 %v2517_v34 }
 0x840   : > { %1611 = vmatprep.subr.bf16.mxu0 %v2525_v36 }
 0x843   : > { %1612 = vmatpush1.bf16.msra.mxu0 %v2523_v38 }
 0x844   : > { %2312 = vmatprep.subr.bf16.mxu0 %v2527_v54 }
 0x8b0   : > { %v1309_v11 = vpop.xlane.xlu0 %1308 }
 0x8b1   : > { %v1310_v12 = vmul.f32 0.0078125, %v1309_v11  ;;  %v2547_v11 = vld [vmem:[%s3183_s11 + $0xd0] sm:$0xff]  }
 0x8b3   : > { %v1311_v13 = vsub.f32 %v2916_v63, %v1310_v12  ;;  %v2548_v12 = vld [vmem:[%s3183_s11 + $0x10] sm:$0xff]  }
 0x8b5   : > { %v1312_v14 = vmul.f32 %v1311_v13, %v1311_v13 }
 0x8b7   : > { %1313 = vadd.xlane.f32.xlu1 %v1312_v14  ;;  %v2550_v14 = vld [vmem:[%s3183_s11 + $0x48] sm:$0xff]  }
 0x940   : > { %v1314_v39 = vpop.xlane.xlu1 %1313 }
 0x941   : > { %v1315_v40 = vmul.f32 0.0078125, %v1314_v39 }
 0x943   : > { %v1316_v41 = vadd.f32 1e-06, %v1315_v40 }
 0x945   : > { %2576 = vrsqrt.f32 %v1316_v41 }
 0x952   : > { %v2577_v45 = vpop.eup %2576 }
 0x953   : > { %v1318_v48 = vmul.f32 %v2577_v45, %v1311_v13  ;;  %v2549_v13 = vld [vmem:[%s3183_s11 + $0x90] sm:$0xff]  }
 0x955   : > { %v1325_v50 = vmul.f32 %v2187_v47, %v1318_v48 }
 0x957   : > { %v1332_v51 = vadd.f32 %v2188_v49, %v1325_v50 }
 0x959   : > { %v1333_v52 = vpack.c.bf16 %v1332_v51, %v1332_v51 }
 0x95b   : > { %1589 = vmatmul.mubr.bf16.vlgmr.msra.gmra.mxu1 %v1333_v52  ;;  %1630 = vmatmul.mubr.bf16.vlgmr.msra.gmra.mxu0 %v1333_v52 }
 0x95c   : > { %2291 = vmatpush3.bf16.msra.mxu1 %v2528_v55  ;;  %2313 = vmatpush3.bf16.msra.mxu0 %v2529_v56 }
 0x95d   : > { %2292 = vmatprep.subr.bf16.mxu1 %v2530_v3  ;;  %2314 = vmatprep.subr.bf16.mxu0 %v2531_v57 }
 0x960   : > { %2293 = vmatpush3.bf16.msra.mxu1 %v2532_v58  ;;  %2315 = vmatpush3.bf16.msra.mxu0 %v2533_v59 }
 0x961   : > { %2294 = vmatprep.subr.bf16.mxu1 %v2534_v60  ;;  %2316 = vmatprep.subr.bf16.mxu0 %v2535_v61 }
 0x964   : > { %2295 = vmatpush3.bf16.msra.mxu1 %v2536_v62  ;;  %2317 = vmatpush3.bf16.msra.mxu0 %v2537_v2 }
 0x965   : > { %2296 = vmatprep.subr.bf16.mxu1 %v2538_v4  ;;  %2318 = vmatprep.subr.bf16.mxu0 %v2539_v5 }
 0x968   : > { %2297 = vmatpush3.bf16.msra.mxu1 %v2540_v22  ;;  %2319 = vmatpush3.bf16.msra.mxu0 %v2541_v6 }
 0x969   : > { %2298 = vmatprep.subr.bf16.mxu1 %v2542_v0  ;;  %2320 = vmatprep.subr.bf16.mxu0 %v2543_v7 }
 0x96c   : > { %2299 = vmatpush3.bf16.msra.mxu1 %v2544_v8  ;;  %2321 = vmatpush3.bf16.msra.mxu0 %v2545_v9 }
 0x96d   : > { %2300 = vmatprep.subr.bf16.mxu1 %v2546_v10  ;;  %2322 = vmatprep.subr.bf16.mxu0 %v2547_v11 }
 0x970   : > { %2301 = vmatpush3.bf16.msra.mxu1 %v2548_v12  ;;  %2323 = vmatpush3.bf16.msra.mxu0 %v2549_v13 }
 0x971   : > { %2302 = vmatprep.subr.bf16.mxu1 %v2550_v14  ;;  %2324 = vmatprep.subr.bf16.mxu0 %v2551_v15 }
 0x974   : > { %2303 = vmatpush3.bf16.msra.mxu1 %v2552_v16  ;;  %2325 = vmatpush3.bf16.msra.mxu0 %v2553_v17 }
 0x975   : > { %2304 = vmatprep.subr.bf16.mxu1 %v2554_v18  ;;  %2326 = vmatprep.subr.bf16.mxu0 %v2555_v19 }
 0x978   : > { %2305 = vmatpush3.bf16.msra.mxu1 %v2556_v20  ;;  %2327 = vmatpush3.bf16.msra.mxu0 %v2557_v21 }
 0xa1b   : > { %v1590_v26 = vpop.f32.mrf.mxu1  ;;  %v1631_v27 = vpop.f32.mrf.mxu0 }
 0xa1c   : > { %v3128_v30 = vadd.f32 %v1590_v26, %v1379_v1  ;;  %v3130_v31 = vadd.f32 %v1631_v27, %v1387_v25 }
 0xa1d   : > { %v1592_v32 = vpop.f32.mrf.mxu1  ;;  %v1633_v33 = vpop.f32.mrf.mxu0 }
 0xa1e   : > { %v3133_v34 = vmul.f32 0.70710677, %v3128_v30  ;;  %v3136_v44 = vmul.f32 0.70710677, %v3130_v31  ;;  %v3138_v35 = vadd.f32 %v1592_v32, %v1383_v28  ;;  %v3140_v46 = vadd.f32 %v1633_v33, %v1391_v29 }
 0xa1f   : > { %v1594_v36 = vpop.f32.mrf.mxu1  ;;  %v1635_v42 = vpop.f32.mrf.mxu0 }
 0xa20   : > { %v1654_v43 = vand.u32 2147483647, %v3133_v34  ;;  %v1656_v37 = vand.u32 2147483647, %v3136_v44  ;;  %v3145_v38 = vmul.f32 0.70710677, %v3138_v35 }
 0xa21   : > { %v1595_v39 = vpop.f32.mrf.mxu1  ;;  %v1636_v40 = vpop.f32.mrf.mxu0  ;;  %v3149_v48 = vmul.f32 0.70710677, %v3140_v46  ;;  %vm1646_vm8 = vcmp.ge.f32.partialorder %v3133_v34, 0.0  ;;  %vm1648_vm9 = vcmp.ge.f32.partialorder %v3136_v44, 0.0 }
 0xa22   : > { %v1658_v41 = vmul.f32 0.3275911, %v1654_v43  ;;  %v1660_v45 = vmul.f32 0.3275911, %v1656_v37  ;;  %v1655_v47 = vand.u32 2147483647, %v3145_v38 }
 0xa23   : > { %v1657_v53 = vand.u32 2147483647, %v3149_v48  ;;  %v1706_v56 = vsub.f32 0.0, %v1654_v43  ;;  %v1708_v3 = vsub.f32 0.0, %v1656_v37  ;;  %vm1647_vm10 = vcmp.ge.f32.partialorder %v3145_v38, 0.0 }
 0xa24   : > { %v1662_v49 = vadd.f32 1.0, %v1658_v41  ;;  %v1664_v50 = vadd.f32 1.0, %v1660_v45  ;;  %v1659_v51 = vmul.f32 0.3275911, %v1655_v47  ;;  %v1707_v58 = vsub.f32 0.0, %v1655_v47 }
 0xa25   : > { %v1661_v54 = vmul.f32 0.3275911, %v1657_v53  ;;  %v1710_v57 = vmul.f32 %v1706_v56, %v1654_v43  ;;  %v1712_v59 = vmul.f32 %v1708_v3, %v1656_v37  ;;  %v1709_v61 = vsub.f32 0.0, %v1657_v53 }
 0xa26   : > { %2578 = vrcp.f32 %v1662_v49  ;;  %v1663_v52 = vadd.f32 1.0, %v1659_v51  ;;  %v1711_v5 = vmul.f32 %v1707_v58, %v1655_v47  ;;  %v2609_v3 = vmov -1.0  }
 0xa27   : > { %2580 = vrcp.f32 %v1664_v50  ;;  %v1665_v55 = vadd.f32 1.0, %v1661_v54  ;;  %v1714_v4 = vmul.f32 1.442695, %v1710_v57  ;;  %v1718_v6 = vmul.f32 1.442695, %v1712_v59 }
 0xa28   : > { %2582 = vrcp.f32 %v1663_v52  ;;  %v1713_v9 = vmul.f32 %v1709_v61, %v1657_v53  ;;  %v1716_v12 = vmul.f32 1.442695, %v1711_v5  ;;  %v1650_v57 = vsel %vm1646_vm8, 1.0, %v2609_v3 }
 0xa29   : > { %2584 = vrcp.f32 %v1665_v55  ;;  %vm1649_vm11 = vcmp.ge.f32.partialorder %v3149_v48, 0.0 }
 0xa2a   : > { %2586 = vpow2.f32 %v1714_v4  ;;  %v1720_v19 = vmul.f32 1.442695, %v1713_v9 }
 0xa2b   : > { %2588 = vpow2.f32 %v1718_v6  ;;  %v1651_v6 = vsel %vm1647_vm10, 1.0, %v2609_v3 }
 0xa2c   : > { %2590 = vpow2.f32 %v1716_v12 }
 0xa2d   : > { %2592 = vpow2.f32 %v1720_v19 }
 0xa33   : > { %v2579_v60 = vpop.eup %2578 }
 0xa34   : > { %v2581_v62 = vpop.eup %2580  ;;  %v1670_v2 = vmul.f32 1.0614054, %v2579_v60 }
 0xa35   : > { %v1672_v22 = vmul.f32 1.0614054, %v2581_v62  ;;  %v2583_v7 = vpop.eup %2582 }
 0xa36   : > { %v1674_v0 = vadd.f32 -1.4531521, %v1670_v2  ;;  %v1671_v11 = vmul.f32 1.0614054, %v2583_v7  ;;  %v2585_v14 = vpop.eup %2584 }
 0xa37   : > { %v1676_v8 = vadd.f32 -1.4531521, %v1672_v22  ;;  %v1673_v18 = vmul.f32 1.0614054, %v2585_v14  ;;  %v2587_v41 = vpop.eup %2586 }
 0xa38   : > { %v1678_v10 = vmul.f32 %v2579_v60, %v1674_v0  ;;  %v1675_v16 = vadd.f32 -1.4531521, %v1671_v11  ;;  %v2589_v49 = vpop.eup %2588  ;;  %v1653_v11 = vsel %vm1649_vm11, 1.0, %v2609_v3 }
 0xa39   : > { %v1680_v13 = vmul.f32 %v2581_v62, %v1676_v8  ;;  %v1677_v24 = vadd.f32 -1.4531521, %v1673_v18  ;;  %v2591_v56 = vpop.eup %2590 }
 0xa3a   : > { %v1682_v15 = vadd.f32 1.4214138, %v1678_v10  ;;  %v1679_v21 = vmul.f32 %v2583_v7, %v1675_v16  ;;  %v2593_v34 = vpop.eup %2592  ;;  %v1639_v10 = vmul.f32 0.5, %v3138_v35  ;;  %v1641_v16 = vmul.f32 0.5, %v3140_v46  ;;  %v2189_v46 = vld [vmem:[%s3184_s12] ss:$0 sm:$0xff] }
 0xa3b   : > { %v1684_v17 = vadd.f32 1.4214138, %v1680_v13  ;;  %v1681_v27 = vmul.f32 %v2585_v14, %v1677_v24 }
 0xa3c   : > { %v1686_v20 = vmul.f32 %v2579_v60, %v1682_v15  ;;  %v1683_v25 = vadd.f32 1.4214138, %v1679_v21 }
 0xa3d   : > { %v1688_v23 = vmul.f32 %v2581_v62, %v1684_v17  ;;  %v1685_v33 = vadd.f32 1.4214138, %v1681_v27 }
 0xa3e   : > { %v1690_v1 = vadd.f32 -0.28449672, %v1686_v20  ;;  %v1687_v29 = vmul.f32 %v2583_v7, %v1683_v25 }
 0xa3f   : > { %v1692_v26 = vadd.f32 -0.28449672, %v1688_v23  ;;  %v1689_v37 = vmul.f32 %v2585_v14, %v1685_v33 }
 0xa40   : > { %v1694_v28 = vmul.f32 %v2579_v60, %v1690_v1  ;;  %v1691_v42 = vadd.f32 -0.28449672, %v1687_v29  ;;  %v1341_v29 = vadd.f32 %v2189_v46, %v2916_v63 }
 0xa41   : > { %v1696_v32 = vmul.f32 %v2581_v62, %v1692_v26  ;;  %v1693_v47 = vadd.f32 -0.28449672, %v1689_v37 }
 0xa42   : > { %v1698_v36 = vadd.f32 0.2548296, %v1694_v28  ;;  %v1695_v40 = vmul.f32 %v2583_v7, %v1691_v42 }
 0xa43   : > { %v1700_v43 = vadd.f32 0.2548296, %v1696_v32  ;;  %v1697_v53 = vmul.f32 %v2585_v14, %v1693_v47 }
 0xa44   : > { %v1702_v39 = vmul.f32 %v2579_v60, %v1698_v36  ;;  %v1699_v51 = vadd.f32 0.2548296, %v1695_v40 }
 0xa45   : > { %v1704_v45 = vmul.f32 %v2581_v62, %v1700_v43  ;;  %v1701_v59 = vadd.f32 0.2548296, %v1697_v53  ;;  %v1652_v62 = vsel %vm1648_vm9, 1.0, %v2609_v3 }
 0xa46   : > { %v1722_v50 = vmul.f32 %v2587_v41, %v1702_v39  ;;  %v1703_v55 = vmul.f32 %v2583_v7, %v1699_v51  ;;  %v1638_v7 = vmul.f32 0.5, %v3128_v30 }
 0xa47   : > { %v1724_v52 = vmul.f32 %v2589_v49, %v1704_v45  ;;  %v1705_v2 = vmul.f32 %v2585_v14, %v1701_v59  ;;  %v1640_v14 = vmul.f32 0.5, %v3130_v31 }
 0xa48   : > { %v1726_v54 = vsub.f32 1.0, %v1722_v50  ;;  %v1723_v61 = vmul.f32 %v2591_v56, %v1703_v55 }
 0xa49   : > { %v1728_v58 = vsub.f32 1.0, %v1724_v52  ;;  %v1725_v44 = vmul.f32 %v2593_v34, %v1705_v2 }
 0xa4a   : > { %v1730_v60 = vmul.f32 %v1726_v54, %v1650_v57  ;;  %v1727_v5 = vsub.f32 1.0, %v1723_v61 }
 0xa4b   : > { %v1732_v4 = vmul.f32 %v1728_v58, %v1652_v62  ;;  %v1729_v8 = vsub.f32 1.0, %v1725_v44 }
 0xa4c   : > { %v1734_v22 = vadd.f32 1.0, %v1730_v60  ;;  %v1731_v0 = vmul.f32 %v1727_v5, %v1651_v6 }
 0xa4d   : > { %v1736_v9 = vadd.f32 1.0, %v1732_v4  ;;  %v1733_v13 = vmul.f32 %v1729_v8, %v1653_v11 }
 0xa4e   : > { %v1735_v38 = vadd.f32 1.0, %v1731_v0  ;;  %v1738_v12 = vmul.f32 %v1734_v22, %v1638_v7 }
 0xa4f   : > { %v1737_v17 = vadd.f32 1.0, %v1733_v13  ;;  %v1740_v18 = vmul.f32 %v1736_v9, %v1640_v14 }
 0xa50   : > { %v1739_v15 = vmul.f32 %v1735_v38, %v1639_v10  ;;  %v1742_v19 = vpack.c.bf16 %v1738_v12, %v1738_v12 }
 0xa51   : > { %v1741_v20 = vmul.f32 %v1737_v17, %v1641_v16  ;;  %v1744_v21 = vpack.c.bf16 %v1740_v18, %v1740_v18 }
 0xa52   : > { %v1743_v48 = vpack.c.bf16 %v1739_v15, %v1739_v15 }
 0xa53   : > { %v1745_v30 = vpack.c.bf16 %v1741_v20, %v1741_v20 }
 0xa54   : > { %2034 = vmatprep.mubr.bf16.mxu1 %v1743_v48 }
 0xa55   : > { %2035 = vmatmul.mubr.bf16.vlgmr.msra.gmra.mxu1 %v1742_v19  ;;  %2074 = vmatprep.mubr.bf16.mxu0 %v1745_v30 }
 0xa56   : > { %2075 = vmatmul.mubr.bf16.vlgmr.msra.gmra.mxu0 %v1744_v21 }
 0xb15   : > { %v2306_v35 = vpop.f32.mrf.mxu1 }
 0xb16   : > { %v2328_v24 = vpop.f32.mrf.mxu0 }
 0xb17   : > { %v2307_v23 = vpop.f32.mrf.mxu1 }
 0xb18   : > { %v2308_v1 = vadd.f32 %v2307_v23, %v2306_v35  ;;  %v2329_v25 = vpop.f32.mrf.mxu0 }
 0xb19   : > { %v2309_v31 = vpop.f32.mrf.mxu1  ;;  %v2330_v26 = vadd.f32 %v2329_v25, %v2328_v24 }
 0xb1a   : > { %v2331_v28 = vpop.f32.mrf.mxu0 }
 0xb1b   : > { %v2310_v27 = vpop.f32.mrf.mxu1  ;;  %v2077_v32 = vadd.f32 %v2330_v26, %v2308_v1 }
 0xb1c   : > { %v2332_v33 = vpop.f32.mrf.mxu0 }
 0xb1d   : > { %v2082_v36 = vadd.f32 %v2077_v32, %v1341_v29 }
 0xb1f   : > { %2083 = vst [vmem:[%s435_s30] sm:$0xff] %v2082_v36 }
 0xb20 PF: > { %s23_s25 = sadd.s32 1, %s2600_s25  }
 0xb21   : > { %p20_p4 = scmp.ge.s32.totalorder %s23_s25, 4  }
 0xb23   :  { %22 = sbr.rel (!%p20_p4) target bundleno = 1 (0x1), region = 102 }

</bundles_post_ra>
